<compile_context>
chip_gen: v6e
topology: v6e:2x2x1
jax: 0.10.0
libtpu: 0.0.40
codegen_flags: <defaults>
</compile_context>

<pallas_src>
import functools

import jax
import jax.numpy as jnp
from jax.experimental import pallas as pl
from jax.experimental.pallas import tpu as pltpu


CPAD = 128                      # lane-dense conv channel count (multiple of 128)
VMEM_LIMIT = 40 * 1024 * 1024   # <= ~48 MiB so v7x (64 MiB physical) keeps headroom


# ----------------------------- Pallas kernels ------------------------------

def _matmul_bias_kernel(x_ref, w_ref, b_ref, o_ref, *, relu):
    acc = jnp.dot(x_ref[...], w_ref[...], preferred_element_type=jnp.float32)
    acc = acc + b_ref[...]
    if relu:
        acc = jnp.maximum(acc, 0.0)
    o_ref[...] = acc.astype(o_ref.dtype)


def matmul_bias(x, w, b, *, relu=False, out_dtype=jnp.float32, tm_max=512):
    """x: (M, K), w: (K, N), b: (N,) -> (M, N). bf16 operands, f32 accumulate.

    Gridded over M with a cdiv grid (ragged tail handled by Pallas block masking).
    """
    M, K = x.shape
    K2, N = w.shape
    assert K == K2
    tm = M if M <= tm_max else tm_max
    grid = (pl.cdiv(M, tm),)
    return pl.pallas_call(
        functools.partial(_matmul_bias_kernel, relu=relu),
        out_shape=jax.ShapeDtypeStruct((M, N), out_dtype),
        grid_spec=pltpu.PrefetchScalarGridSpec(
            num_scalar_prefetch=0,
            grid=grid,
            in_specs=[pl.BlockSpec((tm, K), lambda i: (i, 0)),
                      pl.BlockSpec((K, N), lambda i: (0, 0)),
                      pl.BlockSpec((1, N), lambda i: (0, 0))],
            out_specs=pl.BlockSpec((tm, N), lambda i: (i, 0)),
        ),
        compiler_params=pltpu.CompilerParams(
            dimension_semantics=("parallel",),
            vmem_limit_bytes=VMEM_LIMIT),
    )(x.astype(jnp.bfloat16), w.astype(jnp.bfloat16),
      b.reshape(1, N).astype(jnp.float32))


def _conv_tap_kernel(x_ref, w_ref, b_ref, o_ref, *, Ho, Wo, C, gap):
    """3x3 / stride-2 / pad-1 conv for ONE image from its space-to-depth layout.

    x_ref: (1, Hq, Wq, 4C)  - 4 parity planes packed along lanes (row-parity major).
    w_ref: (9, C, Cout)     - per-tap weight matrices.
    The 9 taps are contiguous-window matmuls accumulated in f32 (no strided reads,
    no im2col materialization).  gap=True fuses the global average pool (sublane mean).
    """
    x = x_ref[0]                                      # (Hq, Wq, 4C) bf16
    cout = o_ref.shape[-1]
    acc = jnp.zeros((Ho * Wo, cout), jnp.float32)
    for ky in range(3):
        for kx in range(3):
            c0 = (2 * (ky % 2) + (kx % 2)) * C        # parity plane lane offset
            win = x[ky // 2:ky // 2 + Ho, kx // 2:kx // 2 + Wo, c0:c0 + C]
            acc = acc + jnp.dot(win.reshape(Ho * Wo, C), w_ref[ky * 3 + kx],
                                preferred_element_type=jnp.float32)
    y = jnp.maximum(acc + b_ref[...], 0.0)            # (Ho*Wo, Cout) f32
    if gap:
        o_ref[0] = jnp.mean(y, axis=0, keepdims=True).astype(o_ref.dtype)   # (1, Cout)
    else:
        o_ref[0] = y.reshape(Ho, Wo, cout).astype(o_ref.dtype)


def _fused_bilstm_fc_kernel(fp_ref, wih_ref, gb_ref, wblk_ref, fcw_ref, fcb_ref,
                            o_ref, gx_ref, *, T, B, H, unroll):
    """Fused bi-LSTM aggregator + final FC.

    Prologue : one MXU matmul computes the input projection for BOTH directions and all
               timesteps (bwd direction uses time-reversed features packed in the upper
               K lanes of fp), plus the per-timestep gate bias (tokens + b_ih + b_hh).
    Recurrence: single fused state (B, 2H) against a block-diagonal (2H, 8H) Whh; gates
               are laid out gate-major [i|f|g|o] x [fwd|bwd]; full-width sigmoid/tanh
               with a lane-mask select for the 'g' block.
    Epilogue : Linear(2H -> out) with K zero-padded to 128, lane-dense output.
    """
    G = 8 * H
    mm = jnp.dot(fp_ref[...], wih_ref[...], preferred_element_type=jnp.float32)  # (T*B, G)
    gx_ref[...] = mm.reshape(T, B, G) + gb_ref[...]

    wblk = wblk_ref[...]                                   # (2H, G) bf16
    lane = jax.lax.broadcasted_iota(jnp.int32, (B, G), 1)
    g_sel = (lane >= 4 * H) & (lane < 6 * H)               # 'g' (cell candidate) block

    def step(s, carry):
        h, c = carry                                       # h: (B,2H) bf16, c: (B,2H) f32
        gates = gx_ref[s] + jnp.dot(h, wblk, preferred_element_type=jnp.float32)
        sig = jax.nn.sigmoid(gates)                        # full-width EUP
        th = jnp.tanh(gates)
        act = jnp.where(g_sel, th, sig)
        i = act[:, 0:2 * H]
        f = act[:, 2 * H:4 * H]
        g = act[:, 4 * H:6 * H]
        o = act[:, 6 * H:8 * H]
        c = f * c + i * g
        h = (o * jnp.tanh(c)).astype(jnp.bfloat16)
        return (h, c)

    h0 = jnp.zeros((B, 2 * H), jnp.bfloat16)
    c0 = jnp.zeros((B, 2 * H), jnp.float32)
    h_fin, _ = jax.lax.fori_loop(0, T, step, (h0, c0), unroll=unroll)

    # h_fin = [fwd state after t=T-1 | bwd state after t=0]  ==  t_out of the module.
    fck = fcw_ref.shape[0]
    if fck > 2 * H:
        h_pad = jnp.concatenate(
            [h_fin, jnp.zeros((B, fck - 2 * H), jnp.bfloat16)], axis=1)
    else:
        h_pad = h_fin
    o_ref[...] = (jnp.dot(h_pad, fcw_ref[...], preferred_element_type=jnp.float32)
                  + fcb_ref[...])


# ------------------------------- wrappers -----------------------------------

def _im2col_nhwc(x_nhwc, k, stride, pad):
    """Channels-last im2col (first conv only): (N,H,W,C) -> (N*Ho*Wo, k*k*C)."""
    N, H, W, C = x_nhwc.shape
    xp = jnp.pad(x_nhwc, ((0, 0), (pad, pad), (pad, pad), (0, 0)))
    Ho = (H + 2 * pad - k) // stride + 1
    Wo = (W + 2 * pad - k) // stride + 1
    cols = []
    for ky in range(k):
        for kx in range(k):
            cols.append(xp[:, ky:ky + stride * Ho:stride, kx:kx + stride * Wo:stride, :])
    patches = jnp.concatenate(cols, axis=-1)
    return patches.reshape(N * Ho * Wo, k * k * C), Ho, Wo


def _space_to_depth_pad(x_nhwc, pad=1):
    """Single-pass pad + 2x2 space-to-depth: (N,H,W,C) -> (N, Hq, Wq, 4C).

    Lane block order is (row-parity, col-parity), matching _conv_tap_kernel's c0 math."""
    N, H, W, C = x_nhwc.shape
    Hp, Wp = H + 2 * pad, W + 2 * pad
    eh, ew = Hp % 2, Wp % 2
    xp = jnp.pad(x_nhwc, ((0, 0), (pad, pad + eh), (pad, pad + ew), (0, 0)))
    Hq, Wq = (Hp + eh) // 2, (Wp + ew) // 2
    xq = xp.reshape(N, Hq, 2, Wq, 2, C)
    xq = jnp.transpose(xq, (0, 1, 3, 2, 4, 5)).reshape(N, Hq, Wq, 4 * C)
    return xq


def conv_s2d(x_nhwc, w_taps, b, *, gap):
    """3x3/stride-2/pad-1 conv (+ReLU, optionally +GAP) via the per-image tap kernel."""
    N, H, W, C = x_nhwc.shape
    Cout = w_taps.shape[-1]
    Ho = (H - 1) // 2 + 1
    Wo = (W - 1) // 2 + 1
    xq = _space_to_depth_pad(x_nhwc)                       # (N, Hq, Wq, 4C)
    Hq, Wq = xq.shape[1], xq.shape[2]
    kern = functools.partial(_conv_tap_kernel, Ho=Ho, Wo=Wo, C=C, gap=gap)
    if gap:
        out_shape = jax.ShapeDtypeStruct((N, 1, Cout), jnp.bfloat16)
        out_spec = pl.BlockSpec((1, 1, Cout), lambda n: (n, 0, 0))
    else:
        out_shape = jax.ShapeDtypeStruct((N, Ho, Wo, Cout), jnp.bfloat16)
        out_spec = pl.BlockSpec((1, Ho, Wo, Cout), lambda n: (n, 0, 0, 0))
    return pl.pallas_call(
        kern,
        out_shape=out_shape,
        grid_spec=pltpu.PrefetchScalarGridSpec(
            num_scalar_prefetch=0,
            grid=(N,),
            in_specs=[pl.BlockSpec((1, Hq, Wq, 4 * C), lambda n: (n, 0, 0, 0)),
                      pl.BlockSpec((9, C, Cout), lambda n: (0, 0, 0)),
                      pl.BlockSpec((1, Cout), lambda n: (0, 0))],
            out_specs=out_spec,
        ),
        compiler_params=pltpu.CompilerParams(
            dimension_semantics=("arbitrary",),
            vmem_limit_bytes=VMEM_LIMIT),
    )(xq.astype(jnp.bfloat16), w_taps.astype(jnp.bfloat16),
      b.reshape(1, Cout).astype(jnp.float32))


def fused_bilstm_fc(feats_pair, wih_pair, gb, w_blk, fc_w, fc_b, *, T, B, H):
    """feats_pair: (T*B, 2*Cfe) bf16, gb: (T,B,8H) f32 -> (B, FCN) f32 (padded FC output)."""
    G = 8 * H
    FCN = fc_w.shape[1]
    unroll = True if T <= 8 else 4
    kern = functools.partial(_fused_bilstm_fc_kernel, T=T, B=B, H=H, unroll=unroll)
    TB, K2 = feats_pair.shape
    return pl.pallas_call(
        kern,
        out_shape=jax.ShapeDtypeStruct((B, FCN), jnp.float32),
        grid_spec=pltpu.PrefetchScalarGridSpec(
            num_scalar_prefetch=0,
            grid=(1,),
            in_specs=[pl.BlockSpec((TB, K2), lambda i: (0, 0)),
                      pl.BlockSpec(wih_pair.shape, lambda i: (0, 0)),
                      pl.BlockSpec((T, B, G), lambda i: (0, 0, 0)),
                      pl.BlockSpec(w_blk.shape, lambda i: (0, 0)),
                      pl.BlockSpec(fc_w.shape, lambda i: (0, 0)),
                      pl.BlockSpec(fc_b.shape, lambda i: (0, 0))],
            out_specs=pl.BlockSpec((B, FCN), lambda i: (0, 0)),
            scratch_shapes=[pltpu.VMEM((T, B, G), jnp.float32)],
        ),
        compiler_params=pltpu.CompilerParams(
            dimension_semantics=("arbitrary",),
            vmem_limit_bytes=VMEM_LIMIT),
    )(feats_pair.astype(jnp.bfloat16), wih_pair, gb.astype(jnp.float32),
      w_blk, fc_w, fc_b)


# ------------------------------ parameters -----------------------------------

def _to_gate_major(a_f, a_b, H):
    """(..., 4H) per-direction arrays in PyTorch i,f,g,o order -> (..., 8H) gate-major,
    direction-interleaved: [i_f i_b | f_f f_b | g_f g_b | o_f o_b]."""
    parts = []
    for k in range(4):
        parts.append(a_f[..., k * H:(k + 1) * H])
        parts.append(a_b[..., k * H:(k + 1) * H])
    return jnp.concatenate(parts, axis=-1)


def init_params(key, *, in_ch=1, fe_channels=(32, 64, 128), hidden=32, out_ch=3,
                with_tokens=True):
    assert len(fe_channels) >= 2
    assert fe_channels[-1] == CPAD, "LSTM feature dim assumes last conv has CPAD channels"
    keys = jax.random.split(key, 32)
    ki = 0
    p = {}

    # --- first conv: repeat(k=3) folded into weights, im2col-matmul layout, K padded ---
    c0 = fe_channels[0]
    w1 = jax.random.normal(keys[ki], (c0, 3 * in_ch, 3, 3), jnp.float32) / jnp.sqrt(3 * in_ch * 9)
    b1 = jax.random.normal(keys[ki + 1], (c0,), jnp.float32) * 0.01
    ki += 2
    w1f = w1.reshape(c0, 3, in_ch, 3, 3).sum(axis=1)               # fold the 3x channel tile
    K1 = 9 * in_ch
    Kp = ((K1 + 127) // 128) * 128
    w1_hwio = jnp.transpose(w1f, (2, 3, 1, 0)).reshape(K1, c0)     # (ky,kx,Cin) x Cout
    p['conv1_w'] = (jnp.zeros((Kp, CPAD), jnp.float32)
                    .at[:K1, :c0].set(w1_hwio)).astype(jnp.bfloat16)
    p['conv1_b'] = jnp.zeros((CPAD,), jnp.float32).at[:c0].set(b1)
    p['conv1_k'] = Kp

    # --- later conv layers: per-tap (9, CPAD, CPAD) weights for the s2d kernel ---
    taps_w, taps_b = [], []
    c_prev = c0
    for c in fe_channels[1:]:
        w = jax.random.normal(keys[ki], (c, c_prev, 3, 3), jnp.float32) / jnp.sqrt(c_prev * 9)
        bb = jax.random.normal(keys[ki + 1], (c,), jnp.float32) * 0.01
        ki += 2
        wt = jnp.zeros((9, CPAD, CPAD), jnp.float32)
        for ky in range(3):
            for kx in range(3):
                wt = wt.at[ky * 3 + kx, :c_prev, :c].set(jnp.transpose(w[:, :, ky, kx]))
        taps_w.append(wt.astype(jnp.bfloat16))
        taps_b.append(jnp.zeros((CPAD,), jnp.float32).at[:c].set(bb))
        c_prev = c
    p['conv_taps_w'] = taps_w
    p['conv_taps_b'] = taps_b

    # --- bidirectional LSTM (num_layers=1) + final FC, packed for the fused kernel ---
    Cfe = CPAD
    H = hidden
    D = Cfe + (2 if with_tokens else 0)
    wih, whh, bih, bhh = [], [], [], []
    for _ in range(2):                                              # forward, backward
        wih.append(jax.random.normal(keys[ki], (4 * H, D), jnp.float32) / jnp.sqrt(D))
        whh.append(jax.random.normal(keys[ki + 1], (4 * H, H), jnp.float32) / jnp.sqrt(H))
        bih.append(jax.random.normal(keys[ki + 2], (4 * H,), jnp.float32) * 0.01)
        bhh.append(jax.random.normal(keys[ki + 3], (4 * H,), jnp.float32) * 0.01)
        ki += 4
    wihT_f, wihT_b = wih[0].T, wih[1].T                             # (D, 4H)
    zf = jnp.zeros((Cfe, 4 * H), jnp.float32)
    # Doubled-K projection weight: rows [0:Cfe) carry feats[t] -> fwd gate columns only,
    # rows [Cfe:2Cfe) carry feats[T-1-t] -> bwd gate columns only.
    p['wih_pair'] = _to_gate_major(
        jnp.concatenate([wihT_f[:Cfe], zf], axis=0),
        jnp.concatenate([zf, wihT_b[:Cfe]], axis=0), H).astype(jnp.bfloat16)   # (2Cfe, 8H)
    p['tok_w_f'] = wihT_f[Cfe:]                                     # (2, 4H) or (0, 4H)
    p['tok_w_b'] = wihT_b[Cfe:]
    p['b_gates'] = _to_gate_major((bih[0] + bhh[0])[None, :],
                                  (bih[1] + bhh[1])[None, :], H)    # (1, 8H)
    zh = jnp.zeros((H, 4 * H), jnp.float32)
    p['w_blk'] = _to_gate_major(
        jnp.concatenate([whh[0].T, zh], axis=0),
        jnp.concatenate([zh, whh[1].T], axis=0), H).astype(jnp.bfloat16)       # (2H, 8H)

    fc_w = jax.random.normal(keys[ki], (out_ch, 2 * H), jnp.float32) / jnp.sqrt(2 * H)
    fc_b = jax.random.normal(keys[ki + 1], (out_ch,), jnp.float32) * 0.01
    FCK = ((2 * H + 127) // 128) * 128
    FCN = ((out_ch + 127) // 128) * 128
    p['fc_w'] = (jnp.zeros((FCK, FCN), jnp.float32)
                 .at[:2 * H, :out_ch].set(fc_w.T)).astype(jnp.bfloat16)
    p['fc_b'] = jnp.zeros((1, FCN), jnp.float32).at[0, :out_ch].set(fc_b)
    return p


# ------------------------------ forward pass ----------------------------------

def mr_cnn_lstm_forward(params, x, *, with_tokens=True, out_ch=3):
    """x: (B, CH, R, C, S) float32 -> {'main': (B, out_ch)}."""
    B, CH, R, C, S = x.shape
    N = B * S

    # rearrange 'b ch r c s -> (b s) r c ch' (channels-last); repeat(k=3) folded in weights.
    t_in = jnp.transpose(x, (0, 4, 2, 3, 1)).reshape(N, R, C, CH).astype(jnp.bfloat16)

    # conv1: XLA im2col (tiny raw input), K padded to 128 for lane-dense loads.
    patches, Ho, Wo = _im2col_nhwc(t_in, 3, 2, 1)
    Kp = params['conv1_w'].shape[0]
    if Kp > patches.shape[1]:
        patches = jnp.pad(patches, ((0, 0), (0, Kp - patches.shape[1])))
    h = matmul_bias(patches, params['conv1_w'], params['conv1_b'],
                    relu=True, out_dtype=jnp.bfloat16).reshape(N, Ho, Wo, CPAD)

    # feature-map conv layers: space-to-depth + per-image tap kernel (no im2col in HBM);
    # the last layer fuses the global average pool ('with_gap' resnet avgpool).
    for w_taps, b in zip(params['conv_taps_w'][:-1], params['conv_taps_b'][:-1]):
        h = conv_s2d(h, w_taps, b, gap=False)
    feat = conv_s2d(h, params['conv_taps_w'][-1], params['conv_taps_b'][-1], gap=True)
    feat = feat.reshape(B, S, CPAD)            # '(b s) ch 1 1 -> b (s 1 1) ch'

    # ---- fused bi-LSTM + FC ----
    H = params['w_blk'].shape[0] // 2
    G = 8 * H
    T = S
    f_t = jnp.transpose(feat, (1, 0, 2))                             # (T, B, Cfe) time-major
    feats_pair = jnp.concatenate([f_t, f_t[::-1]], axis=-1).reshape(T * B, 2 * CPAD)

    # Per-timestep gate bias: b_ih + b_hh plus the (tiny) token-feature contribution,
    # so the in-kernel projection keeps K = 128.
    gb = jnp.broadcast_to(params['b_gates'], (T, G))
    if with_tokens:
        tok_slice = jnp.linspace(0.0, 1.0, T)
        tok_superpix = jnp.zeros((T,), jnp.float32)    # fe_out_spat=(1,1) -> single token 0.0
        tok_feat = jnp.stack([tok_slice, tok_superpix], axis=1)      # (T, 2)
        a_f = tok_feat @ params['tok_w_f']                           # fwd reads tok(t)
        a_b = tok_feat[::-1] @ params['tok_w_b']                     # bwd reads tok(T-1-t)
        gb = gb + _to_gate_major(a_f, a_b, H)
    gb = jnp.broadcast_to(gb.reshape(T, 1, G), (T, B, G)).astype(jnp.float32)

    out_pad = fused_bilstm_fc(feats_pair, params['wih_pair'], gb, params['w_blk'],
                              params['fc_w'], params['fc_b'], T=T, B=B, H=H)
    res_out = out_pad[:, :out_ch]
    return {'main': res_out}


# --------------------------------- main --------------------------------------

if __name__ == "__main__":
    key = jax.random.PRNGKey(0)
    k_par, k_inp = jax.random.split(key)

    # Small shapes consistent with the module: B=2, CH=1 (tiled to 3 internally), R=C=16, S=4.
    B, CH, R, C, S = 2, 1, 16, 16, 4
    hidden = 32
    output_channels = 3

    params = init_params(k_par, in_ch=CH, fe_channels=(32, 64, 128),
                         hidden=hidden, out_ch=output_channels, with_tokens=True)
    x = jax.random.normal(k_inp, (B, CH, R, C, S), jnp.float32)

    fwd = jax.jit(functools.partial(mr_cnn_lstm_forward,
                                    with_tokens=True, out_ch=output_channels))
    out = fwd(params, x)
    main = jax.block_until_ready(out['main'])
    assert main.shape == (B, output_channels), main.shape
    assert bool(jnp.all(jnp.isfinite(main)))
    print("KERNEL_OK")
</pallas_src>

<mosaic_0001>
module attributes {stable_mosaic.version = 11 : i64} {
  func.func @_matmul_bias_kernel(%arg0: i32, %arg1: memref<512x128xbf16, #tpu.memory_space<vmem>>, %arg2: memref<128x128xbf16, #tpu.memory_space<vmem>>, %arg3: memref<1x128xf32, #tpu.memory_space<vmem>>, %arg4: memref<512x128xbf16, #tpu.memory_space<vmem>>) attributes {dimension_semantics = [#tpu.dimension_semantics<parallel>], iteration_bounds = array<i64: 1>, scalar_prefetch = 0 : i64, scratch_operands = 0 : i64, tpu.core_type = #tpu.core_type<tc>, window_params = [{transform_indices = @transform_0, window_bounds = array<i64: 512, 128>}, {pipeline_mode = #tpu.pipeline_mode<synchronous>, transform_indices = @transform_1, window_bounds = array<i64: 128, 128>}, {pipeline_mode = #tpu.pipeline_mode<synchronous>, transform_indices = @transform_2, window_bounds = array<i64: 1, 128>}, {transform_indices = @transform_3, window_bounds = array<i64: 512, 128>}]} {
    %c0 = arith.constant 0 : index
    %c0_0 = arith.constant 0 : index
    %0 = vector.load %arg1[%c0, %c0_0] : memref<512x128xbf16, #tpu.memory_space<vmem>>, vector<512x128xbf16>
    %c0_1 = arith.constant 0 : index
    %c0_2 = arith.constant 0 : index
    %1 = vector.load %arg2[%c0_1, %c0_2] : memref<128x128xbf16, #tpu.memory_space<vmem>>, vector<128x128xbf16>
    %cst = arith.constant dense<0.000000e+00> : vector<512x128xf32>
    %2 = tpu.matmul %0, %1, %cst {dimension_numbers = #tpu.dot_dimension_numbers<[1], [0], [0], [1], [0, 0, 1, 1], [], []>} : vector<512x128xbf16>, vector<128x128xbf16>, vector<512x128xf32> -> vector<512x128xf32>
    %c0_3 = arith.constant 0 : index
    %c0_4 = arith.constant 0 : index
    %3 = vector.load %arg3[%c0_3, %c0_4] : memref<1x128xf32, #tpu.memory_space<vmem>>, vector<1x128xf32>
    %4 = vector.broadcast %3 : vector<1x128xf32> to vector<512x128xf32>
    %5 = arith.addf %2, %4 : vector<512x128xf32>
    %cst_5 = arith.constant 0.000000e+00 : f32
    %6 = vector.broadcast %cst_5 : f32 to vector<512x128xf32>
    %7 = arith.maximumf %5, %6 : vector<512x128xf32>
    %8 = arith.truncf %7 : vector<512x128xf32> to vector<512x128xbf16>
    %c0_6 = arith.constant 0 : index
    %c0_7 = arith.constant 0 : index
    %9 = vector.load %arg4[%c0_6, %c0_7] : memref<512x128xbf16, #tpu.memory_space<vmem>>, vector<512x128xbf16>
    tpu.vector_store %arg4[%c0_6, %c0_7], %8 {strides = array<i32>} : memref<512x128xbf16, #tpu.memory_space<vmem>>, vector<512x128xbf16>,
    return
  }
  func.func @transform_0(%arg0: i32) -> (i32, i32) {
    %c0_i32 = arith.constant 0 : i32
    %c0_i32_0 = arith.constant 0 : i32
    return %arg0, %c0_i32 : i32, i32
  }
  func.func @transform_1(%arg0: i32) -> (i32, i32) {
    %c0_i32 = arith.constant 0 : i32
    %c0_i32_0 = arith.constant 0 : i32
    %c0_i32_1 = arith.constant 0 : i32
    return %c0_i32, %c0_i32_0 : i32, i32
  }
  func.func @transform_2(%arg0: i32) -> (i32, i32) {
    %c0_i32 = arith.constant 0 : i32
    %c0_i32_0 = arith.constant 0 : i32
    %c0_i32_1 = arith.constant 0 : i32
    return %c0_i32, %c0_i32_0 : i32, i32
  }
  func.func @transform_3(%arg0: i32) -> (i32, i32) {
    %c0_i32 = arith.constant 0 : i32
    %c0_i32_0 = arith.constant 0 : i32
    return %arg0, %c0_i32 : i32, i32
  }
}

module attributes {stable_mosaic.version = 11 : i64} {
  func.func @_conv_tap_kernel(%arg0: i32, %arg1: memref<1x5x5x512xbf16, #tpu.memory_space<vmem>>, %arg2: memref<9x128x128xbf16, #tpu.memory_space<vmem>>, %arg3: memref<1x128xf32, #tpu.memory_space<vmem>>, %arg4: memref<1x4x4x128xbf16, #tpu.memory_space<vmem>>) attributes {dimension_semantics = [#tpu.dimension_semantics<arbitrary>], iteration_bounds = array<i64: 8>, scalar_prefetch = 0 : i64, scratch_operands = 0 : i64, tpu.core_type = #tpu.core_type<tc>, window_params = [{transform_indices = @transform_0, window_bounds = array<i64: 1, 5, 5, 512>}, {pipeline_mode = #tpu.pipeline_mode<synchronous>, transform_indices = @transform_1, window_bounds = array<i64: 9, 128, 128>}, {pipeline_mode = #tpu.pipeline_mode<synchronous>, transform_indices = @transform_2, window_bounds = array<i64: 1, 128>}, {transform_indices = @transform_3, window_bounds = array<i64: 1, 4, 4, 128>}]} {
    %c0 = arith.constant 0 : index
    %c0_0 = arith.constant 0 : index
    %c0_1 = arith.constant 0 : index
    %c0_2 = arith.constant 0 : index
    %0 = vector.load %arg1[%c0, %c0_0, %c0_1, %c0_2] : memref<1x5x5x512xbf16, #tpu.memory_space<vmem>>, vector<1x5x5x512xbf16>
    %1 = vector.shape_cast %0 : vector<1x5x5x512xbf16> to vector<5x5x512xbf16>
    %cst = arith.constant 0.000000e+00 : f32
    %2 = vector.broadcast %cst : f32 to vector<16x128xf32>
    %3 = vector.extract_strided_slice %1 {offsets = [0, 0, 0], sizes = [4, 4, 128], strides = [1, 1, 1]} : vector<5x5x512xbf16> to vector<4x4x128xbf16>
    %4 = vector.shape_cast %3 : vector<4x4x128xbf16> to vector<16x128xbf16>
    %c0_3 = arith.constant 0 : index
    %c0_4 = arith.constant 0 : index
    %c0_5 = arith.constant 0 : index
    %5 = vector.load %arg2[%c0_3, %c0_4, %c0_5] : memref<9x128x128xbf16, #tpu.memory_space<vmem>>, vector<1x128x128xbf16>
    %6 = vector.shape_cast %5 : vector<1x128x128xbf16> to vector<128x128xbf16>
    %cst_6 = arith.constant dense<0.000000e+00> : vector<16x128xf32>
    %7 = tpu.matmul %4, %6, %cst_6 {dimension_numbers = #tpu.dot_dimension_numbers<[1], [0], [0], [1], [0, 0, 1, 1], [], []>} : vector<16x128xbf16>, vector<128x128xbf16>, vector<16x128xf32> -> vector<16x128xf32>
    %8 = arith.addf %2, %7 : vector<16x128xf32>
    %9 = vector.extract_strided_slice %1 {offsets = [0, 0, 128], sizes = [4, 4, 128], strides = [1, 1, 1]} : vector<5x5x512xbf16> to vector<4x4x128xbf16>
    %10 = vector.shape_cast %9 : vector<4x4x128xbf16> to vector<16x128xbf16>
    %c1 = arith.constant 1 : index
    %c0_7 = arith.constant 0 : index
    %c0_8 = arith.constant 0 : index
    %11 = vector.load %arg2[%c1, %c0_7, %c0_8] : memref<9x128x128xbf16, #tpu.memory_space<vmem>>, vector<1x128x128xbf16>
    %12 = vector.shape_cast %11 : vector<1x128x128xbf16> to vector<128x128xbf16>
    %cst_9 = arith.constant dense<0.000000e+00> : vector<16x128xf32>
    %13 = tpu.matmul %10, %12, %cst_9 {dimension_numbers = #tpu.dot_dimension_numbers<[1], [0], [0], [1], [0, 0, 1, 1], [], []>} : vector<16x128xbf16>, vector<128x128xbf16>, vector<16x128xf32> -> vector<16x128xf32>
    %14 = arith.addf %8, %13 : vector<16x128xf32>
    %15 = vector.extract_strided_slice %1 {offsets = [0, 1, 0], sizes = [4, 4, 128], strides = [1, 1, 1]} : vector<5x5x512xbf16> to vector<4x4x128xbf16>
    %16 = vector.shape_cast %15 : vector<4x4x128xbf16> to vector<16x128xbf16>
    %c2 = arith.constant 2 : index
    %c0_10 = arith.constant 0 : index
    %c0_11 = arith.constant 0 : index
    %17 = vector.load %arg2[%c2, %c0_10, %c0_11] : memref<9x128x128xbf16, #tpu.memory_space<vmem>>, vector<1x128x128xbf16>
    %18 = vector.shape_cast %17 : vector<1x128x128xbf16> to vector<128x128xbf16>
    %cst_12 = arith.constant dense<0.000000e+00> : vector<16x128xf32>
    %19 = tpu.matmul %16, %18, %cst_12 {dimension_numbers = #tpu.dot_dimension_numbers<[1], [0], [0], [1], [0, 0, 1, 1], [], []>} : vector<16x128xbf16>, vector<128x128xbf16>, vector<16x128xf32> -> vector<16x128xf32>
    %20 = arith.addf %14, %19 : vector<16x128xf32>
    %21 = vector.extract_strided_slice %1 {offsets = [0, 0, 256], sizes = [4, 4, 128], strides = [1, 1, 1]} : vector<5x5x512xbf16> to vector<4x4x128xbf16>
    %22 = vector.shape_cast %21 : vector<4x4x128xbf16> to vector<16x128xbf16>
    %c3 = arith.constant 3 : index
    %c0_13 = arith.constant 0 : index
    %c0_14 = arith.constant 0 : index
    %23 = vector.load %arg2[%c3, %c0_13, %c0_14] : memref<9x128x128xbf16, #tpu.memory_space<vmem>>, vector<1x128x128xbf16>
    %24 = vector.shape_cast %23 : vector<1x128x128xbf16> to vector<128x128xbf16>
    %cst_15 = arith.constant dense<0.000000e+00> : vector<16x128xf32>
    %25 = tpu.matmul %22, %24, %cst_15 {dimension_numbers = #tpu.dot_dimension_numbers<[1], [0], [0], [1], [0, 0, 1, 1], [], []>} : vector<16x128xbf16>, vector<128x128xbf16>, vector<16x128xf32> -> vector<16x128xf32>
    %26 = arith.addf %20, %25 : vector<16x128xf32>
    %27 = vector.extract_strided_slice %1 {offsets = [0, 0, 384], sizes = [4, 4, 128], strides = [1, 1, 1]} : vector<5x5x512xbf16> to vector<4x4x128xbf16>
    %28 = vector.shape_cast %27 : vector<4x4x128xbf16> to vector<16x128xbf16>
    %c4 = arith.constant 4 : index
    %c0_16 = arith.constant 0 : index
    %c0_17 = arith.constant 0 : index
    %29 = vector.load %arg2[%c4, %c0_16, %c0_17] : memref<9x128x128xbf16, #tpu.memory_space<vmem>>, vector<1x128x128xbf16>
    %30 = vector.shape_cast %29 : vector<1x128x128xbf16> to vector<128x128xbf16>
    %cst_18 = arith.constant dense<0.000000e+00> : vector<16x128xf32>
    %31 = tpu.matmul %28, %30, %cst_18 {dimension_numbers = #tpu.dot_dimension_numbers<[1], [0], [0], [1], [0, 0, 1, 1], [], []>} : vector<16x128xbf16>, vector<128x128xbf16>, vector<16x128xf32> -> vector<16x128xf32>
    %32 = arith.addf %26, %31 : vector<16x128xf32>
    %33 = vector.extract_strided_slice %1 {offsets = [0, 1, 256], sizes = [4, 4, 128], strides = [1, 1, 1]} : vector<5x5x512xbf16> to vector<4x4x128xbf16>
    %34 = vector.shape_cast %33 : vector<4x4x128xbf16> to vector<16x128xbf16>
    %c5 = arith.constant 5 : index
    %c0_19 = arith.constant 0 : index
    %c0_20 = arith.constant 0 : index
    %35 = vector.load %arg2[%c5, %c0_19, %c0_20] : memref<9x128x128xbf16, #tpu.memory_space<vmem>>, vector<1x128x128xbf16>
    %36 = vector.shape_cast %35 : vector<1x128x128xbf16> to vector<128x128xbf16>
    %cst_21 = arith.constant dense<0.000000e+00> : vector<16x128xf32>
    %37 = tpu.matmul %34, %36, %cst_21 {dimension_numbers = #tpu.dot_dimension_numbers<[1], [0], [0], [1], [0, 0, 1, 1], [], []>} : vector<16x128xbf16>, vector<128x128xbf16>, vector<16x128xf32> -> vector<16x128xf32>
    %38 = arith.addf %32, %37 : vector<16x128xf32>
    %39 = vector.extract_strided_slice %1 {offsets = [1, 0, 0], sizes = [4, 4, 128], strides = [1, 1, 1]} : vector<5x5x512xbf16> to vector<4x4x128xbf16>
    %40 = vector.shape_cast %39 : vector<4x4x128xbf16> to vector<16x128xbf16>
    %c6 = arith.constant 6 : index
    %c0_22 = arith.constant 0 : index
    %c0_23 = arith.constant 0 : index
    %41 = vector.load %arg2[%c6, %c0_22, %c0_23] : memref<9x128x128xbf16, #tpu.memory_space<vmem>>, vector<1x128x128xbf16>
    %42 = vector.shape_cast %41 : vector<1x128x128xbf16> to vector<128x128xbf16>
    %cst_24 = arith.constant dense<0.000000e+00> : vector<16x128xf32>
    %43 = tpu.matmul %40, %42, %cst_24 {dimension_numbers = #tpu.dot_dimension_numbers<[1], [0], [0], [1], [0, 0, 1, 1], [], []>} : vector<16x128xbf16>, vector<128x128xbf16>, vector<16x128xf32> -> vector<16x128xf32>
    %44 = arith.addf %38, %43 : vector<16x128xf32>
    %45 = vector.extract_strided_slice %1 {offsets = [1, 0, 128], sizes = [4, 4, 128], strides = [1, 1, 1]} : vector<5x5x512xbf16> to vector<4x4x128xbf16>
    %46 = vector.shape_cast %45 : vector<4x4x128xbf16> to vector<16x128xbf16>
    %c7 = arith.constant 7 : index
    %c0_25 = arith.constant 0 : index
    %c0_26 = arith.constant 0 : index
    %47 = vector.load %arg2[%c7, %c0_25, %c0_26] : memref<9x128x128xbf16, #tpu.memory_space<vmem>>, vector<1x128x128xbf16>
    %48 = vector.shape_cast %47 : vector<1x128x128xbf16> to vector<128x128xbf16>
    %cst_27 = arith.constant dense<0.000000e+00> : vector<16x128xf32>
    %49 = tpu.matmul %46, %48, %cst_27 {dimension_numbers = #tpu.dot_dimension_numbers<[1], [0], [0], [1], [0, 0, 1, 1], [], []>} : vector<16x128xbf16>, vector<128x128xbf16>, vector<16x128xf32> -> vector<16x128xf32>
    %50 = arith.addf %44, %49 : vector<16x128xf32>
    %51 = vector.extract_strided_slice %1 {offsets = [1, 1, 0], sizes = [4, 4, 128], strides = [1, 1, 1]} : vector<5x5x512xbf16> to vector<4x4x128xbf16>
    %52 = vector.shape_cast %51 : vector<4x4x128xbf16> to vector<16x128xbf16>
    %c8 = arith.constant 8 : index
    %c0_28 = arith.constant 0 : index
    %c0_29 = arith.constant 0 : index
    %53 = vector.load %arg2[%c8, %c0_28, %c0_29] : memref<9x128x128xbf16, #tpu.memory_space<vmem>>, vector<1x128x128xbf16>
    %54 = vector.shape_cast %53 : vector<1x128x128xbf16> to vector<128x128xbf16>
    %cst_30 = arith.constant dense<0.000000e+00> : vector<16x128xf32>
    %55 = tpu.matmul %52, %54, %cst_30 {dimension_numbers = #tpu.dot_dimension_numbers<[1], [0], [0], [1], [0, 0, 1, 1], [], []>} : vector<16x128xbf16>, vector<128x128xbf16>, vector<16x128xf32> -> vector<16x128xf32>
    %56 = arith.addf %50, %55 : vector<16x128xf32>
    %c0_31 = arith.constant 0 : index
    %c0_32 = arith.constant 0 : index
    %57 = vector.load %arg3[%c0_31, %c0_32] : memref<1x128xf32, #tpu.memory_space<vmem>>, vector<1x128xf32>
    %58 = vector.broadcast %57 : vector<1x128xf32> to vector<16x128xf32>
    %59 = arith.addf %56, %58 : vector<16x128xf32>
    %cst_33 = arith.constant 0.000000e+00 : f32
    %60 = vector.broadcast %cst_33 : f32 to vector<16x128xf32>
    %61 = arith.maximumf %59, %60 : vector<16x128xf32>
    %62 = vector.shape_cast %61 : vector<16x128xf32> to vector<4x4x128xf32>
    %63 = arith.truncf %62 : vector<4x4x128xf32> to vector<4x4x128xbf16>
    %c0_34 = arith.constant 0 : index
    %c0_35 = arith.constant 0 : index
    %c0_36 = arith.constant 0 : index
    %c0_37 = arith.constant 0 : index
    %64 = vector.load %arg4[%c0_34, %c0_35, %c0_36, %c0_37] : memref<1x4x4x128xbf16, #tpu.memory_space<vmem>>, vector<1x4x4x128xbf16>
    %65 = vector.shape_cast %64 : vector<1x4x4x128xbf16> to vector<4x4x128xbf16>
    %66 = vector.shape_cast %63 : vector<4x4x128xbf16> to vector<1x4x4x128xbf16>
    tpu.vector_store %arg4[%c0_34, %c0_35, %c0_36, %c0_37], %66 {strides = array<i32>} : memref<1x4x4x128xbf16, #tpu.memory_space<vmem>>, vector<1x4x4x128xbf16>,
    return
  }
  func.func @transform_0(%arg0: i32) -> (i32, i32, i32, i32) {
    %c0_i32 = arith.constant 0 : i32
    %c0_i32_0 = arith.constant 0 : i32
    %c0_i32_1 = arith.constant 0 : i32
    %c0_i32_2 = arith.constant 0 : i32
    return %arg0, %c0_i32, %c0_i32_0, %c0_i32_1 : i32, i32, i32, i32
  }
  func.func @transform_1(%arg0: i32) -> (i32, i32, i32) {
    %c0_i32 = arith.constant 0 : i32
    %c0_i32_0 = arith.constant 0 : i32
    %c0_i32_1 = arith.constant 0 : i32
    %c0_i32_2 = arith.constant 0 : i32
    return %c0_i32, %c0_i32_0, %c0_i32_1 : i32, i32, i32
  }
  func.func @transform_2(%arg0: i32) -> (i32, i32) {
    %c0_i32 = arith.constant 0 : i32
    %c0_i32_0 = arith.constant 0 : i32
    %c0_i32_1 = arith.constant 0 : i32
    return %c0_i32, %c0_i32_0 : i32, i32
  }
  func.func @transform_3(%arg0: i32) -> (i32, i32, i32, i32) {
    %c0_i32 = arith.constant 0 : i32
    %c0_i32_0 = arith.constant 0 : i32
    %c0_i32_1 = arith.constant 0 : i32
    %c0_i32_2 = arith.constant 0 : i32
    return %arg0, %c0_i32, %c0_i32_0, %c0_i32_1 : i32, i32, i32, i32
  }
}

module attributes {stable_mosaic.version = 11 : i64} {
  func.func @_conv_tap_kernel(%arg0: i32, %arg1: memref<1x3x3x512xbf16, #tpu.memory_space<vmem>>, %arg2: memref<9x128x128xbf16, #tpu.memory_space<vmem>>, %arg3: memref<1x128xf32, #tpu.memory_space<vmem>>, %arg4: memref<1x1x128xbf16, #tpu.memory_space<vmem>>) attributes {dimension_semantics = [#tpu.dimension_semantics<arbitrary>], iteration_bounds = array<i64: 8>, scalar_prefetch = 0 : i64, scratch_operands = 0 : i64, tpu.core_type = #tpu.core_type<tc>, window_params = [{transform_indices = @transform_0, window_bounds = array<i64: 1, 3, 3, 512>}, {pipeline_mode = #tpu.pipeline_mode<synchronous>, transform_indices = @transform_1, window_bounds = array<i64: 9, 128, 128>}, {pipeline_mode = #tpu.pipeline_mode<synchronous>, transform_indices = @transform_2, window_bounds = array<i64: 1, 128>}, {transform_indices = @transform_3, window_bounds = array<i64: 1, 1, 128>}]} {
    %c0 = arith.constant 0 : index
    %c0_0 = arith.constant 0 : index
    %c0_1 = arith.constant 0 : index
    %c0_2 = arith.constant 0 : index
    %0 = vector.load %arg1[%c0, %c0_0, %c0_1, %c0_2] : memref<1x3x3x512xbf16, #tpu.memory_space<vmem>>, vector<1x3x3x512xbf16>
    %1 = vector.shape_cast %0 : vector<1x3x3x512xbf16> to vector<3x3x512xbf16>
    %cst = arith.constant 0.000000e+00 : f32
    %2 = vector.broadcast %cst : f32 to vector<4x128xf32>
    %3 = vector.extract_strided_slice %1 {offsets = [0, 0, 0], sizes = [2, 2, 128], strides = [1, 1, 1]} : vector<3x3x512xbf16> to vector<2x2x128xbf16>
    %4 = vector.shape_cast %3 : vector<2x2x128xbf16> to vector<4x128xbf16>
    %c0_3 = arith.constant 0 : index
    %c0_4 = arith.constant 0 : index
    %c0_5 = arith.constant 0 : index
    %5 = vector.load %arg2[%c0_3, %c0_4, %c0_5] : memref<9x128x128xbf16, #tpu.memory_space<vmem>>, vector<1x128x128xbf16>
    %6 = vector.shape_cast %5 : vector<1x128x128xbf16> to vector<128x128xbf16>
    %cst_6 = arith.constant dense<0.000000e+00> : vector<4x128xf32>
    %7 = tpu.matmul %4, %6, %cst_6 {dimension_numbers = #tpu.dot_dimension_numbers<[1], [0], [0], [1], [0, 0, 1, 1], [], []>} : vector<4x128xbf16>, vector<128x128xbf16>, vector<4x128xf32> -> vector<4x128xf32>
    %8 = arith.addf %2, %7 : vector<4x128xf32>
    %9 = vector.extract_strided_slice %1 {offsets = [0, 0, 128], sizes = [2, 2, 128], strides = [1, 1, 1]} : vector<3x3x512xbf16> to vector<2x2x128xbf16>
    %10 = vector.shape_cast %9 : vector<2x2x128xbf16> to vector<4x128xbf16>
    %c1 = arith.constant 1 : index
    %c0_7 = arith.constant 0 : index
    %c0_8 = arith.constant 0 : index
    %11 = vector.load %arg2[%c1, %c0_7, %c0_8] : memref<9x128x128xbf16, #tpu.memory_space<vmem>>, vector<1x128x128xbf16>
    %12 = vector.shape_cast %11 : vector<1x128x128xbf16> to vector<128x128xbf16>
    %cst_9 = arith.constant dense<0.000000e+00> : vector<4x128xf32>
    %13 = tpu.matmul %10, %12, %cst_9 {dimension_numbers = #tpu.dot_dimension_numbers<[1], [0], [0], [1], [0, 0, 1, 1], [], []>} : vector<4x128xbf16>, vector<128x128xbf16>, vector<4x128xf32> -> vector<4x128xf32>
    %14 = arith.addf %8, %13 : vector<4x128xf32>
    %15 = vector.extract_strided_slice %1 {offsets = [0, 1, 0], sizes = [2, 2, 128], strides = [1, 1, 1]} : vector<3x3x512xbf16> to vector<2x2x128xbf16>
    %16 = vector.shape_cast %15 : vector<2x2x128xbf16> to vector<4x128xbf16>
    %c2 = arith.constant 2 : index
    %c0_10 = arith.constant 0 : index
    %c0_11 = arith.constant 0 : index
    %17 = vector.load %arg2[%c2, %c0_10, %c0_11] : memref<9x128x128xbf16, #tpu.memory_space<vmem>>, vector<1x128x128xbf16>
    %18 = vector.shape_cast %17 : vector<1x128x128xbf16> to vector<128x128xbf16>
    %cst_12 = arith.constant dense<0.000000e+00> : vector<4x128xf32>
    %19 = tpu.matmul %16, %18, %cst_12 {dimension_numbers = #tpu.dot_dimension_numbers<[1], [0], [0], [1], [0, 0, 1, 1], [], []>} : vector<4x128xbf16>, vector<128x128xbf16>, vector<4x128xf32> -> vector<4x128xf32>
    %20 = arith.addf %14, %19 : vector<4x128xf32>
    %21 = vector.extract_strided_slice %1 {offsets = [0, 0, 256], sizes = [2, 2, 128], strides = [1, 1, 1]} : vector<3x3x512xbf16> to vector<2x2x128xbf16>
    %22 = vector.shape_cast %21 : vector<2x2x128xbf16> to vector<4x128xbf16>
    %c3 = arith.constant 3 : index
    %c0_13 = arith.constant 0 : index
    %c0_14 = arith.constant 0 : index
    %23 = vector.load %arg2[%c3, %c0_13, %c0_14] : memref<9x128x128xbf16, #tpu.memory_space<vmem>>, vector<1x128x128xbf16>
    %24 = vector.shape_cast %23 : vector<1x128x128xbf16> to vector<128x128xbf16>
    %cst_15 = arith.constant dense<0.000000e+00> : vector<4x128xf32>
    %25 = tpu.matmul %22, %24, %cst_15 {dimension_numbers = #tpu.dot_dimension_numbers<[1], [0], [0], [1], [0, 0, 1, 1], [], []>} : vector<4x128xbf16>, vector<128x128xbf16>, vector<4x128xf32> -> vector<4x128xf32>
    %26 = arith.addf %20, %25 : vector<4x128xf32>
    %27 = vector.extract_strided_slice %1 {offsets = [0, 0, 384], sizes = [2, 2, 128], strides = [1, 1, 1]} : vector<3x3x512xbf16> to vector<2x2x128xbf16>
    %28 = vector.shape_cast %27 : vector<2x2x128xbf16> to vector<4x128xbf16>
    %c4 = arith.constant 4 : index
    %c0_16 = arith.constant 0 : index
    %c0_17 = arith.constant 0 : index
    %29 = vector.load %arg2[%c4, %c0_16, %c0_17] : memref<9x128x128xbf16, #tpu.memory_space<vmem>>, vector<1x128x128xbf16>
    %30 = vector.shape_cast %29 : vector<1x128x128xbf16> to vector<128x128xbf16>
    %cst_18 = arith.constant dense<0.000000e+00> : vector<4x128xf32>
    %31 = tpu.matmul %28, %30, %cst_18 {dimension_numbers = #tpu.dot_dimension_numbers<[1], [0], [0], [1], [0, 0, 1, 1], [], []>} : vector<4x128xbf16>, vector<128x128xbf16>, vector<4x128xf32> -> vector<4x128xf32>
    %32 = arith.addf %26, %31 : vector<4x128xf32>
    %33 = vector.extract_strided_slice %1 {offsets = [0, 1, 256], sizes = [2, 2, 128], strides = [1, 1, 1]} : vector<3x3x512xbf16> to vector<2x2x128xbf16>
    %34 = vector.shape_cast %33 : vector<2x2x128xbf16> to vector<4x128xbf16>
    %c5 = arith.constant 5 : index
    %c0_19 = arith.constant 0 : index
    %c0_20 = arith.constant 0 : index
    %35 = vector.load %arg2[%c5, %c0_19, %c0_20] : memref<9x128x128xbf16, #tpu.memory_space<vmem>>, vector<1x128x128xbf16>
    %36 = vector.shape_cast %35 : vector<1x128x128xbf16> to vector<128x128xbf16>
    %cst_21 = arith.constant dense<0.000000e+00> : vector<4x128xf32>
    %37 = tpu.matmul %34, %36, %cst_21 {dimension_numbers = #tpu.dot_dimension_numbers<[1], [0], [0], [1], [0, 0, 1, 1], [], []>} : vector<4x128xbf16>, vector<128x128xbf16>, vector<4x128xf32> -> vector<4x128xf32>
    %38 = arith.addf %32, %37 : vector<4x128xf32>
    %39 = vector.extract_strided_slice %1 {offsets = [1, 0, 0], sizes = [2, 2, 128], strides = [1, 1, 1]} : vector<3x3x512xbf16> to vector<2x2x128xbf16>
    %40 = vector.shape_cast %39 : vector<2x2x128xbf16> to vector<4x128xbf16>
    %c6 = arith.constant 6 : index
    %c0_22 = arith.constant 0 : index
    %c0_23 = arith.constant 0 : index
    %41 = vector.load %arg2[%c6, %c0_22, %c0_23] : memref<9x128x128xbf16, #tpu.memory_space<vmem>>, vector<1x128x128xbf16>
    %42 = vector.shape_cast %41 : vector<1x128x128xbf16> to vector<128x128xbf16>
    %cst_24 = arith.constant dense<0.000000e+00> : vector<4x128xf32>
    %43 = tpu.matmul %40, %42, %cst_24 {dimension_numbers = #tpu.dot_dimension_numbers<[1], [0], [0], [1], [0, 0, 1, 1], [], []>} : vector<4x128xbf16>, vector<128x128xbf16>, vector<4x128xf32> -> vector<4x128xf32>
    %44 = arith.addf %38, %43 : vector<4x128xf32>
    %45 = vector.extract_strided_slice %1 {offsets = [1, 0, 128], sizes = [2, 2, 128], strides = [1, 1, 1]} : vector<3x3x512xbf16> to vector<2x2x128xbf16>
    %46 = vector.shape_cast %45 : vector<2x2x128xbf16> to vector<4x128xbf16>
    %c7 = arith.constant 7 : index
    %c0_25 = arith.constant 0 : index
    %c0_26 = arith.constant 0 : index
    %47 = vector.load %arg2[%c7, %c0_25, %c0_26] : memref<9x128x128xbf16, #tpu.memory_space<vmem>>, vector<1x128x128xbf16>
    %48 = vector.shape_cast %47 : vector<1x128x128xbf16> to vector<128x128xbf16>
    %cst_27 = arith.constant dense<0.000000e+00> : vector<4x128xf32>
    %49 = tpu.matmul %46, %48, %cst_27 {dimension_numbers = #tpu.dot_dimension_numbers<[1], [0], [0], [1], [0, 0, 1, 1], [], []>} : vector<4x128xbf16>, vector<128x128xbf16>, vector<4x128xf32> -> vector<4x128xf32>
    %50 = arith.addf %44, %49 : vector<4x128xf32>
    %51 = vector.extract_strided_slice %1 {offsets = [1, 1, 0], sizes = [2, 2, 128], strides = [1, 1, 1]} : vector<3x3x512xbf16> to vector<2x2x128xbf16>
    %52 = vector.shape_cast %51 : vector<2x2x128xbf16> to vector<4x128xbf16>
    %c8 = arith.constant 8 : index
    %c0_28 = arith.constant 0 : index
    %c0_29 = arith.constant 0 : index
    %53 = vector.load %arg2[%c8, %c0_28, %c0_29] : memref<9x128x128xbf16, #tpu.memory_space<vmem>>, vector<1x128x128xbf16>
    %54 = vector.shape_cast %53 : vector<1x128x128xbf16> to vector<128x128xbf16>
    %cst_30 = arith.constant dense<0.000000e+00> : vector<4x128xf32>
    %55 = tpu.matmul %52, %54, %cst_30 {dimension_numbers = #tpu.dot_dimension_numbers<[1], [0], [0], [1], [0, 0, 1, 1], [], []>} : vector<4x128xbf16>, vector<128x128xbf16>, vector<4x128xf32> -> vector<4x128xf32>
    %56 = arith.addf %50, %55 : vector<4x128xf32>
    %c0_31 = arith.constant 0 : index
    %c0_32 = arith.constant 0 : index
    %57 = vector.load %arg3[%c0_31, %c0_32] : memref<1x128xf32, #tpu.memory_space<vmem>>, vector<1x128xf32>
    %58 = vector.broadcast %57 : vector<1x128xf32> to vector<4x128xf32>
    %59 = arith.addf %56, %58 : vector<4x128xf32>
    %cst_33 = arith.constant 0.000000e+00 : f32
    %60 = vector.broadcast %cst_33 : f32 to vector<4x128xf32>
    %61 = arith.maximumf %59, %60 : vector<4x128xf32>
    %cst_34 = arith.constant dense<0.000000e+00> : vector<128xf32>
    %62 = vector.multi_reduction <add>, %61, %cst_34 [0] : vector<4x128xf32> to vector<128xf32>
    %63 = vector.shape_cast %62 : vector<128xf32> to vector<1x128xf32>
    %cst_35 = arith.constant 4.000000e+00 : f32
    %64 = vector.broadcast %cst_35 : f32 to vector<1x128xf32>
    %65 = arith.divf %63, %64 : vector<1x128xf32>
    %66 = arith.truncf %65 : vector<1x128xf32> to vector<1x128xbf16>
    %c0_36 = arith.constant 0 : index
    %c0_37 = arith.constant 0 : index
    %c0_38 = arith.constant 0 : index
    %67 = vector.load %arg4[%c0_36, %c0_37, %c0_38] : memref<1x1x128xbf16, #tpu.memory_space<vmem>>, vector<1x1x128xbf16>
    %68 = vector.shape_cast %67 : vector<1x1x128xbf16> to vector<1x128xbf16>
    %69 = vector.shape_cast %66 : vector<1x128xbf16> to vector<1x1x128xbf16>
    tpu.vector_store %arg4[%c0_36, %c0_37, %c0_38], %69 {strides = array<i32>} : memref<1x1x128xbf16, #tpu.memory_space<vmem>>, vector<1x1x128xbf16>,
    return
  }
  func.func @transform_0(%arg0: i32) -> (i32, i32, i32, i32) {
    %c0_i32 = arith.constant 0 : i32
    %c0_i32_0 = arith.constant 0 : i32
    %c0_i32_1 = arith.constant 0 : i32
    %c0_i32_2 = arith.constant 0 : i32
    return %arg0, %c0_i32, %c0_i32_0, %c0_i32_1 : i32, i32, i32, i32
  }
  func.func @transform_1(%arg0: i32) -> (i32, i32, i32) {
    %c0_i32 = arith.constant 0 : i32
    %c0_i32_0 = arith.constant 0 : i32
    %c0_i32_1 = arith.constant 0 : i32
    %c0_i32_2 = arith.constant 0 : i32
    return %c0_i32, %c0_i32_0, %c0_i32_1 : i32, i32, i32
  }
  func.func @transform_2(%arg0: i32) -> (i32, i32) {
    %c0_i32 = arith.constant 0 : i32
    %c0_i32_0 = arith.constant 0 : i32
    %c0_i32_1 = arith.constant 0 : i32
    return %c0_i32, %c0_i32_0 : i32, i32
  }
  func.func @transform_3(%arg0: i32) -> (i32, i32, i32) {
    %c0_i32 = arith.constant 0 : i32
    %c0_i32_0 = arith.constant 0 : i32
    %c0_i32_1 = arith.constant 0 : i32
    return %arg0, %c0_i32, %c0_i32_0 : i32, i32, i32
  }
}

module attributes {stable_mosaic.version = 11 : i64} {
  func.func @_fused_bilstm_fc_kernel(%arg0: i32, %arg1: memref<8x256xbf16, #tpu.memory_space<vmem>>, %arg2: memref<256x256xbf16, #tpu.memory_space<vmem>>, %arg3: memref<4x2x256xf32, #tpu.memory_space<vmem>>, %arg4: memref<64x256xbf16, #tpu.memory_space<vmem>>, %arg5: memref<128x128xbf16, #tpu.memory_space<vmem>>, %arg6: memref<1x128xf32, #tpu.memory_space<vmem>>, %arg7: memref<2x128xf32, #tpu.memory_space<vmem>>, %arg8: memref<4x2x256xf32, #tpu.memory_space<vmem>>) attributes {dimension_semantics = [#tpu.dimension_semantics<arbitrary>], iteration_bounds = array<i64: 1>, scalar_prefetch = 0 : i64, scratch_operands = 1 : i64, tpu.core_type = #tpu.core_type<tc>, window_params = [{pipeline_mode = #tpu.pipeline_mode<synchronous>, transform_indices = @transform_0, window_bounds = array<i64: 8, 256>}, {pipeline_mode = #tpu.pipeline_mode<synchronous>, transform_indices = @transform_1, window_bounds = array<i64: 256, 256>}, {pipeline_mode = #tpu.pipeline_mode<synchronous>, transform_indices = @transform_2, window_bounds = array<i64: 4, 2, 256>}, {pipeline_mode = #tpu.pipeline_mode<synchronous>, transform_indices = @transform_3, window_bounds = array<i64: 64, 256>}, {pipeline_mode = #tpu.pipeline_mode<synchronous>, transform_indices = @transform_4, window_bounds = array<i64: 128, 128>}, {pipeline_mode = #tpu.pipeline_mode<synchronous>, transform_indices = @transform_5, window_bounds = array<i64: 1, 128>}, {pipeline_mode = #tpu.pipeline_mode<synchronous>, transform_indices = @transform_6, window_bounds = array<i64: 2, 128>}]} {
    %c0 = arith.constant 0 : index
    %c0_0 = arith.constant 0 : index
    %0 = vector.load %arg1[%c0, %c0_0] : memref<8x256xbf16, #tpu.memory_space<vmem>>, vector<8x256xbf16>
    %c0_1 = arith.constant 0 : index
    %c0_2 = arith.constant 0 : index
    %1 = vector.load %arg2[%c0_1, %c0_2] : memref<256x256xbf16, #tpu.memory_space<vmem>>, vector<256x256xbf16>
    %cst = arith.constant dense<0.000000e+00> : vector<8x256xf32>
    %2 = tpu.matmul %0, %1, %cst {dimension_numbers = #tpu.dot_dimension_numbers<[1], [0], [0], [1], [0, 0, 1, 1], [], []>} : vector<8x256xbf16>, vector<256x256xbf16>, vector<8x256xf32> -> vector<8x256xf32>
    %3 = vector.shape_cast %2 : vector<8x256xf32> to vector<4x2x256xf32>
    %c0_3 = arith.constant 0 : index
    %c0_4 = arith.constant 0 : index
    %c0_5 = arith.constant 0 : index
    %4 = vector.load %arg3[%c0_3, %c0_4, %c0_5] : memref<4x2x256xf32, #tpu.memory_space<vmem>>, vector<4x2x256xf32>
    %5 = arith.addf %3, %4 : vector<4x2x256xf32>
    %c0_6 = arith.constant 0 : index
    %c0_7 = arith.constant 0 : index
    %c0_8 = arith.constant 0 : index
    %6 = vector.load %arg8[%c0_6, %c0_7, %c0_8] : memref<4x2x256xf32, #tpu.memory_space<vmem>>, vector<4x2x256xf32>
    tpu.vector_store %arg8[%c0_6, %c0_7, %c0_8], %5 {strides = array<i32>} : memref<4x2x256xf32, #tpu.memory_space<vmem>>, vector<4x2x256xf32>,
    %c0_9 = arith.constant 0 : index
    %c0_10 = arith.constant 0 : index
    %7 = vector.load %arg4[%c0_9, %c0_10] : memref<64x256xbf16, #tpu.memory_space<vmem>>, vector<64x256xbf16>
    %8 = tpu.iota {dimensions = array<i32: 1>} : vector<2x256xi32>
    %c128_i32 = arith.constant 128 : i32
    %9 = vector.broadcast %c128_i32 : i32 to vector<2x256xi32>
    %10 = arith.cmpi sge, %8, %9 : vector<2x256xi32>
    %c192_i32 = arith.constant 192 : i32
    %11 = vector.broadcast %c192_i32 : i32 to vector<2x256xi32>
    %12 = arith.cmpi slt, %8, %11 : vector<2x256xi32>
    %13 = arith.andi %10, %12 : vector<2x256xi1>
    %cst_11 = arith.constant 0.000000e+00 : bf16
    %14 = vector.broadcast %cst_11 : bf16 to vector<2x64xbf16>
    %cst_12 = arith.constant 0.000000e+00 : f32
    %15 = vector.broadcast %cst_12 : f32 to vector<2x64xf32>
    %c0_i32 = arith.constant 0 : i32
    %16 = arith.index_cast %c0_i32 : i32 to index
    %c0_13 = arith.constant 0 : index
    %c0_14 = arith.constant 0 : index
    %17 = vector.load %arg8[%16, %c0_13, %c0_14] : memref<4x2x256xf32, #tpu.memory_space<vmem>>, vector<1x2x256xf32>
    %18 = vector.shape_cast %17 : vector<1x2x256xf32> to vector<2x256xf32>
    %cst_15 = arith.constant dense<0.000000e+00> : vector<2x256xf32>
    %19 = tpu.matmul %14, %7, %cst_15 {dimension_numbers = #tpu.dot_dimension_numbers<[1], [0], [0], [1], [0, 0, 1, 1], [], []>} : vector<2x64xbf16>, vector<64x256xbf16>, vector<2x256xf32> -> vector<2x256xf32>
    %20 = arith.addf %18, %19 : vector<2x256xf32>
    %21 = arith.negf %20 : vector<2x256xf32>
    %22 = math.exp %21 : vector<2x256xf32>
    %cst_16 = arith.constant 1.000000e+00 : f32
    %23 = vector.broadcast %cst_16 : f32 to vector<2x256xf32>
    %24 = arith.addf %23, %22 : vector<2x256xf32>
    %25 = arith.divf %23, %24 : vector<2x256xf32>
    %26 = math.tanh %20 : vector<2x256xf32>
    %27 = arith.select %13, %26, %25 : vector<2x256xi1>, vector<2x256xf32>
    %28 = vector.extract_strided_slice %27 {offsets = [0, 0], sizes = [2, 64], strides = [1, 1]} : vector<2x256xf32> to vector<2x64xf32>
    %29 = vector.extract_strided_slice %27 {offsets = [0, 64], sizes = [2, 64], strides = [1, 1]} : vector<2x256xf32> to vector<2x64xf32>
    %30 = vector.extract_strided_slice %27 {offsets = [0, 128], sizes = [2, 64], strides = [1, 1]} : vector<2x256xf32> to vector<2x64xf32>
    %31 = vector.extract_strided_slice %27 {offsets = [0, 192], sizes = [2, 64], strides = [1, 1]} : vector<2x256xf32> to vector<2x64xf32>
    %32 = arith.mulf %29, %15 : vector<2x64xf32>
    %33 = arith.mulf %28, %30 : vector<2x64xf32>
    %34 = arith.addf %32, %33 : vector<2x64xf32>
    %35 = math.tanh %34 : vector<2x64xf32>
    %36 = arith.mulf %31, %35 : vector<2x64xf32>
    %37 = arith.truncf %36 : vector<2x64xf32> to vector<2x64xbf16>
    %c1_i32 = arith.constant 1 : i32
    %38 = arith.index_cast %c1_i32 : i32 to index
    %c0_17 = arith.constant 0 : index
    %c0_18 = arith.constant 0 : index
    %39 = vector.load %arg8[%38, %c0_17, %c0_18] : memref<4x2x256xf32, #tpu.memory_space<vmem>>, vector<1x2x256xf32>
    %40 = vector.shape_cast %39 : vector<1x2x256xf32> to vector<2x256xf32>
    %cst_19 = arith.constant dense<0.000000e+00> : vector<2x256xf32>
    %41 = tpu.matmul %37, %7, %cst_19 {dimension_numbers = #tpu.dot_dimension_numbers<[1], [0], [0], [1], [0, 0, 1, 1], [], []>} : vector<2x64xbf16>, vector<64x256xbf16>, vector<2x256xf32> -> vector<2x256xf32>
    %42 = arith.addf %40, %41 : vector<2x256xf32>
    %43 = arith.negf %42 : vector<2x256xf32>
    %44 = math.exp %43 : vector<2x256xf32>
    %cst_20 = arith.constant 1.000000e+00 : f32
    %45 = vector.broadcast %cst_20 : f32 to vector<2x256xf32>
    %46 = arith.addf %45, %44 : vector<2x256xf32>
    %47 = arith.divf %45, %46 : vector<2x256xf32>
    %48 = math.tanh %42 : vector<2x256xf32>
    %49 = arith.select %13, %48, %47 : vector<2x256xi1>, vector<2x256xf32>
    %50 = vector.extract_strided_slice %49 {offsets = [0, 0], sizes = [2, 64], strides = [1, 1]} : vector<2x256xf32> to vector<2x64xf32>
    %51 = vector.extract_strided_slice %49 {offsets = [0, 64], sizes = [2, 64], strides = [1, 1]} : vector<2x256xf32> to vector<2x64xf32>
    %52 = vector.extract_strided_slice %49 {offsets = [0, 128], sizes = [2, 64], strides = [1, 1]} : vector<2x256xf32> to vector<2x64xf32>
    %53 = vector.extract_strided_slice %49 {offsets = [0, 192], sizes = [2, 64], strides = [1, 1]} : vector<2x256xf32> to vector<2x64xf32>
    %54 = arith.mulf %51, %34 : vector<2x64xf32>
    %55 = arith.mulf %50, %52 : vector<2x64xf32>
    %56 = arith.addf %54, %55 : vector<2x64xf32>
    %57 = math.tanh %56 : vector<2x64xf32>
    %58 = arith.mulf %53, %57 : vector<2x64xf32>
    %59 = arith.truncf %58 : vector<2x64xf32> to vector<2x64xbf16>
    %c2_i32 = arith.constant 2 : i32
    %60 = arith.index_cast %c2_i32 : i32 to index
    %c0_21 = arith.constant 0 : index
    %c0_22 = arith.constant 0 : index
    %61 = vector.load %arg8[%60, %c0_21, %c0_22] : memref<4x2x256xf32, #tpu.memory_space<vmem>>, vector<1x2x256xf32>
    %62 = vector.shape_cast %61 : vector<1x2x256xf32> to vector<2x256xf32>
    %cst_23 = arith.constant dense<0.000000e+00> : vector<2x256xf32>
    %63 = tpu.matmul %59, %7, %cst_23 {dimension_numbers = #tpu.dot_dimension_numbers<[1], [0], [0], [1], [0, 0, 1, 1], [], []>} : vector<2x64xbf16>, vector<64x256xbf16>, vector<2x256xf32> -> vector<2x256xf32>
    %64 = arith.addf %62, %63 : vector<2x256xf32>
    %65 = arith.negf %64 : vector<2x256xf32>
    %66 = math.exp %65 : vector<2x256xf32>
    %cst_24 = arith.constant 1.000000e+00 : f32
    %67 = vector.broadcast %cst_24 : f32 to vector<2x256xf32>
    %68 = arith.addf %67, %66 : vector<2x256xf32>
    %69 = arith.divf %67, %68 : vector<2x256xf32>
    %70 = math.tanh %64 : vector<2x256xf32>
    %71 = arith.select %13, %70, %69 : vector<2x256xi1>, vector<2x256xf32>
    %72 = vector.extract_strided_slice %71 {offsets = [0, 0], sizes = [2, 64], strides = [1, 1]} : vector<2x256xf32> to vector<2x64xf32>
    %73 = vector.extract_strided_slice %71 {offsets = [0, 64], sizes = [2, 64], strides = [1, 1]} : vector<2x256xf32> to vector<2x64xf32>
    %74 = vector.extract_strided_slice %71 {offsets = [0, 128], sizes = [2, 64], strides = [1, 1]} : vector<2x256xf32> to vector<2x64xf32>
    %75 = vector.extract_strided_slice %71 {offsets = [0, 192], sizes = [2, 64], strides = [1, 1]} : vector<2x256xf32> to vector<2x64xf32>
    %76 = arith.mulf %73, %56 : vector<2x64xf32>
    %77 = arith.mulf %72, %74 : vector<2x64xf32>
    %78 = arith.addf %76, %77 : vector<2x64xf32>
    %79 = math.tanh %78 : vector<2x64xf32>
    %80 = arith.mulf %75, %79 : vector<2x64xf32>
    %81 = arith.truncf %80 : vector<2x64xf32> to vector<2x64xbf16>
    %c3_i32 = arith.constant 3 : i32
    %82 = arith.index_cast %c3_i32 : i32 to index
    %c0_25 = arith.constant 0 : index
    %c0_26 = arith.constant 0 : index
    %83 = vector.load %arg8[%82, %c0_25, %c0_26] : memref<4x2x256xf32, #tpu.memory_space<vmem>>, vector<1x2x256xf32>
    %84 = vector.shape_cast %83 : vector<1x2x256xf32> to vector<2x256xf32>
    %cst_27 = arith.constant dense<0.000000e+00> : vector<2x256xf32>
    %85 = tpu.matmul %81, %7, %cst_27 {dimension_numbers = #tpu.dot_dimension_numbers<[1], [0], [0], [1], [0, 0, 1, 1], [], []>} : vector<2x64xbf16>, vector<64x256xbf16>, vector<2x256xf32> -> vector<2x256xf32>
    %86 = arith.addf %84, %85 : vector<2x256xf32>
    %87 = arith.negf %86 : vector<2x256xf32>
    %88 = math.exp %87 : vector<2x256xf32>
    %cst_28 = arith.constant 1.000000e+00 : f32
    %89 = vector.broadcast %cst_28 : f32 to vector<2x256xf32>
    %90 = arith.addf %89, %88 : vector<2x256xf32>
    %91 = arith.divf %89, %90 : vector<2x256xf32>
    %92 = math.tanh %86 : vector<2x256xf32>
    %93 = arith.select %13, %92, %91 : vector<2x256xi1>, vector<2x256xf32>
    %94 = vector.extract_strided_slice %93 {offsets = [0, 0], sizes = [2, 64], strides = [1, 1]} : vector<2x256xf32> to vector<2x64xf32>
    %95 = vector.extract_strided_slice %93 {offsets = [0, 64], sizes = [2, 64], strides = [1, 1]} : vector<2x256xf32> to vector<2x64xf32>
    %96 = vector.extract_strided_slice %93 {offsets = [0, 128], sizes = [2, 64], strides = [1, 1]} : vector<2x256xf32> to vector<2x64xf32>
    %97 = vector.extract_strided_slice %93 {offsets = [0, 192], sizes = [2, 64], strides = [1, 1]} : vector<2x256xf32> to vector<2x64xf32>
    %98 = arith.mulf %95, %78 : vector<2x64xf32>
    %99 = arith.mulf %94, %96 : vector<2x64xf32>
    %100 = arith.addf %98, %99 : vector<2x64xf32>
    %101 = math.tanh %100 : vector<2x64xf32>
    %102 = arith.mulf %97, %101 : vector<2x64xf32>
    %103 = arith.truncf %102 : vector<2x64xf32> to vector<2x64xbf16>
    %c4_i32 = arith.constant 4 : i32
    %cst_29 = arith.constant 0.000000e+00 : bf16
    %104 = vector.broadcast %cst_29 : bf16 to vector<2x64xbf16>
    %105 = tpu.concatenate %103, %104 in 1 : vector<2x64xbf16>, vector<2x64xbf16> -> vector<2x128xbf16>
    %c0_30 = arith.constant 0 : index
    %c0_31 = arith.constant 0 : index
    %106 = vector.load %arg5[%c0_30, %c0_31] : memref<128x128xbf16, #tpu.memory_space<vmem>>, vector<128x128xbf16>
    %cst_32 = arith.constant dense<0.000000e+00> : vector<2x128xf32>
    %107 = tpu.matmul %105, %106, %cst_32 {dimension_numbers = #tpu.dot_dimension_numbers<[1], [0], [0], [1], [0, 0, 1, 1], [], []>} : vector<2x128xbf16>, vector<128x128xbf16>, vector<2x128xf32> -> vector<2x128xf32>
    %c0_33 = arith.constant 0 : index
    %c0_34 = arith.constant 0 : index
    %108 = vector.load %arg6[%c0_33, %c0_34] : memref<1x128xf32, #tpu.memory_space<vmem>>, vector<1x128xf32>
    %109 = vector.broadcast %108 : vector<1x128xf32> to vector<2x128xf32>
    %110 = arith.addf %107, %109 : vector<2x128xf32>
    %c0_35 = arith.constant 0 : index
    %c0_36 = arith.constant 0 : index
    %111 = vector.load %arg7[%c0_35, %c0_36] : memref<2x128xf32, #tpu.memory_space<vmem>>, vector<2x128xf32>
    tpu.vector_store %arg7[%c0_35, %c0_36], %110 {strides = array<i32>} : memref<2x128xf32, #tpu.memory_space<vmem>>, vector<2x128xf32>,
    return
  }
  func.func @transform_0(%arg0: i32) -> (i32, i32) {
    %c0_i32 = arith.constant 0 : i32
    %c0_i32_0 = arith.constant 0 : i32
    %c0_i32_1 = arith.constant 0 : i32
    return %c0_i32, %c0_i32_0 : i32, i32
  }
  func.func @transform_1(%arg0: i32) -> (i32, i32) {
    %c0_i32 = arith.constant 0 : i32
    %c0_i32_0 = arith.constant 0 : i32
    %c0_i32_1 = arith.constant 0 : i32
    return %c0_i32, %c0_i32_0 : i32, i32
  }
  func.func @transform_2(%arg0: i32) -> (i32, i32, i32) {
    %c0_i32 = arith.constant 0 : i32
    %c0_i32_0 = arith.constant 0 : i32
    %c0_i32_1 = arith.constant 0 : i32
    %c0_i32_2 = arith.constant 0 : i32
    return %c0_i32, %c0_i32_0, %c0_i32_1 : i32, i32, i32
  }
  func.func @transform_3(%arg0: i32) -> (i32, i32) {
    %c0_i32 = arith.constant 0 : i32
    %c0_i32_0 = arith.constant 0 : i32
    %c0_i32_1 = arith.constant 0 : i32
    return %c0_i32, %c0_i32_0 : i32, i32
  }
  func.func @transform_4(%arg0: i32) -> (i32, i32) {
    %c0_i32 = arith.constant 0 : i32
    %c0_i32_0 = arith.constant 0 : i32
    %c0_i32_1 = arith.constant 0 : i32
    return %c0_i32, %c0_i32_0 : i32, i32
  }
  func.func @transform_5(%arg0: i32) -> (i32, i32) {
    %c0_i32 = arith.constant 0 : i32
    %c0_i32_0 = arith.constant 0 : i32
    %c0_i32_1 = arith.constant 0 : i32
    return %c0_i32, %c0_i32_0 : i32, i32
  }
  func.func @transform_6(%arg0: i32) -> (i32, i32) {
    %c0_i32 = arith.constant 0 : i32
    %c0_i32_0 = arith.constant 0 : i32
    %c0_i32_1 = arith.constant 0 : i32
    return %c0_i32, %c0_i32_0 : i32, i32
  }
}

</mosaic_0001>

<bundles_post_ra>
// kernel: mr_cnn_lstm_forward.4
= control target key start
LH: loop header
LB: loop body
LE: loop exit
PB: predicated region body
PF: predicated region fallthrough
CT: control target
= control target key end

     0   :  { %s1860_s1 = inlined_call_operand.vmem [shape: bf16[128,128], index: 1, kind: input, shape index: {}]   ;;  %s1861_s0 = inlined_call_operand.vmem [shape: bf16[512,128], index: 0, kind: input, shape index: {}]   ;;  %s1862_s2 = inlined_call_operand.vmem [shape: f32[1,128], index: 2, kind: input, shape index: {}]   ;;  %s1863_s3 = inlined_call_operand.vmem [shape: bf16[512,128], index: 3, kind: output, shape index: {}]  }
   0x1   :  { %v1515_v0 = vld [vmem:[%s1860_s1 + $0x38] sm:$0xff]   ;;  %v1516_v1 = vld [vmem:[%s1860_s1 + $0x30] sm:$0xff]   ;;  %v1517_v2 = vld [vmem:[%s1860_s1 + $0x28] sm:$0xff]  }
   0x2   :  { %1419 = vmatprep.subr.bf16.mxu0 %v1515_v0  ;;  %1499 = vmatprep.subr.bf16.mxu1 %v1515_v0  ;;  %v1518_v3 = vld [vmem:[%s1860_s1 + $0x20] sm:$0xff]   ;;  %v1519_v6 = vld [vmem:[%s1860_s1 + $0x18] sm:$0xff]   ;;  %v1520_v7 = vld [vmem:[%s1860_s1 + $0x10] sm:$0xff]  }
   0x3   :  { %1420 = vmatpush3.bf16.msra.mxu0 %v1515_v0  ;;  %1507 = vmatpush3.bf16.msra.mxu1 %v1515_v0  ;;  %v1523_v4 = vld [vmem:[%s1861_s0] sm:$0xff]   ;;  %v1521_v8 = vld [vmem:[%s1860_s1 + $0x8] sm:$0xff]   ;;  %v1527_v12 = vld [vmem:[%s1861_s0 + $0x10] sm:$0xff]  }
   0x4   :  { %1421 = vmatprep.subr.bf16.mxu0 %v1516_v1  ;;  %1500 = vmatprep.subr.bf16.mxu1 %v1516_v1  ;;  %v1524_v5 = vld [vmem:[%s1861_s0 + $0x80] sm:$0xff]   ;;  %v1525_v10 = vld [vmem:[%s1861_s0 + $0x8] sm:$0xff]   ;;  %v1528_v13 = vld [vmem:[%s1861_s0 + $0x90] sm:$0xff]  }
   0x5   :  { %1435 = vmatprep.mubr.bf16.mxu0 %v1523_v4  ;;  %1467 = vmatprep.mubr.bf16.mxu1 %v1524_v5  ;;  %v1522_v9 = vld [vmem:[%s1860_s1] sm:$0xff]   ;;  %v1526_v11 = vld [vmem:[%s1861_s0 + $0x88] sm:$0xff]   ;;  %v1529_v14 = vld [vmem:[%s1861_s0 + $0x18] sm:$0xff]  }
   0x6   :  { %v1530_v15 = vld [vmem:[%s1861_s0 + $0x98] sm:$0xff]   ;;  %v1531_v16 = vld [vmem:[%s1861_s0 + $0x20] sm:$0xff]   ;;  %v1533_v18 = vld [vmem:[%s1861_s0 + $0x28] sm:$0xff]  }
   0x7   :  { %1422 = vmatpush3.bf16.msra.mxu0 %v1516_v1  ;;  %1508 = vmatpush3.bf16.msra.mxu1 %v1516_v1  ;;  %v1532_v17 = vld [vmem:[%s1861_s0 + $0xa0] sm:$0xff]   ;;  %v1534_v19 = vld [vmem:[%s1861_s0 + $0xa8] sm:$0xff]   ;;  %v1535_v20 = vld [vmem:[%s1861_s0 + $0x30] sm:$0xff]  }
   0x8   :  { %1423 = vmatprep.subr.bf16.mxu0 %v1517_v2  ;;  %1501 = vmatprep.subr.bf16.mxu1 %v1517_v2  ;;  %v1536_v21 = vld [vmem:[%s1861_s0 + $0xb0] sm:$0xff]   ;;  %v1537_v22 = vld [vmem:[%s1861_s0 + $0x38] sm:$0xff]   ;;  %v1539_v24 = vld [vmem:[%s1861_s0 + $0x40] sm:$0xff]  }
   0x9   :  { %v1538_v23 = vld [vmem:[%s1861_s0 + $0xb8] sm:$0xff]   ;;  %v1540_v25 = vld [vmem:[%s1861_s0 + $0xc0] sm:$0xff]   ;;  %v1541_v26 = vld [vmem:[%s1861_s0 + $0x48] sm:$0xff]  }
   0xa   :  { %v1542_v27 = vld [vmem:[%s1861_s0 + $0xc8] sm:$0xff]   ;;  %v1543_v28 = vld [vmem:[%s1861_s0 + $0x50] sm:$0xff]   ;;  %v1545_v30 = vld [vmem:[%s1861_s0 + $0x58] sm:$0xff]  }
   0xb   :  { %1424 = vmatpush3.bf16.msra.mxu0 %v1517_v2  ;;  %1509 = vmatpush3.bf16.msra.mxu1 %v1517_v2  ;;  %v1544_v29 = vld [vmem:[%s1861_s0 + $0xd0] sm:$0xff]   ;;  %v1546_v31 = vld [vmem:[%s1861_s0 + $0xd8] sm:$0xff]   ;;  %v1547_v32 = vld [vmem:[%s1861_s0 + $0x60] sm:$0xff]  }
   0xc   :  { %1425 = vmatprep.subr.bf16.mxu0 %v1518_v3  ;;  %1502 = vmatprep.subr.bf16.mxu1 %v1518_v3  ;;  %v1548_v33 = vld [vmem:[%s1861_s0 + $0xe0] sm:$0xff]   ;;  %v1549_v34 = vld [vmem:[%s1861_s0 + $0x68] sm:$0xff]   ;;  %v1551_v36 = vld [vmem:[%s1861_s0 + $0x70] sm:$0xff]  }
   0xd   :  { %v1550_v35 = vld [vmem:[%s1861_s0 + $0xe8] sm:$0xff]   ;;  %v1552_v37 = vld [vmem:[%s1861_s0 + $0xf0] sm:$0xff]   ;;  %v1553_v38 = vld [vmem:[%s1861_s0 + $0x78] sm:$0xff]  }
   0xe   :  { %v1554_v39 = vld [vmem:[%s1861_s0 + $0xf8] sm:$0xff]   ;;  %v1698_v40 = vld [vmem:[%s1862_s2] ss:$0 sm:$0xff] }
   0xf   :  { %1426 = vmatpush3.bf16.msra.mxu0 %v1518_v3  ;;  %1510 = vmatpush3.bf16.msra.mxu1 %v1518_v3 }
  0x10   :  { %1427 = vmatprep.subr.bf16.mxu0 %v1519_v6  ;;  %1503 = vmatprep.subr.bf16.mxu1 %v1519_v6 }
  0x13   :  { %1428 = vmatpush3.bf16.msra.mxu0 %v1519_v6  ;;  %1511 = vmatpush3.bf16.msra.mxu1 %v1519_v6 }
  0x14   :  { %1429 = vmatprep.subr.bf16.mxu0 %v1520_v7  ;;  %1504 = vmatprep.subr.bf16.mxu1 %v1520_v7 }
  0x17   :  { %1430 = vmatpush3.bf16.msra.mxu0 %v1520_v7  ;;  %1512 = vmatpush3.bf16.msra.mxu1 %v1520_v7 }
  0x18   :  { %1431 = vmatprep.subr.bf16.mxu0 %v1521_v8  ;;  %1505 = vmatprep.subr.bf16.mxu1 %v1521_v8 }
  0x1b   :  { %1432 = vmatpush3.bf16.msra.mxu0 %v1521_v8  ;;  %1513 = vmatpush3.bf16.msra.mxu1 %v1521_v8 }
  0x1c   :  { %1433 = vmatprep.subr.bf16.mxu0 %v1522_v9  ;;  %1506 = vmatprep.subr.bf16.mxu1 %v1522_v9 }
  0x1f   :  { %1434 = vmatpush3.bf16.msra.mxu0 %v1522_v9  ;;  %1514 = vmatpush3.bf16.msra.mxu1 %v1522_v9 }
  0x22   :  { %1436 = vmatmul.mubr.bf16.vlgmr.msra.gmra.mxu0 %v1525_v10  ;;  %1468 = vmatmul.mubr.bf16.vlgmr.msra.gmra.mxu1 %v1526_v11 }
  0x23   :  { %1439 = vmatprep.mubr.bf16.mxu0 %v1527_v12  ;;  %1471 = vmatprep.mubr.bf16.mxu1 %v1528_v13 }
  0x2a   :  { %1440 = vmatmul.mubr.bf16.gmra.mxu0 %v1529_v14  ;;  %1472 = vmatmul.mubr.bf16.gmra.mxu1 %v1530_v15 }
  0x2b   :  { %1443 = vmatprep.mubr.bf16.mxu0 %v1531_v16  ;;  %1475 = vmatprep.mubr.bf16.mxu1 %v1532_v17 }
  0x32   :  { %1444 = vmatmul.mubr.bf16.gmra.mxu0 %v1533_v18  ;;  %1476 = vmatmul.mubr.bf16.gmra.mxu1 %v1534_v19 }
  0x33   :  { %1447 = vmatprep.mubr.bf16.mxu0 %v1535_v20  ;;  %1479 = vmatprep.mubr.bf16.mxu1 %v1536_v21 }
  0x3a   :  { %1448 = vmatmul.mubr.bf16.gmra.mxu0 %v1537_v22  ;;  %1480 = vmatmul.mubr.bf16.gmra.mxu1 %v1538_v23 }
  0x3b   :  { %1451 = vmatprep.mubr.bf16.mxu0 %v1539_v24  ;;  %1483 = vmatprep.mubr.bf16.mxu1 %v1540_v25 }
  0x42   :  { %1452 = vmatmul.mubr.bf16.gmra.mxu0 %v1541_v26  ;;  %1484 = vmatmul.mubr.bf16.gmra.mxu1 %v1542_v27 }
  0x43   :  { %1455 = vmatprep.mubr.bf16.mxu0 %v1543_v28  ;;  %1487 = vmatprep.mubr.bf16.mxu1 %v1544_v29 }
  0x4a   :  { %1456 = vmatmul.mubr.bf16.gmra.mxu0 %v1545_v30  ;;  %1488 = vmatmul.mubr.bf16.gmra.mxu1 %v1546_v31 }
  0x4b   :  { %1459 = vmatprep.mubr.bf16.mxu0 %v1547_v32  ;;  %1491 = vmatprep.mubr.bf16.mxu1 %v1548_v33 }
  0x52   :  { %1460 = vmatmul.mubr.bf16.gmra.mxu0 %v1549_v34  ;;  %1492 = vmatmul.mubr.bf16.gmra.mxu1 %v1550_v35 }
  0x53   :  { %1463 = vmatprep.mubr.bf16.mxu0 %v1551_v36  ;;  %1495 = vmatprep.mubr.bf16.mxu1 %v1552_v37 }
  0x5a   :  { %1464 = vmatmul.mubr.bf16.gmra.mxu0 %v1553_v38  ;;  %1496 = vmatmul.mubr.bf16.gmra.mxu1 %v1554_v39 }
  0xe2   :  { %v1437_v41 = vpop.f32.mrf.mxu0  ;;  %v1469_v42 = vpop.f32.mrf.mxu1 }
  0xe3   :  { %v385_v43 = vadd.f32 %v1437_v41, %v1698_v40  ;;  %v513_v44 = vadd.f32 %v1469_v42, %v1698_v40 }
  0xe4   :  { %v376_v45 = vpop.f32.mrf.mxu0  ;;  %v504_v46 = vpop.f32.mrf.mxu1 }
  0xe5   :  { %v377_v47 = vadd.f32 %v1698_v40, %v376_v45  ;;  %v505_v48 = vadd.f32 %v1698_v40, %v504_v46  ;;  %v633_v53 = vmax.f32 %v385_v43, 0.0  ;;  %v665_v54 = vmax.f32 %v513_v44, 0.0 }
  0xe6   :  { %v1438_v49 = vpop.f32.mrf.mxu0  ;;  %v1470_v50 = vpop.f32.mrf.mxu1 }
  0xe7   :  { %v388_v51 = vadd.f32 %v1438_v49, %v1698_v40  ;;  %v516_v52 = vadd.f32 %v1470_v50, %v1698_v40  ;;  %v631_v61 = vmax.f32 %v377_v47, 0.0  ;;  %v663_v62 = vmax.f32 %v505_v48, 0.0 }
  0xe8   :  { %v379_v55 = vpop.f32.mrf.mxu0  ;;  %v507_v56 = vpop.f32.mrf.mxu1 }
  0xe9   :  { %v634_v57 = vmax.f32 %v388_v51, 0.0  ;;  %v666_v58 = vmax.f32 %v516_v52, 0.0  ;;  %v380_v59 = vadd.f32 %v1698_v40, %v379_v55  ;;  %v508_v60 = vadd.f32 %v1698_v40, %v507_v56 }
  0xea   :  { %v1441_v63 = vpop.f32.mrf.mxu0  ;;  %v1473_v0 = vpop.f32.mrf.mxu1 }
  0xeb   :  { %v1196_v1 = vpack.c.bf16 %v634_v57, %v633_v53  ;;  %v1276_v2 = vpack.c.bf16 %v666_v58, %v665_v54  ;;  %v632_v3 = vmax.f32 %v380_v59, 0.0  ;;  %v664_v4 = vmax.f32 %v508_v60, 0.0 }
  0xec   :  { %v401_v5 = vadd.f32 %v1441_v63, %v1698_v40  ;;  %v529_v6 = vadd.f32 %v1473_v0, %v1698_v40  ;;  %v392_v7 = vpop.f32.mrf.mxu0  ;;  %v520_v8 = vpop.f32.mrf.mxu1 }
  0xed   :  { %1348 = vst [vmem:[%s1863_s3 + $0x8] sm:$0xff] %v1196_v1   ;;  %1364 = vst [vmem:[%s1863_s3 + $0x88] sm:$0xff] %v1276_v2   ;;  %v1191_v9 = vpack.c.bf16 %v632_v3, %v631_v61  ;;  %v1271_v10 = vpack.c.bf16 %v664_v4, %v663_v62  ;;  %v393_v11 = vadd.f32 %v1698_v40, %v392_v7 }
  0xee   :  { %v521_v12 = vadd.f32 %v1698_v40, %v520_v8  ;;  %v1442_v13 = vpop.f32.mrf.mxu0  ;;  %v1474_v14 = vpop.f32.mrf.mxu1  ;;  %v637_v17 = vmax.f32 %v401_v5, 0.0  ;;  %v669_v18 = vmax.f32 %v529_v6, 0.0 }
  0xef   :  { %1192 = vst [vmem:[%s1863_s3] sm:$0xff] %v1191_v9   ;;  %1363 = vst [vmem:[%s1863_s3 + $0x80] sm:$0xff] %v1271_v10   ;;  %v404_v15 = vadd.f32 %v1442_v13, %v1698_v40  ;;  %v532_v16 = vadd.f32 %v1474_v14, %v1698_v40  ;;  %v635_v25 = vmax.f32 %v393_v11, 0.0 }
  0xf0   :  { %v395_v19 = vpop.f32.mrf.mxu0  ;;  %v523_v20 = vpop.f32.mrf.mxu1  ;;  %v667_v26 = vmax.f32 %v521_v12, 0.0 }
  0xf1   :  { %v638_v21 = vmax.f32 %v404_v15, 0.0  ;;  %v670_v22 = vmax.f32 %v532_v16, 0.0  ;;  %v396_v23 = vadd.f32 %v1698_v40, %v395_v19  ;;  %v524_v24 = vadd.f32 %v1698_v40, %v523_v20 }
  0xf2   :  { %v1445_v27 = vpop.f32.mrf.mxu0  ;;  %v1477_v28 = vpop.f32.mrf.mxu1 }
  0xf3   :  { %v1206_v29 = vpack.c.bf16 %v638_v21, %v637_v17  ;;  %v1286_v30 = vpack.c.bf16 %v670_v22, %v669_v18  ;;  %v636_v31 = vmax.f32 %v396_v23, 0.0  ;;  %v668_v32 = vmax.f32 %v524_v24, 0.0 }
  0xf4   :  { %v417_v33 = vadd.f32 %v1445_v27, %v1698_v40  ;;  %v545_v34 = vadd.f32 %v1477_v28, %v1698_v40  ;;  %v408_v35 = vpop.f32.mrf.mxu0  ;;  %v536_v36 = vpop.f32.mrf.mxu1 }
  0xf5   :  { %1350 = vst [vmem:[%s1863_s3 + $0x18] sm:$0xff] %v1206_v29   ;;  %1366 = vst [vmem:[%s1863_s3 + $0x98] sm:$0xff] %v1286_v30   ;;  %v1201_v37 = vpack.c.bf16 %v636_v31, %v635_v25  ;;  %v1281_v38 = vpack.c.bf16 %v668_v32, %v667_v26  ;;  %v409_v39 = vadd.f32 %v1698_v40, %v408_v35 }
  0xf6   :  { %v537_v41 = vadd.f32 %v1698_v40, %v536_v36  ;;  %v1446_v42 = vpop.f32.mrf.mxu0  ;;  %v1478_v43 = vpop.f32.mrf.mxu1  ;;  %v641_v46 = vmax.f32 %v417_v33, 0.0  ;;  %v673_v47 = vmax.f32 %v545_v34, 0.0 }
  0xf7   :  { %1349 = vst [vmem:[%s1863_s3 + $0x10] sm:$0xff] %v1201_v37   ;;  %1365 = vst [vmem:[%s1863_s3 + $0x90] sm:$0xff] %v1281_v38   ;;  %v420_v44 = vadd.f32 %v1446_v42, %v1698_v40  ;;  %v548_v45 = vadd.f32 %v1478_v43, %v1698_v40  ;;  %v639_v54 = vmax.f32 %v409_v39, 0.0 }
  0xf8   :  { %v411_v48 = vpop.f32.mrf.mxu0  ;;  %v539_v49 = vpop.f32.mrf.mxu1  ;;  %v671_v55 = vmax.f32 %v537_v41, 0.0 }
  0xf9   :  { %v642_v50 = vmax.f32 %v420_v44, 0.0  ;;  %v674_v51 = vmax.f32 %v548_v45, 0.0  ;;  %v412_v52 = vadd.f32 %v1698_v40, %v411_v48  ;;  %v540_v53 = vadd.f32 %v1698_v40, %v539_v49 }
  0xfa   :  { %v1449_v56 = vpop.f32.mrf.mxu0  ;;  %v1481_v57 = vpop.f32.mrf.mxu1 }
  0xfb   :  { %v1216_v58 = vpack.c.bf16 %v642_v50, %v641_v46  ;;  %v1296_v59 = vpack.c.bf16 %v674_v51, %v673_v47  ;;  %v640_v60 = vmax.f32 %v412_v52, 0.0  ;;  %v672_v61 = vmax.f32 %v540_v53, 0.0 }
  0xfc   :  { %v433_v62 = vadd.f32 %v1449_v56, %v1698_v40  ;;  %v561_v63 = vadd.f32 %v1481_v57, %v1698_v40  ;;  %v424_v0 = vpop.f32.mrf.mxu0  ;;  %v552_v1 = vpop.f32.mrf.mxu1 }
  0xfd   :  { %1352 = vst [vmem:[%s1863_s3 + $0x28] sm:$0xff] %v1216_v58   ;;  %1368 = vst [vmem:[%s1863_s3 + $0xa8] sm:$0xff] %v1296_v59   ;;  %v1211_v2 = vpack.c.bf16 %v640_v60, %v639_v54  ;;  %v1291_v3 = vpack.c.bf16 %v672_v61, %v671_v55  ;;  %v425_v4 = vadd.f32 %v1698_v40, %v424_v0 }
  0xfe   :  { %v553_v5 = vadd.f32 %v1698_v40, %v552_v1  ;;  %v1450_v6 = vpop.f32.mrf.mxu0  ;;  %v1482_v7 = vpop.f32.mrf.mxu1  ;;  %v645_v10 = vmax.f32 %v433_v62, 0.0  ;;  %v677_v11 = vmax.f32 %v561_v63, 0.0 }
  0xff   :  { %1351 = vst [vmem:[%s1863_s3 + $0x20] sm:$0xff] %v1211_v2   ;;  %1367 = vst [vmem:[%s1863_s3 + $0xa0] sm:$0xff] %v1291_v3   ;;  %v436_v8 = vadd.f32 %v1450_v6, %v1698_v40  ;;  %v564_v9 = vadd.f32 %v1482_v7, %v1698_v40  ;;  %v643_v18 = vmax.f32 %v425_v4, 0.0 }
 0x100   :  { %v427_v12 = vpop.f32.mrf.mxu0  ;;  %v555_v13 = vpop.f32.mrf.mxu1  ;;  %v675_v19 = vmax.f32 %v553_v5, 0.0 }
 0x101   :  { %v646_v14 = vmax.f32 %v436_v8, 0.0  ;;  %v678_v15 = vmax.f32 %v564_v9, 0.0  ;;  %v428_v16 = vadd.f32 %v1698_v40, %v427_v12  ;;  %v556_v17 = vadd.f32 %v1698_v40, %v555_v13 }
 0x102   :  { %v1453_v20 = vpop.f32.mrf.mxu0  ;;  %v1485_v21 = vpop.f32.mrf.mxu1 }
 0x103   :  { %v1226_v22 = vpack.c.bf16 %v646_v14, %v645_v10  ;;  %v1306_v23 = vpack.c.bf16 %v678_v15, %v677_v11  ;;  %v644_v24 = vmax.f32 %v428_v16, 0.0  ;;  %v676_v25 = vmax.f32 %v556_v17, 0.0 }
 0x104   :  { %v449_v26 = vadd.f32 %v1453_v20, %v1698_v40  ;;  %v577_v27 = vadd.f32 %v1485_v21, %v1698_v40  ;;  %v440_v28 = vpop.f32.mrf.mxu0  ;;  %v568_v29 = vpop.f32.mrf.mxu1 }
 0x105   :  { %1354 = vst [vmem:[%s1863_s3 + $0x38] sm:$0xff] %v1226_v22   ;;  %1370 = vst [vmem:[%s1863_s3 + $0xb8] sm:$0xff] %v1306_v23   ;;  %v1221_v30 = vpack.c.bf16 %v644_v24, %v643_v18  ;;  %v1301_v31 = vpack.c.bf16 %v676_v25, %v675_v19  ;;  %v441_v32 = vadd.f32 %v1698_v40, %v440_v28 }
 0x106   :  { %v569_v33 = vadd.f32 %v1698_v40, %v568_v29  ;;  %v1454_v34 = vpop.f32.mrf.mxu0  ;;  %v1486_v35 = vpop.f32.mrf.mxu1  ;;  %v649_v38 = vmax.f32 %v449_v26, 0.0  ;;  %v681_v39 = vmax.f32 %v577_v27, 0.0 }
 0x107   :  { %1353 = vst [vmem:[%s1863_s3 + $0x30] sm:$0xff] %v1221_v30   ;;  %1369 = vst [vmem:[%s1863_s3 + $0xb0] sm:$0xff] %v1301_v31   ;;  %v452_v36 = vadd.f32 %v1454_v34, %v1698_v40  ;;  %v580_v37 = vadd.f32 %v1486_v35, %v1698_v40  ;;  %v647_v47 = vmax.f32 %v441_v32, 0.0 }
 0x108   :  { %v443_v41 = vpop.f32.mrf.mxu0  ;;  %v571_v42 = vpop.f32.mrf.mxu1  ;;  %v679_v48 = vmax.f32 %v569_v33, 0.0 }
 0x109   :  { %v650_v43 = vmax.f32 %v452_v36, 0.0  ;;  %v682_v44 = vmax.f32 %v580_v37, 0.0  ;;  %v444_v45 = vadd.f32 %v1698_v40, %v443_v41  ;;  %v572_v46 = vadd.f32 %v1698_v40, %v571_v42 }
 0x10a   :  { %v1457_v49 = vpop.f32.mrf.mxu0  ;;  %v1489_v50 = vpop.f32.mrf.mxu1 }
 0x10b   :  { %v1236_v51 = vpack.c.bf16 %v650_v43, %v649_v38  ;;  %v1316_v52 = vpack.c.bf16 %v682_v44, %v681_v39  ;;  %v648_v53 = vmax.f32 %v444_v45, 0.0  ;;  %v680_v54 = vmax.f32 %v572_v46, 0.0 }
 0x10c   :  { %v465_v55 = vadd.f32 %v1457_v49, %v1698_v40  ;;  %v593_v56 = vadd.f32 %v1489_v50, %v1698_v40  ;;  %v456_v57 = vpop.f32.mrf.mxu0  ;;  %v584_v58 = vpop.f32.mrf.mxu1 }
 0x10d   :  { %1356 = vst [vmem:[%s1863_s3 + $0x48] sm:$0xff] %v1236_v51   ;;  %1372 = vst [vmem:[%s1863_s3 + $0xc8] sm:$0xff] %v1316_v52   ;;  %v1231_v59 = vpack.c.bf16 %v648_v53, %v647_v47  ;;  %v1311_v60 = vpack.c.bf16 %v680_v54, %v679_v48  ;;  %v457_v61 = vadd.f32 %v1698_v40, %v456_v57 }
 0x10e   :  { %v585_v62 = vadd.f32 %v1698_v40, %v584_v58  ;;  %v1458_v63 = vpop.f32.mrf.mxu0  ;;  %v1490_v0 = vpop.f32.mrf.mxu1  ;;  %v653_v3 = vmax.f32 %v465_v55, 0.0  ;;  %v685_v4 = vmax.f32 %v593_v56, 0.0 }
 0x10f   :  { %1355 = vst [vmem:[%s1863_s3 + $0x40] sm:$0xff] %v1231_v59   ;;  %1371 = vst [vmem:[%s1863_s3 + $0xc0] sm:$0xff] %v1311_v60   ;;  %v468_v1 = vadd.f32 %v1458_v63, %v1698_v40  ;;  %v596_v2 = vadd.f32 %v1490_v0, %v1698_v40  ;;  %v651_v11 = vmax.f32 %v457_v61, 0.0 }
 0x110   :  { %v459_v5 = vpop.f32.mrf.mxu0  ;;  %v587_v6 = vpop.f32.mrf.mxu1  ;;  %v683_v12 = vmax.f32 %v585_v62, 0.0 }
 0x111   :  { %v654_v7 = vmax.f32 %v468_v1, 0.0  ;;  %v686_v8 = vmax.f32 %v596_v2, 0.0  ;;  %v460_v9 = vadd.f32 %v1698_v40, %v459_v5  ;;  %v588_v10 = vadd.f32 %v1698_v40, %v587_v6 }
 0x112   :  { %v1461_v13 = vpop.f32.mrf.mxu0  ;;  %v1493_v14 = vpop.f32.mrf.mxu1 }
 0x113   :  { %v1246_v15 = vpack.c.bf16 %v654_v7, %v653_v3  ;;  %v1326_v16 = vpack.c.bf16 %v686_v8, %v685_v4  ;;  %v652_v17 = vmax.f32 %v460_v9, 0.0  ;;  %v684_v18 = vmax.f32 %v588_v10, 0.0 }
 0x114   :  { %v481_v19 = vadd.f32 %v1461_v13, %v1698_v40  ;;  %v609_v20 = vadd.f32 %v1493_v14, %v1698_v40  ;;  %v472_v21 = vpop.f32.mrf.mxu0  ;;  %v600_v22 = vpop.f32.mrf.mxu1 }
 0x115   :  { %1358 = vst [vmem:[%s1863_s3 + $0x58] sm:$0xff] %v1246_v15   ;;  %1374 = vst [vmem:[%s1863_s3 + $0xd8] sm:$0xff] %v1326_v16   ;;  %v1241_v23 = vpack.c.bf16 %v652_v17, %v651_v11  ;;  %v1321_v24 = vpack.c.bf16 %v684_v18, %v683_v12  ;;  %v473_v25 = vadd.f32 %v1698_v40, %v472_v21 }
 0x116   :  { %v601_v26 = vadd.f32 %v1698_v40, %v600_v22  ;;  %v1462_v27 = vpop.f32.mrf.mxu0  ;;  %v1494_v28 = vpop.f32.mrf.mxu1  ;;  %v657_v31 = vmax.f32 %v481_v19, 0.0  ;;  %v689_v32 = vmax.f32 %v609_v20, 0.0 }
 0x117   :  { %1357 = vst [vmem:[%s1863_s3 + $0x50] sm:$0xff] %v1241_v23   ;;  %1373 = vst [vmem:[%s1863_s3 + $0xd0] sm:$0xff] %v1321_v24   ;;  %v484_v29 = vadd.f32 %v1462_v27, %v1698_v40  ;;  %v612_v30 = vadd.f32 %v1494_v28, %v1698_v40  ;;  %v655_v39 = vmax.f32 %v473_v25, 0.0 }
 0x118   :  { %v475_v33 = vpop.f32.mrf.mxu0  ;;  %v603_v34 = vpop.f32.mrf.mxu1  ;;  %v687_v41 = vmax.f32 %v601_v26, 0.0 }
 0x119   :  { %v658_v35 = vmax.f32 %v484_v29, 0.0  ;;  %v690_v36 = vmax.f32 %v612_v30, 0.0  ;;  %v476_v37 = vadd.f32 %v1698_v40, %v475_v33  ;;  %v604_v38 = vadd.f32 %v1698_v40, %v603_v34 }
 0x11a   :  { %v1465_v42 = vpop.f32.mrf.mxu0  ;;  %v1497_v43 = vpop.f32.mrf.mxu1 }
 0x11b   :  { %v1256_v44 = vpack.c.bf16 %v658_v35, %v657_v31  ;;  %v1336_v45 = vpack.c.bf16 %v690_v36, %v689_v32  ;;  %v656_v46 = vmax.f32 %v476_v37, 0.0  ;;  %v688_v47 = vmax.f32 %v604_v38, 0.0 }
 0x11c   :  { %v497_v48 = vadd.f32 %v1465_v42, %v1698_v40  ;;  %v625_v49 = vadd.f32 %v1497_v43, %v1698_v40  ;;  %v488_v50 = vpop.f32.mrf.mxu0  ;;  %v616_v51 = vpop.f32.mrf.mxu1 }
 0x11d   :  { %1360 = vst [vmem:[%s1863_s3 + $0x68] sm:$0xff] %v1256_v44   ;;  %1376 = vst [vmem:[%s1863_s3 + $0xe8] sm:$0xff] %v1336_v45   ;;  %v1251_v52 = vpack.c.bf16 %v656_v46, %v655_v39  ;;  %v1331_v53 = vpack.c.bf16 %v688_v47, %v687_v41  ;;  %v489_v54 = vadd.f32 %v1698_v40, %v488_v50 }
 0x11e   :  { %v617_v55 = vadd.f32 %v1698_v40, %v616_v51  ;;  %v1466_v56 = vpop.f32.mrf.mxu0  ;;  %v1498_v57 = vpop.f32.mrf.mxu1  ;;  %v661_v60 = vmax.f32 %v497_v48, 0.0  ;;  %v693_v61 = vmax.f32 %v625_v49, 0.0 }
 0x11f   :  { %1359 = vst [vmem:[%s1863_s3 + $0x60] sm:$0xff] %v1251_v52   ;;  %1375 = vst [vmem:[%s1863_s3 + $0xe0] sm:$0xff] %v1331_v53   ;;  %v500_v58 = vadd.f32 %v1466_v56, %v1698_v40  ;;  %v628_v59 = vadd.f32 %v1498_v57, %v1698_v40  ;;  %v659_v4 = vmax.f32 %v489_v54, 0.0 }
 0x120   :  { %v491_v62 = vpop.f32.mrf.mxu0  ;;  %v619_v63 = vpop.f32.mrf.mxu1  ;;  %v691_v5 = vmax.f32 %v617_v55, 0.0 }
 0x121   :  { %v662_v0 = vmax.f32 %v500_v58, 0.0  ;;  %v694_v1 = vmax.f32 %v628_v59, 0.0  ;;  %v492_v2 = vadd.f32 %v1698_v40, %v491_v62  ;;  %v620_v3 = vadd.f32 %v1698_v40, %v619_v63 }
 0x123   :  { %v1266_v6 = vpack.c.bf16 %v662_v0, %v661_v60  ;;  %v1346_v7 = vpack.c.bf16 %v694_v1, %v693_v61  ;;  %v660_v8 = vmax.f32 %v492_v2, 0.0  ;;  %v692_v9 = vmax.f32 %v620_v3, 0.0 }
 0x125   :  { %1362 = vst [vmem:[%s1863_s3 + $0x78] sm:$0xff] %v1266_v6   ;;  %1378 = vst [vmem:[%s1863_s3 + $0xf8] sm:$0xff] %v1346_v7   ;;  %v1261_v10 = vpack.c.bf16 %v660_v8, %v659_v4  ;;  %v1341_v11 = vpack.c.bf16 %v692_v9, %v691_v5 }
 0x127   :  { %1361 = vst [vmem:[%s1863_s3 + $0x70] sm:$0xff] %v1261_v10   ;;  %1377 = vst [vmem:[%s1863_s3 + $0xf0] sm:$0xff] %v1341_v11  }

// kernel: mr_cnn_lstm_forward.5
= control target key start
LH: loop header
LB: loop body
LE: loop exit
PB: predicated region body
PF: predicated region fallthrough
CT: control target
= control target key end

     0   :  { %s2207_s12 = smov 0   ;;  %s2709_s0 = inlined_call_operand.vmem [shape: bf16[8,5,5,512], index: 0, kind: input, shape index: {}]   ;;  %s2710_s1 = inlined_call_operand.vmem [shape: bf16[9,128,128], index: 1, kind: input, shape index: {}]   ;;  %s2711_s2 = inlined_call_operand.vmem [shape: f32[1,128], index: 2, kind: input, shape index: {}]   ;;  %s2712_s3 = inlined_call_operand.vmem [shape: bf16[8,4,4,128], index: 3, kind: output, shape index: {}]  }
   0x1 LB: > { %s1613_s13 = sadd.s32 4294967295, %s2182_s12   ;;  %p1617_p0 = scmp.ge.s32.totalorder %s2182_s12, 1  ;;  %s2182_s12 = sphi %s2207_s12, %s13_s12  }
   0x2   : > { %p137_p1 = scmp.lt.s32.totalorder %s2182_s12, 9 }
   0x4   : > { %p138_p2 = pnand %p1617_p0, %p137_p1 }
   0x5   : > { %p161_p3 = scmp.lt.s32.totalorder (!%p138_p2), %s1613_s13, 7 }
   0x6   : > { %141 = sbr.rel (%p138_p2) target bundleno = 380 (0x17c), region = 32 }
   0xb   : > { %v2098_v0 = vld [vmem:[%s2710_s1 + $0x78] sm:$0xff]   ;;  %v2184_v1 = vmov 0.0   ;;  %v2100_v3 = vld [vmem:[%s2710_s1 + $0x70] sm:$0xff]   ;;  %vm2185_vm0 = vmmov 0   ;;  %s2718_s13 = smov (!%p161_p3, %s1613_s13), 7  ;;  %v2102_v5 = vld [vmem:[%s2710_s1 + $0x68] sm:$0xff]   ;;  %v204_v10 = vlaneseq }
   0xc   : > { %1906 = vmatprep.subr.bf16.mxu0 %v2184_v1  ;;  %1926 = vmatprep.subr.bf16.mxu1 %v2184_v1  ;;  %v2099_v2 = vld [vmem:[%s2710_s1 + $0x38] sm:$0xff]   ;;  %v2101_v4 = vld [vmem:[%s2710_s1 + $0x30] sm:$0xff]   ;;  %v2103_v6 = vld [vmem:[%s2710_s1 + $0x28] sm:$0xff]   ;;  %s2086_s26 = smul.u32 80, %s2718_s13  ;;  %v2186_v17 = vmov 1983009808  }
   0xd   : > { %1907 = vmatpush3.bf16.msra.mxu0 %v2098_v0  ;;  %1922 = vmatprep.mubr.msk.bf16.mxu0 %vm2185_vm0, %v2184_v1  ;;  %v2104_v7 = vld [vmem:[%s2710_s1 + $0x60] sm:$0xff]   ;;  %v2106_v9 = vld [vmem:[%s2710_s1 + $0x58] sm:$0xff]   ;;  %v2108_v14 = vld [vmem:[%s2710_s1 + $0x50] sm:$0xff]   ;;  %v202_v18 = vunpack.c.l.s4 %v2186_v17  ;;  %v205_v19 = vshrl.u32 %v204_v10, 7  ;;  %vm468_vm1 = vsmask.f32 1280 }
   0xe   : > { %1927 = vmatpush3.bf16.msra.mxu1 %v2099_v2  ;;  %1908 = vmatprep.subr.bf16.mxu0 %v2184_v1  ;;  %v2105_v8 = vld [vmem:[%s2710_s1 + $0x20] sm:$0xff]   ;;  %s2257_s6 = scalar_lea.vmem %s2709_s0, %s2086_s26  ;;  %v2107_v11 = vld [vmem:[%s2710_s1 + $0x18] sm:$0xff]   ;;  %v2109_v16 = vld [vmem:[%s2710_s1 + $0x10] sm:$0xff]   ;;  %vm469_vm2 = vsmask.f32 3336  ;;  %s1824_s16 = sshll.u32 %s2718_s13, 3 }
   0xf   : > { %1928 = vmatprep.subr.bf16.mxu1 %v2184_v1  ;;  %1942 = vmatprep.mubr.msk.bf16.mxu1 %vm2185_vm0, %v2184_v1  ;;  %v2268_v12 = vld [vmem:[%s2257_s6 + $0x10] sm:$0x77]  ;;  %v2271_v13 = vld [vmem:[%s2257_s6 + $0x20] sm:$0x77]  ;;  %v203_v22 = vunpack.c.0.s8 %v202_v18  ;;  %v2110_v25 = vld [vmem:[%s2710_s1 + $0x48] sm:$0xff]   ;;  %s170_s19 = scalar_lea.vmem %s2712_s3, %s1824_s16 }
  0x10   : > { %v1149_v15 = vcombine.low %v2268_v12, %v2271_v13  ;;  %v172_v20 = vld [vmem:[%s2257_s6] sm:$0x77]  ;;  %v2285_v21 = vld [vmem:[%s2257_s6 + $0x30] sm:$0x77]  ;;  %v2111_v27 = vld [vmem:[%s2710_s1 + $0x8] sm:$0xff]  }
  0x11   : > { %1909 = vmatpush3.bf16.msra.mxu0 %v2100_v3  ;;  %v357_v23 = vcombine.low %v172_v20, %v2268_v12  ;;  %v358_v24 = vcombine.low %v2271_v13, %v2285_v21  ;;  %v2293_v26 = vsub.s32 %v203_v22, %v205_v19  ;;  %v2112_v32 = vld [vmem:[%s2710_s1 + $0x40] sm:$0xff]   ;;  %v2116_v46 = vld [vmem:[%s2710_s1 + $0xb8] sm:$0xff]   ;;  %v2118_v54 = vld [vmem:[%s2710_s1 + $0xb0] sm:$0xff]   ;;  %vm471_vm3 = vsmask.f32 5392 }
  0x12   : > { %1929 = vmatpush3.bf16.msra.mxu1 %v2101_v4  ;;  %1910 = vmatprep.subr.bf16.mxu0 %v2184_v1  ;;  %v2113_v39 = vld [vmem:[%s2710_s1] sm:$0xff]   ;;  %v2117_v47 = vld [vmem:[%s2710_s1 + $0xf8] sm:$0xff]   ;;  %v2119_v55 = vld [vmem:[%s2710_s1 + $0xf0] sm:$0xff]   ;;  %vm473_vm6 = vsmask.f32 7448 }
  0x13   : > { %1930 = vmatprep.subr.bf16.mxu1 %v2184_v1  ;;  %v2301_v28 = vrot.slane %v172_v20, %v2293_v26  ;;  %v214_v29 = vrot.slane %v2268_v12, %v2293_v26  ;;  %v221_v30 = vrot.slane %v2271_v13, %v2293_v26  ;;  %v2309_v31 = vrot.slane %v2285_v21, %v2293_v26  ;;  %vm2351_vm4 = vmor %vm468_vm1, %vm469_vm2  ;;  %v2121_v10 = vld [vmem:[%s2710_s1 + $0xe8] sm:$0xff]   ;;  %v2122_v20 = vld [vmem:[%s2710_s1 + $0xa0] sm:$0xff]  }
  0x14   : > { %v365_v33 = vrot.slane %v357_v23, %v2293_v26  ;;  %v372_v34 = vrot.slane %v358_v24, %v2293_v26  ;;  %vm472_vm5 = vmor %vm2351_vm4, %vm471_vm3  ;;  %v2123_v22 = vld [vmem:[%s2710_s1 + $0xe0] sm:$0xff]   ;;  %v2142_v13 = vld [vmem:[%s2710_s1 + $0x118] sm:$0xff]  }
  0x15   : > { %1911 = vmatpush3.bf16.msra.mxu0 %v2102_v5  ;;  %v229_v35 = vrot.slane %v2301_v28, 2  ;;  %v230_v36 = vrot.slane %v214_v29, 2  ;;  %v231_v37 = vrot.slane %v221_v30, 2  ;;  %v232_v38 = vrot.slane %v2309_v31, 2  ;;  %vm2378_vm7 = vmor %vm472_vm5, %vm473_vm6 }
  0x16   : > { %1931 = vmatpush3.bf16.msra.mxu1 %v2103_v6  ;;  %1912 = vmatprep.subr.bf16.mxu0 %v2184_v1  ;;  %v373_v45 = vcombine.low %v365_v33, %v372_v34  ;;  %v465_v49 = vcombine.high %v214_v29, %v214_v29  ;;  %v466_v50 = vcombine.high %v221_v30, %v221_v30  ;;  %v476_v51 = vshrl.u32 %v2301_v28, 16  ;;  %v2125_v33 = vld [vmem:[%s2710_s1 + $0xd8] sm:$0xff]  }
  0x17   : > { %1932 = vmatprep.subr.bf16.mxu1 %v2184_v1  ;;  %v250_v40 = vcombine.low %v229_v35, %v230_v36  ;;  %v251_v41 = vcombine.low %v231_v37, %v232_v38  ;;  %v2325_v42 = vcombine.low %v230_v36, %v231_v37  ;;  %v479_v52 = vshll.u32 %v2301_v28, 16 }
  0x18   : > { %v490_v53 = vshrl.u32 %v214_v29, 16  ;;  %v464_v56 = vcombine.high %v2301_v28, %v2301_v28  ;;  %v467_v57 = vcombine.high %v2309_v31, %v2309_v31  ;;  %v493_v58 = vshll.u32 %v214_v29, 16 }
  0x19   : > { %1913 = vmatpush3.bf16.msra.mxu0 %v2104_v7  ;;  %v258_v43 = vrot.slane %v250_v40, %v2293_v26  ;;  %v265_v44 = vrot.slane %v251_v41, %v2293_v26  ;;  %v499_v61 = vshll.u32 %v465_v49, 16  ;;  %v504_v62 = vshrl.u32 %v221_v30, 16 }
  0x1a   : > { %1933 = vmatpush3.bf16.msra.mxu1 %v2105_v8  ;;  %1914 = vmatprep.subr.bf16.mxu0 %v2184_v1  ;;  %v492_v60 = vrot.slane %v490_v53, 6  ;;  %v507_v63 = vshll.u32 %v221_v30, 16  ;;  %v478_v0 = vrot.slane %v476_v51, 6  ;;  %v495_v2 = vrot.slane %v493_v58, 7  ;;  %v2128_v51 = vld [vmem:[%s2710_s1 + $0x88] sm:$0xff]  }
  0x1b   : > { %1934 = vmatprep.subr.bf16.mxu1 %v2184_v1  ;;  %v266_v48 = vcombine.low %v258_v43, %v265_v44  ;;  %v513_v3 = vshll.u32 %v466_v50, 16  ;;  %v518_v4 = vshrl.u32 %v2309_v31, 16  ;;  %v481_v5 = vrot.slane %v479_v52, 7  ;;  %v2126_v43 = vld [vmem:[%s2710_s1 + $0x90] sm:$0xff]   ;;  %v179_v50 = vld [vmem:[%s2257_s6 + $0x38] sm:$0x77] }
  0x1c   : > { %v506_v6 = vrot.slane %v504_v62, 6  ;;  %v509_v7 = vrot.slane %v507_v63, 7  ;;  %v521_v8 = vshll.u32 %v2309_v31, 16  ;;  %v501_v17 = vrot.slane %v499_v61, 7  ;;  %v2127_v44 = vld [vmem:[%s2710_s1 + $0xd0] sm:$0xff]   ;;  %v2130_v62 = vld [vmem:[%s2710_s1 + $0x80] sm:$0xff]  }
  0x1d   : > { %1915 = vmatpush3.bf16.msra.mxu0 %v2106_v9  ;;  %v2120_v9 = vld [vmem:[%s2710_s1 + $0xa8] sm:$0xff]   ;;  %v515_v23 = vrot.slane %v513_v3, 7  ;;  %v527_v24 = vshll.u32 %v467_v57, 16  ;;  %v2131_v63 = vld [vmem:[%s2710_s1 + $0xc0] sm:$0xff]  }
  0x1e   : > { %1935 = vmatpush3.bf16.msra.mxu1 %v2107_v11  ;;  %1916 = vmatprep.subr.bf16.mxu0 %v2184_v1  ;;  %v496_v11 = vor.u32 %v495_v2, %v492_v60  ;;  %v510_v18 = vor.u32 %v509_v7, %v506_v6  ;;  %v523_v19 = vrot.slane %v521_v8, 7  ;;  %v2458_v8 = vrot.slane %v179_v50, %v2293_v26 }
  0x1f   : > { %1936 = vmatprep.subr.bf16.mxu1 %v2184_v1  ;;  %v529_v40 = vrot.slane %v527_v24, 7 }
  0x20   : > { %v497_v28 = vrot.slane %v496_v11, 2  ;;  %v511_v29 = vrot.slane %v510_v18, 2  ;;  %v992_v24 = vshrl.u32 %v2458_v8, 16 }
  0x21   : > { %1917 = vmatpush3.bf16.msra.mxu0 %v2108_v14  ;;  %v520_v14 = vrot.slane %v518_v4, 6 }
  0x22   : > { %1937 = vmatpush3.bf16.msra.mxu1 %v2109_v16  ;;  %1918 = vmatprep.subr.bf16.mxu0 %v2184_v1  ;;  %v485_v16 = vshll.u32 %v464_v56, 16  ;;  %v2392_v36 = vsel %vm2378_vm7, %v497_v28, %v501_v17  ;;  %v2396_v37 = vsel %vm2378_vm7, %v511_v29, %v515_v23  ;;  %v2129_v56 = vld [vmem:[%s2710_s1 + $0xc8] sm:$0xff]  }
  0x23   : > { %1938 = vmatprep.subr.bf16.mxu1 %v2184_v1  ;;  %v524_v30 = vor.u32 %v523_v19, %v520_v14  ;;  %v1424_v41 = vcombine.low %v2392_v36, %v2396_v37  ;;  %v2136_v14 = vld [vmem:[%s2710_s1 + $0x130] sm:$0xff]  }
  0x24   : > { %v487_v35 = vrot.slane %v485_v16, 7  ;;  %v2137_v16 = vld [vmem:[%s2710_s1 + $0x170] sm:$0xff]  }
  0x25   : > { %1919 = vmatpush3.bf16.msra.mxu0 %v2110_v25 }
  0x26   : > { %1939 = vmatpush3.bf16.msra.mxu1 %v2111_v27  ;;  %1920 = vmatprep.subr.bf16.mxu0 %v2184_v1  ;;  %v482_v27 = vor.u32 %v481_v5, %v478_v0  ;;  %v2132_v5 = vld [vmem:[%s2710_s1 + $0x138] sm:$0xff]  }
  0x27   : > { %1940 = vmatprep.subr.bf16.mxu1 %v2184_v1 }
  0x28   : > { %v483_v34 = vrot.slane %v482_v27, 2  ;;  %v995_v27 = vshll.u32 %v2458_v8, 16 }
  0x29   : > { %1921 = vmatpush3.bf16.msra.mxu0 %v2112_v32  ;;  %v2124_v32 = vld [vmem:[%s2710_s1 + $0x98] sm:$0xff]  }
  0x2a   : > { %1941 = vmatpush3.bf16.msra.mxu1 %v2113_v39  ;;  %1946 = vmatprep.subr.bf16.mxu0 %v2184_v1  ;;  %v525_v39 = vrot.slane %v524_v30, 2 }
  0x2b   : > { %1966 = vmatprep.subr.bf16.mxu1 %v2184_v1 }
  0x2c   : > { %1923 = vmatmul.mubr.bf16.vlgmr.msra.gmra.mxu0 %v266_v48  ;;  %v488_v48 = vsel %vm2378_vm7, %v483_v34, %v487_v35  ;;  %v2415_v49 = vsel %vm2378_vm7, %v525_v39, %v529_v40  ;;  %v948_v34 = vcombine.high %v2458_v8, %v2458_v8 }
  0x2d   : > { %1943 = vmatmul.mubr.bf16.vlgmr.msra.gmra.mxu1 %v373_v45  ;;  %1947 = vmatpush3.bf16.msra.mxu0 %v2116_v46  ;;  %v173_v45 = vld [vmem:[%s2257_s6 + $0x8] sm:$0x77]  ;;  %v175_v46 = vld [vmem:[%s2257_s6 + $0x18] sm:$0x77]  ;;  %v548_v52 = vcombine.low %v488_v48, %v2392_v36  ;;  %v549_v53 = vcombine.low %v2396_v37, %v2415_v49  ;;  %v2149_v36 = vld [vmem:[%s2710_s1 + $0x140] sm:$0xff]  }
  0x2e   : > { %1967 = vmatpush3.bf16.msra.mxu1 %v2117_v47  ;;  %1948 = vmatprep.subr.bf16.mxu0 %v2184_v1  ;;  %v177_v47 = vld [vmem:[%s2257_s6 + $0x28] sm:$0x77]  ;;  %v2432_v57 = vrot.slane %v173_v45, %v2293_v26  ;;  %v2447_v0 = vrot.slane %v175_v46, %v2293_v26 }
  0x2f   : > { %1968 = vmatprep.subr.bf16.mxu1 %v2184_v1  ;;  %1962 = vmatprep.mubr.msk.bf16.mxu0 %vm2185_vm0, %v2184_v1  ;;  %v556_v58 = vrot.slane %v548_v52, %v2293_v26  ;;  %v563_v59 = vrot.slane %v549_v53, %v2293_v26  ;;  %v2455_v7 = vrot.slane %v177_v47, %v2293_v26  ;;  %v1001_v53 = vshll.u32 %v948_v34, 16 }
  0x30   : > { %1982 = vmatprep.mubr.msk.bf16.mxu1 %vm2185_vm0, %v2184_v1  ;;  %v950_v2 = vshrl.u32 %v2432_v57, 16  ;;  %v953_v3 = vshll.u32 %v2432_v57, 16  ;;  %v967_v11 = vshll.u32 %v2447_v0, 16  ;;  %v945_v17 = vcombine.high %v2432_v57, %v2432_v57 }
  0x31   : > { %1949 = vmatpush3.bf16.msra.mxu0 %v2118_v54  ;;  %v678_v54 = vcombine.low %v173_v45, %v175_v46  ;;  %v564_v4 = vcombine.low %v556_v58, %v563_v59  ;;  %v946_v18 = vcombine.high %v2447_v0, %v2447_v0  ;;  %v981_v23 = vshll.u32 %v2455_v7, 16  ;;  %v180_v58 = vld [vmem:[%s2257_s6 + $0x40] sm:$0x77] }
  0x32   : > { %1969 = vmatpush3.bf16.msra.mxu1 %v2119_v55  ;;  %1950 = vmatprep.subr.bf16.mxu0 %v2184_v1  ;;  %v679_v55 = vcombine.low %v177_v47, %v179_v50  ;;  %v952_v19 = vrot.slane %v950_v2, 6  ;;  %v947_v28 = vcombine.high %v2455_v7, %v2455_v7  ;;  %v969_v30 = vrot.slane %v967_v11, 7 }
  0x33   : > { %1970 = vmatprep.subr.bf16.mxu1 %v2184_v1  ;;  %v686_v60 = vrot.slane %v678_v54, %v2293_v26  ;;  %v959_v35 = vshll.u32 %v945_v17, 16  ;;  %v973_v39 = vshll.u32 %v946_v18, 16  ;;  %v994_v45 = vrot.slane %v992_v24, 6 }
  0x34   : > { %v693_v61 = vrot.slane %v679_v55, %v2293_v26  ;;  %v997_v46 = vrot.slane %v995_v27, 7  ;;  %v815_v47 = vrot.slane %v2432_v57, 2  ;;  %v987_v50 = vshll.u32 %v947_v28, 16  ;;  %v2141_v57 = vld [vmem:[%s2710_s1 + $0x160] sm:$0xff]  }
  0x35   : > { %1951 = vmatpush3.bf16.msra.mxu0 %v2120_v9  ;;  %v2135_v9 = vld [vmem:[%s2710_s1 + $0x178] sm:$0xff]   ;;  %v816_v52 = vrot.slane %v2447_v0, 2  ;;  %v961_v55 = vrot.slane %v959_v35, 7  ;;  %v2509_v59 = vrot.slane %v1149_v15, %v2293_v26  ;;  %v1003_v2 = vrot.slane %v1001_v53, 7  ;;  %v2152_v53 = vld [vmem:[%s2710_s1 + $0x1b0] sm:$0xff]  }
  0x36   : > { %1971 = vmatpush3.bf16.msra.mxu1 %v2121_v10  ;;  %1952 = vmatprep.subr.bf16.mxu0 %v2184_v1  ;;  %v694_v6 = vcombine.low %v686_v60, %v693_v61  ;;  %v964_v10 = vshrl.u32 %v2447_v0, 16  ;;  %v975_v60 = vrot.slane %v973_v39, 7  ;;  %v998_v61 = vor.u32 %v997_v46, %v994_v45  ;;  %v2143_v15 = vld [vmem:[%s2710_s1 + $0x158] sm:$0xff]   ;;  %v2146_v39 = vld [vmem:[%s2710_s1 + $0x108] sm:$0xff]  }
  0x37   : > { %1972 = vmatprep.subr.bf16.mxu1 %v2184_v1  ;;  %v989_v12 = vrot.slane %v987_v50, 7  ;;  %v817_v17 = vrot.slane %v2455_v7, 2  ;;  %v2571_v45 = vrot.slane %v1424_v41, %v2293_v26 }
  0x38   : > { %v966_v29 = vrot.slane %v964_v10, 6  ;;  %v999_v10 = vrot.slane %v998_v61, 2  ;;  %v2159_v61 = vld [vmem:[%s2710_s1 + $0x1d8] sm:$0xff]  }
  0x39   : > { %1953 = vmatpush3.bf16.msra.mxu0 %v2122_v20  ;;  %v955_v20 = vrot.slane %v953_v3, 7 }
  0x3a   : > { %1973 = vmatpush3.bf16.msra.mxu1 %v2123_v22  ;;  %1954 = vmatprep.subr.bf16.mxu0 %v2184_v1  ;;  %v978_v22 = vshrl.u32 %v2455_v7, 16  ;;  %v970_v48 = vor.u32 %v969_v30, %v966_v29  ;;  %v2144_v7 = vld [vmem:[%s2710_s1 + $0x110] sm:$0xff]   ;;  %v1004_v24 = vsel %vm2378_vm7, %v999_v10, %v1003_v2  ;;  %v836_v30 = vcombine.low %v815_v47, %v816_v52  ;;  %v2151_v52 = vld [vmem:[%s2710_s1 + $0x1f8] sm:$0xff]  }
  0x3b   : > { %1974 = vmatprep.subr.bf16.mxu1 %v2184_v1  ;;  %v956_v40 = vor.u32 %v955_v20, %v952_v19  ;;  %v2168_v2 = vld [vmem:[%s2710_s1 + $0x238] sm:$0xff]  }
  0x3c   : > { %v971_v0 = vrot.slane %v970_v48, 2  ;;  %v844_v46 = vrot.slane %v836_v30, %v2293_v26 }
  0x3d   : > { %1955 = vmatpush3.bf16.msra.mxu0 %v2124_v32  ;;  %v2138_v32 = vld [vmem:[%s2710_s1 + $0x128] sm:$0xff]   ;;  %v957_v54 = vrot.slane %v956_v40, 2 }
  0x3e   : > { %1975 = vmatpush3.bf16.msra.mxu1 %v2125_v33  ;;  %1956 = vmatprep.subr.bf16.mxu0 %v2184_v1  ;;  %v2139_v33 = vld [vmem:[%s2710_s1 + $0x168] sm:$0xff]   ;;  %v976_v31 = vsel %vm2378_vm7, %v971_v0, %v975_v60  ;;  %v2158_v60 = vld [vmem:[%s2710_s1 + $0x198] sm:$0xff]  }
  0x3f   : > { %1976 = vmatprep.subr.bf16.mxu1 %v2184_v1  ;;  %v2147_v40 = vld [vmem:[%s2710_s1 + $0x148] sm:$0xff]  }
  0x40   : > { %v2162_v0 = vld [vmem:[%s2710_s1 + $0x188] sm:$0xff]  }
  0x41   : > { %1957 = vmatpush3.bf16.msra.mxu0 %v2126_v43  ;;  %v980_v43 = vrot.slane %v978_v22, 6  ;;  %v962_v22 = vsel %vm2378_vm7, %v957_v54, %v961_v55  ;;  %v2153_v54 = vld [vmem:[%s2710_s1 + $0x1f0] sm:$0xff]   ;;  %v2154_v55 = vld [vmem:[%s2710_s1 + $0x1a8] sm:$0xff]  }
  0x42   : > { %1977 = vmatpush3.bf16.msra.mxu1 %v2127_v44  ;;  %1958 = vmatprep.subr.bf16.mxu0 %v2184_v1  ;;  %v983_v44 = vrot.slane %v981_v23, 7  ;;  %v1022_v34 = vcombine.low %v962_v22, %v976_v31 }
  0x43   : > { %1978 = vmatprep.subr.bf16.mxu1 %v2184_v1 }
  0x44   : > { %v1030_v48 = vrot.slane %v1022_v34, %v2293_v26 }
  0x45   : > { %1959 = vmatpush3.bf16.msra.mxu0 %v2128_v51  ;;  %v2140_v51 = vld [vmem:[%s2710_s1 + $0x120] sm:$0xff]  }
  0x46   : > { %1979 = vmatpush3.bf16.msra.mxu1 %v2129_v56  ;;  %1960 = vmatprep.subr.bf16.mxu0 %v2184_v1  ;;  %v984_v56 = vor.u32 %v983_v44, %v980_v43 }
  0x47   : > { %1980 = vmatprep.subr.bf16.mxu1 %v2184_v1 }
  0x49   : > { %1961 = vmatpush3.bf16.msra.mxu0 %v2130_v62  ;;  %v1150_v62 = vcombine.low %v2285_v21, %v180_v58 }
  0x4a   : > { %1981 = vmatpush3.bf16.msra.mxu1 %v2131_v63  ;;  %1986 = vmatprep.subr.bf16.mxu0 %v2184_v1  ;;  %v1264_v63 = vrot.slane %v180_v58, %v2293_v26  ;;  %v2156_v58 = vld [vmem:[%s2710_s1 + $0x1a0] sm:$0xff]  }
  0x4b   : > { %2006 = vmatprep.subr.bf16.mxu1 %v2184_v1  ;;  %v2525_v3 = vrot.slane %v1150_v62, %v2293_v26  ;;  %v2160_v62 = vld [vmem:[%s2710_s1 + $0x190] sm:$0xff]  }
  0x4c   : > { %1963 = vmatmul.mubr.bf16.vlgmr.msra.gmra.mxu0 %v564_v4  ;;  %v1265_v21 = vrot.slane %v1264_v63, 2  ;;  %v985_v4 = vrot.slane %v984_v56, 2  ;;  %v2155_v56 = vld [vmem:[%s2710_s1 + $0x1e8] sm:$0xff]  }
  0x4d   : > { %1983 = vmatmul.mubr.bf16.vlgmr.msra.gmra.mxu1 %v694_v6  ;;  %1987 = vmatpush3.bf16.msra.mxu0 %v2132_v5  ;;  %v1291_v5 = vrot.slane %v2325_v42, %v2293_v26  ;;  %v1392_v6 = vcombine.high %v1264_v63, %v1264_v63  ;;  %v1165_v11 = vcombine.low %v2509_v59, %v2525_v3  ;;  %v818_v42 = vrot.slane %v2458_v8, 2  ;;  %v2145_v8 = vld [vmem:[%s2710_s1 + $0x150] sm:$0xff]   ;;  %v2171_v59 = vld [vmem:[%s2710_s1 + $0x220] sm:$0xff]   ;;  %v2172_v3 = vld [vmem:[%s2710_s1 + $0x218] sm:$0xff]  }
  0x4e   : > { %2007 = vmatpush3.bf16.msra.mxu1 %v2135_v9  ;;  %1988 = vmatprep.subr.bf16.mxu0 %v2184_v1  ;;  %v1394_v9 = vshrl.u32 %v1264_v63, 16 }
  0x4f   : > { %2008 = vmatprep.subr.bf16.mxu1 %v2184_v1  ;;  %2002 = vmatprep.mubr.msk.bf16.mxu0 %vm2185_vm0, %v2184_v1  ;;  %v1403_v23 = vshll.u32 %v1392_v6, 16  ;;  %v2174_v6 = vld [vmem:[%s2710_s1 + $0x208] sm:$0xff]  }
  0x50   : > { %2022 = vmatprep.mubr.msk.bf16.mxu1 %vm2185_vm0, %v2184_v1  ;;  %v1396_v18 = vrot.slane %v1394_v9, 6  ;;  %v2175_v9 = vld [vmem:[%s2710_s1 + $0x200] sm:$0xff]  }
  0x51   : > { %1989 = vmatpush3.bf16.msra.mxu0 %v2136_v14  ;;  %v1284_v14 = vcombine.low %v232_v38, %v1265_v21  ;;  %v990_v38 = vsel %vm2378_vm7, %v985_v4, %v989_v12  ;;  %v1405_v29 = vrot.slane %v1403_v23, 7  ;;  %v2163_v12 = vld [vmem:[%s2710_s1 + $0x1c8] sm:$0xff]   ;;  %v2169_v21 = vld [vmem:[%s2710_s1 + $0x230] sm:$0xff]  }
  0x52   : > { %2009 = vmatpush3.bf16.msra.mxu1 %v2137_v16  ;;  %1990 = vmatprep.subr.bf16.mxu0 %v2184_v1  ;;  %v1397_v16 = vshll.u32 %v1264_v63, 16  ;;  %v1023_v35 = vcombine.low %v990_v38, %v1004_v24  ;;  %v2161_v63 = vld [vmem:[%s2710_s1 + $0x1d0] sm:$0xff]   ;;  %v2170_v4 = vld [vmem:[%s2710_s1 + $0x228] sm:$0xff]  }
  0x53   : > { %2010 = vmatprep.subr.bf16.mxu1 %v2184_v1  ;;  %v1298_v19 = vrot.slane %v1284_v14, %v2293_v26 }
  0x54   : > { %v1399_v20 = vrot.slane %v1397_v16, 7  ;;  %v1037_v25 = vrot.slane %v1023_v35, %v2293_v26 }
  0x55   : > { %1991 = vmatpush3.bf16.msra.mxu0 %v2138_v32  ;;  %v2552_v27 = vcombine.low %v1291_v5, %v1298_v19  ;;  %v2173_v5 = vld [vmem:[%s2710_s1 + $0x210] sm:$0xff]  }
  0x56   : > { %2011 = vmatpush3.bf16.msra.mxu1 %v2139_v33  ;;  %1992 = vmatprep.subr.bf16.mxu0 %v2184_v1  ;;  %v1400_v28 = vor.u32 %v1399_v20, %v1396_v18  ;;  %v837_v33 = vcombine.low %v817_v17, %v818_v42 }
  0x57   : > { %2012 = vmatprep.subr.bf16.mxu1 %v2184_v1 }
  0x58   : > { %v1401_v32 = vrot.slane %v1400_v28, 2  ;;  %v851_v47 = vrot.slane %v837_v33, %v2293_v26 }
  0x59   : > { %1993 = vmatpush3.bf16.msra.mxu0 %v2140_v51  ;;  %v2150_v51 = vld [vmem:[%s2710_s1 + $0x1b8] sm:$0xff]  }
  0x5a   : > { %2013 = vmatpush3.bf16.msra.mxu1 %v2141_v57  ;;  %1994 = vmatprep.subr.bf16.mxu0 %v2184_v1  ;;  %v1406_v43 = vsel %vm2378_vm7, %v1401_v32, %v1405_v29  ;;  %v852_v41 = vcombine.low %v844_v46, %v851_v47  ;;  %v2157_v57 = vld [vmem:[%s2710_s1 + $0x1e0] sm:$0xff]  }
  0x5b   : > { %2014 = vmatprep.subr.bf16.mxu1 %v2184_v1  ;;  %v1425_v44 = vcombine.low %v2415_v49, %v1406_v43  ;;  %v2148_v49 = vld [vmem:[%s2710_s1 + $0x100] sm:$0xff]  }
  0x5d   : > { %1995 = vmatpush3.bf16.msra.mxu0 %v2142_v13  ;;  %v2578_v50 = vrot.slane %v1425_v44, %v2293_v26  ;;  %v1038_v26 = vcombine.low %v1030_v48, %v1037_v25  ;;  %v2164_v13 = vld [vmem:[%s2710_s1 + $0x180] sm:$0xff]  }
  0x5e   : > { %2015 = vmatpush3.bf16.msra.mxu1 %v2143_v15  ;;  %1996 = vmatprep.subr.bf16.mxu0 %v2184_v1  ;;  %v2165_v15 = vld [vmem:[%s2710_s1 + $0x1c0] sm:$0xff]  }
  0x5f   : > { %2016 = vmatprep.subr.bf16.mxu1 %v2184_v1  ;;  %v1440_v37 = vcombine.low %v2571_v45, %v2578_v50 }
  0x61   : > { %1997 = vmatpush3.bf16.msra.mxu0 %v2144_v7 }
  0x62   : > { %2017 = vmatpush3.bf16.msra.mxu1 %v2145_v8  ;;  %1998 = vmatprep.subr.bf16.mxu0 %v2184_v1 }
  0x63   : > { %2018 = vmatprep.subr.bf16.mxu1 %v2184_v1 }
  0x65   : > { %1999 = vmatpush3.bf16.msra.mxu0 %v2146_v39 }
  0x66   : > { %2019 = vmatpush3.bf16.msra.mxu1 %v2147_v40  ;;  %2000 = vmatprep.subr.bf16.mxu0 %v2184_v1 }
  0x67   : > { %2020 = vmatprep.subr.bf16.mxu1 %v2184_v1 }
  0x69   : > { %2001 = vmatpush3.bf16.msra.mxu0 %v2148_v49 }
  0x6a   : > { %2021 = vmatpush3.bf16.msra.mxu1 %v2149_v36  ;;  %2026 = vmatprep.subr.bf16.mxu0 %v2184_v1 }
  0x6b   : > { %2046 = vmatprep.subr.bf16.mxu1 %v2184_v1 }
  0x6c   : > { %2003 = vmatmul.mubr.bf16.vlgmr.msra.gmra.mxu0 %v852_v41 }
  0x6d   : > { %2023 = vmatmul.mubr.bf16.vlgmr.msra.gmra.mxu1 %v1038_v26  ;;  %2027 = vmatpush3.bf16.msra.mxu0 %v2150_v51 }
  0x6e   : > { %2047 = vmatpush3.bf16.msra.mxu1 %v2151_v52  ;;  %2028 = vmatprep.subr.bf16.mxu0 %v2184_v1 }
  0x6f   : > { %2048 = vmatprep.subr.bf16.mxu1 %v2184_v1  ;;  %2042 = vmatprep.mubr.msk.bf16.mxu0 %vm2185_vm0, %v2184_v1 }
  0x70   : > { %2062 = vmatprep.mubr.msk.bf16.mxu1 %vm2185_vm0, %v2184_v1 }
  0x71   : > { %2029 = vmatpush3.bf16.msra.mxu0 %v2152_v53 }
  0x72   : > { %2049 = vmatpush3.bf16.msra.mxu1 %v2153_v54  ;;  %2030 = vmatprep.subr.bf16.mxu0 %v2184_v1 }
  0x73   : > { %2050 = vmatprep.subr.bf16.mxu1 %v2184_v1 }
  0x75   : > { %2031 = vmatpush3.bf16.msra.mxu0 %v2154_v55 }
  0x76   : > { %2051 = vmatpush3.bf16.msra.mxu1 %v2155_v56  ;;  %2032 = vmatprep.subr.bf16.mxu0 %v2184_v1 }
  0x77   : > { %2052 = vmatprep.subr.bf16.mxu1 %v2184_v1 }
  0x79   : > { %2033 = vmatpush3.bf16.msra.mxu0 %v2156_v58  ;;  %v1821_v58 = vld [vmem:[%s2711_s2] ss:$0 sm:$0xff] }
  0x7a   : > { %2053 = vmatpush3.bf16.msra.mxu1 %v2157_v57  ;;  %2034 = vmatprep.subr.bf16.mxu0 %v2184_v1 }
  0x7b   : > { %2054 = vmatprep.subr.bf16.mxu1 %v2184_v1 }
  0x7d   : > { %2035 = vmatpush3.bf16.msra.mxu0 %v2158_v60 }
  0x7e   : > { %2055 = vmatpush3.bf16.msra.mxu1 %v2159_v61  ;;  %2036 = vmatprep.subr.bf16.mxu0 %v2184_v1 }
  0x7f   : > { %2056 = vmatprep.subr.bf16.mxu1 %v2184_v1 }
  0x81   : > { %2037 = vmatpush3.bf16.msra.mxu0 %v2160_v62 }
  0x82   : > { %2057 = vmatpush3.bf16.msra.mxu1 %v2161_v63  ;;  %2038 = vmatprep.subr.bf16.mxu0 %v2184_v1 }
  0x83   : > { %2058 = vmatprep.subr.bf16.mxu1 %v2184_v1 }
  0x85   : > { %2039 = vmatpush3.bf16.msra.mxu0 %v2162_v0 }
  0x86   : > { %2059 = vmatpush3.bf16.msra.mxu1 %v2163_v12  ;;  %2040 = vmatprep.subr.bf16.mxu0 %v2184_v1 }
  0x87   : > { %2060 = vmatprep.subr.bf16.mxu1 %v2184_v1 }
  0x89   : > { %2041 = vmatpush3.bf16.msra.mxu0 %v2164_v13 }
  0x8a   : > { %2061 = vmatpush3.bf16.msra.mxu1 %v2165_v15  ;;  %2066 = vmatprep.subr.bf16.mxu0 %v2184_v1 }
  0x8c   : > { %2043 = vmatmul.mubr.bf16.vlgmr.msra.gmra.mxu0 %v1165_v11 }
  0x8d   : > { %2063 = vmatmul.mubr.bf16.vlgmr.msra.gmra.mxu1 %v2552_v27  ;;  %2067 = vmatpush3.bf16.msra.mxu0 %v2168_v2 }
  0x8e   : > { %2082 = vmatprep.mubr.msk.bf16.mxu0 %vm2185_vm0, %v2184_v1  ;;  %2068 = vmatprep.subr.bf16.mxu0 %v2184_v1 }
  0x91   : > { %2069 = vmatpush3.bf16.msra.mxu0 %v2169_v21 }
  0x92   : > { %2070 = vmatprep.subr.bf16.mxu0 %v2184_v1 }
  0x95   : > { %2071 = vmatpush3.bf16.msra.mxu0 %v2170_v4 }
  0x96   : > { %2072 = vmatprep.subr.bf16.mxu0 %v2184_v1 }
  0x99   : > { %2073 = vmatpush3.bf16.msra.mxu0 %v2171_v59 }
  0x9a   : > { %2074 = vmatprep.subr.bf16.mxu0 %v2184_v1 }
  0x9d   : > { %2075 = vmatpush3.bf16.msra.mxu0 %v2172_v3 }
  0x9e   : > { %2076 = vmatprep.subr.bf16.mxu0 %v2184_v1 }
  0xa1   : > { %2077 = vmatpush3.bf16.msra.mxu0 %v2173_v5 }
  0xa2   : > { %2078 = vmatprep.subr.bf16.mxu0 %v2184_v1 }
  0xa5   : > { %2079 = vmatpush3.bf16.msra.mxu0 %v2174_v6 }
  0xa6   : > { %2080 = vmatprep.subr.bf16.mxu0 %v2184_v1 }
  0xa9   : > { %2081 = vmatpush3.bf16.msra.mxu0 %v2175_v9 }
  0xac   : > { %2083 = vmatmul.mubr.bf16.vlgmr.msra.gmra.mxu0 %v1440_v37 }
  0xec   : > { %v350_v10 = vpop.f32.mrf.mxu0 }
  0xed   : > { %v457_v11 = vpop.f32.mrf.mxu1 }
  0xee   : > { %v458_v14 = vadd.f32 %v457_v11, %v350_v10  ;;  %v1924_v16 = vpop.f32.mrf.mxu0 }
  0xef   : > { %v1944_v17 = vpop.f32.mrf.mxu1 }
  0xf0   : > { %v353_v18 = vpop.f32.mrf.mxu0 }
  0xf1   : > { %v460_v42 = vpop.f32.mrf.mxu1 }
  0xf2   : > { %v461_v19 = vadd.f32 %v460_v42, %v353_v18  ;;  %v1925_v20 = vpop.f32.mrf.mxu0 }
  0xf3   : > { %v1945_v22 = vpop.f32.mrf.mxu1 }
 0x10c   : > { %v648_v31 = vpop.f32.mrf.mxu0 }
 0x10d   : > { %v778_v38 = vpop.f32.mrf.mxu1  ;;  %v655_v23 = vadd.f32 %v648_v31, %v458_v14 }
 0x10e   : > { %v1964_v7 = vpop.f32.mrf.mxu0 }
 0x10f   : > { %v1984_v1 = vpop.f32.mrf.mxu1  ;;  %v785_v8 = vadd.f32 %v778_v38, %v655_v23 }
 0x110   : > { %v651_v24 = vpop.f32.mrf.mxu0 }
 0x111   : > { %v781_v27 = vpop.f32.mrf.mxu1  ;;  %v656_v28 = vadd.f32 %v651_v24, %v461_v19 }
 0x112   : > { %v1965_v29 = vpop.f32.mrf.mxu0 }
 0x113   : > { %v1985_v30 = vpop.f32.mrf.mxu1  ;;  %v786_v32 = vadd.f32 %v781_v27, %v656_v28 }
 0x12c   : > { %v936_v33 = vpop.f32.mrf.mxu0 }
 0x12d   : > { %v1122_v34 = vpop.f32.mrf.mxu1  ;;  %v943_v41 = vadd.f32 %v936_v33, %v785_v8 }
 0x12e   : > { %v2004_v35 = vpop.f32.mrf.mxu0 }
 0x12f   : > { %v2024_v39 = vpop.f32.mrf.mxu1  ;;  %v1129_v26 = vadd.f32 %v1122_v34, %v943_v41 }
 0x130   : > { %v939_v40 = vpop.f32.mrf.mxu0 }
 0x131   : > { %v1125_v43 = vpop.f32.mrf.mxu1  ;;  %v944_v51 = vadd.f32 %v939_v40, %v786_v32 }
 0x132   : > { %v2005_v44 = vpop.f32.mrf.mxu0 }
 0x133   : > { %v2025_v45 = vpop.f32.mrf.mxu1  ;;  %v1130_v53 = vadd.f32 %v1125_v43, %v944_v51 }
 0x14c   : > { %v1249_v46 = vpop.f32.mrf.mxu0 }
 0x14d   : > { %v1383_v47 = vpop.f32.mrf.mxu1  ;;  %v1256_v52 = vadd.f32 %v1249_v46, %v1129_v26 }
 0x14e   : > { %v2044_v48 = vpop.f32.mrf.mxu0 }
 0x14f   : > { %v2064_v25 = vpop.f32.mrf.mxu1  ;;  %v1390_v54 = vadd.f32 %v1383_v47, %v1256_v52 }
 0x150   : > { %v1252_v50 = vpop.f32.mrf.mxu0 }
 0x151   : > { %v1386_v49 = vpop.f32.mrf.mxu1  ;;  %v1257_v55 = vadd.f32 %v1252_v50, %v1130_v53 }
 0x152   : > { %v2045_v36 = vpop.f32.mrf.mxu0 }
 0x153   : > { %v2065_v37 = vpop.f32.mrf.mxu1  ;;  %v1391_v61 = vadd.f32 %v1386_v49, %v1257_v55 }
 0x16c   : > { %v1524_v56 = vpop.f32.mrf.mxu0 }
 0x16d   : > { %v1531_v57 = vadd.f32 %v1524_v56, %v1390_v54 }
 0x16e   : > { %v2084_v60 = vpop.f32.mrf.mxu0 }
 0x16f   : > { %v1540_v62 = vadd.f32 %v1821_v58, %v1531_v57 }
 0x170   : > { %v1527_v63 = vpop.f32.mrf.mxu0 }
 0x171   : > { %v1542_v0 = vmax.f32 %v1540_v62, 0.0  ;;  %v1532_v12 = vadd.f32 %v1527_v63, %v1391_v61 }
 0x172   : > { %v2085_v13 = vpop.f32.mrf.mxu0 }
 0x173   : > { %v1546_v15 = vcombine.high %v1542_v0, %v1542_v0  ;;  %v1550_v2 = vpack.c.bf16 %v1542_v0, %v1542_v0  ;;  %v1541_v21 = vadd.f32 %v1821_v58, %v1532_v12 }
 0x175   : > { %v1551_v4 = vpack.c.bf16 %v1546_v15, %v1546_v15  ;;  %1554 = vst [vmem:[%s170_s19] sm:$0x3] %v1550_v2  ;;  %v1543_v59 = vmax.f32 %v1541_v21, 0.0 }
 0x177   : > { %1555 = vst [vmem:[%s170_s19 + $0x2] sm:$0x3] %v1551_v4  ;;  %v1547_v3 = vcombine.high %v1543_v59, %v1543_v59  ;;  %v1552_v5 = vpack.c.bf16 %v1543_v59, %v1543_v59 }
 0x179   : > { %v1553_v6 = vpack.c.bf16 %v1547_v3, %v1547_v3  ;;  %1556 = vst [vmem:[%s170_s19 + $0x4] sm:$0x3] %v1552_v5 }
 0x17b   : > { %1557 = vst [vmem:[%s170_s19 + $0x6] sm:$0x3] %v1553_v6 }
 0x17c PF: > { %s13_s12 = sadd.s32 1, %s2182_s12  }
 0x17d   : > { %p10_p4 = scmp.ge.s32.totalorder %s13_s12, 10  }
 0x17f   :  { %12 = sbr.rel (!%p10_p4) target bundleno = 1 (0x1), region = 70 }

// kernel: mr_cnn_lstm_forward.6
= control target key start
LH: loop header
LB: loop body
LE: loop exit
PB: predicated region body
PF: predicated region fallthrough
CT: control target
= control target key end

     0   :  { %s2006_s12 = smov 0   ;;  %s2428_s0 = inlined_call_operand.vmem [shape: bf16[8,3,3,512], index: 0, kind: input, shape index: {}]   ;;  %s2429_s1 = inlined_call_operand.vmem [shape: bf16[9,128,128], index: 1, kind: input, shape index: {}]   ;;  %s2430_s2 = inlined_call_operand.vmem [shape: f32[1,128], index: 2, kind: input, shape index: {}]   ;;  %s2431_s3 = inlined_call_operand.vmem [shape: bf16[8,1,128], index: 3, kind: output, shape index: {}]  }
   0x1 LB: > { %s1416_s13 = sadd.s32 4294967295, %s1981_s12   ;;  %p1420_p0 = scmp.ge.s32.totalorder %s1981_s12, 1  ;;  %s1981_s12 = sphi %s2006_s12, %s13_s12  }
   0x2   : > { %p137_p1 = scmp.lt.s32.totalorder %s1981_s12, 9 }
   0x4   : > { %p138_p2 = pnand %p1420_p0, %p137_p1 }
   0x5   : > { %p159_p3 = scmp.lt.s32.totalorder (!%p138_p2), %s1416_s13, 7 }
   0x6   : > { %141 = sbr.rel (%p138_p2) target bundleno = 390 (0x186), region = 32 }
   0xb   : > { %v1901_v0 = vld [vmem:[%s2429_s1 + $0x78] sm:$0xff]   ;;  %v1983_v1 = vmov 0.0   ;;  %v1903_v3 = vld [vmem:[%s2429_s1 + $0x70] sm:$0xff]   ;;  %vm1984_vm0 = vmmov 0   ;;  %v1905_v5 = vld [vmem:[%s2429_s1 + $0x68] sm:$0xff]   ;;  %s2435_s13 = smov (!%p159_p3, %s1416_s13), 7  ;;  %v192_v9 = vlaneseq }
   0xc   : > { %1709 = vmatprep.subr.bf16.mxu0 %v1983_v1  ;;  %1729 = vmatprep.subr.bf16.mxu1 %v1983_v1  ;;  %v1902_v2 = vld [vmem:[%s2429_s1 + $0x38] sm:$0xff]   ;;  %v1904_v4 = vld [vmem:[%s2429_s1 + $0x30] sm:$0xff]   ;;  %v1906_v6 = vld [vmem:[%s2429_s1 + $0x28] sm:$0xff]   ;;  %s1889_s30 = smul.u32 24, %s2435_s13  ;;  %v1985_v13 = vmov 1966171168   ;;  %s166_s18 = scalar_lea.vmem %s2431_s3, %s2435_s13 }
   0xd   : > { %1710 = vmatpush3.bf16.msra.mxu0 %v1901_v0  ;;  %1725 = vmatprep.mubr.msk.bf16.mxu0 %vm1984_vm0, %v1983_v1  ;;  %v1907_v7 = vld [vmem:[%s2429_s1 + $0x60] sm:$0xff]   ;;  %v1909_v10 = vld [vmem:[%s2429_s1 + $0x58] sm:$0xff]   ;;  %v1911_v12 = vld [vmem:[%s2429_s1 + $0x50] sm:$0xff]   ;;  %v190_v14 = vunpack.c.l.s4 %v1985_v13  ;;  %v193_v15 = vshrl.u32 %v192_v9, 7  ;;  %vm432_vm1 = vsmask.f32 256 }
   0xe   : > { %1730 = vmatpush3.bf16.msra.mxu1 %v1902_v2  ;;  %1711 = vmatprep.subr.bf16.mxu0 %v1983_v1  ;;  %v1908_v8 = vld [vmem:[%s2429_s1 + $0x20] sm:$0xff]   ;;  %v1910_v11 = vld [vmem:[%s2429_s1 + $0x18] sm:$0xff]   ;;  %s2064_s10 = scalar_lea.vmem %s2428_s0, %s1889_s30  ;;  %v1912_v16 = vld [vmem:[%s2429_s1 + $0x10] sm:$0xff]   ;;  %vm433_vm2 = vsmask.f32 1284 }
   0xf   : > { %1731 = vmatprep.subr.bf16.mxu1 %v1983_v1  ;;  %1745 = vmatprep.mubr.msk.bf16.mxu1 %vm1984_vm0, %v1983_v1  ;;  %v168_v17 = vld [vmem:[%s2064_s10] sm:$0xff]  ;;  %v191_v18 = vunpack.c.0.s8 %v190_v14  ;;  %v2076_v19 = vld [vmem:[%s2064_s10 + $0x8] sm:$0xff]  ;;  %v1918_v34 = vld [vmem:[%s2429_s1 + $0xb8] sm:$0xff]   ;;  %vm435_vm3 = vsmask.f32 2312 }
  0x10   : > { %v1913_v21 = vld [vmem:[%s2429_s1 + $0x48] sm:$0xff]   ;;  %v326_v22 = vcombine.low %v168_v17, %v2076_v19  ;;  %v1915_v26 = vld [vmem:[%s2429_s1 + $0x40] sm:$0xff]   ;;  %v1919_v36 = vld [vmem:[%s2429_s1 + $0xf8] sm:$0xff]   ;;  %vm437_vm4 = vsmask.f32 3340 }
  0x11   : > { %1712 = vmatpush3.bf16.msra.mxu0 %v1903_v3  ;;  %v2078_v20 = vsub.s32 %v191_v18, %v193_v15  ;;  %v1914_v23 = vld [vmem:[%s2429_s1 + $0x8] sm:$0xff]   ;;  %v1916_v30 = vld [vmem:[%s2429_s1] sm:$0xff]   ;;  %v1920_v37 = vld [vmem:[%s2429_s1 + $0xb0] sm:$0xff]   ;;  %vm439_vm7 = vsmask.f32 4368 }
  0x12   : > { %1732 = vmatpush3.bf16.msra.mxu1 %v1904_v4  ;;  %1713 = vmatprep.subr.bf16.mxu0 %v1983_v1  ;;  %v1921_v38 = vld [vmem:[%s2429_s1 + $0xf0] sm:$0xff]   ;;  %vm434_vm5 = vmor %vm432_vm1, %vm433_vm2  ;;  %v1922_v41 = vld [vmem:[%s2429_s1 + $0xa8] sm:$0xff]   ;;  %vm441_vm10 = vsmask.f32 5396  ;;  %vm443_vm12 = vsmask.f32 6424 }
  0x13   : > { %1733 = vmatprep.subr.bf16.mxu1 %v1983_v1  ;;  %v2089_v24 = vrot.slane %v168_v17, %v2078_v20  ;;  %v2093_v25 = vrot.slane %v2076_v19, %v2078_v20  ;;  %v333_v29 = vrot.slane %v326_v22, %v2078_v20  ;;  %vm436_vm6 = vmor %vm434_vm5, %vm435_vm3  ;;  %v1923_v42 = vld [vmem:[%s2429_s1 + $0xe8] sm:$0xff]   ;;  %v1924_v46 = vld [vmem:[%s2429_s1 + $0xa0] sm:$0xff]   ;;  %vm445_vm14 = vsmask.f32 7452 }
  0x14   : > { %vm438_vm8 = vmor %vm436_vm6, %vm437_vm4  ;;  %v1925_v48 = vld [vmem:[%s2429_s1 + $0xe0] sm:$0xff]   ;;  %v1926_v50 = vld [vmem:[%s2429_s1 + $0x98] sm:$0xff]   ;;  %vm1364_vm2 = vcmask 1040384  }
  0x15   : > { %1714 = vmatpush3.bf16.msra.mxu0 %v1905_v5  ;;  %v203_v27 = vrot.slane %v2089_v24, 1  ;;  %v204_v28 = vrot.slane %v2093_v25, 1  ;;  %v340_v33 = vrot.slane %v333_v29, %v2078_v20  ;;  %v711_v39 = vrot.slane %v2089_v24, 3  ;;  %vm440_vm9 = vmor %vm438_vm8, %vm439_vm7  ;;  %v1927_v51 = vld [vmem:[%s2429_s1 + $0xd8] sm:$0xff]   ;;  %v1928_v57 = vld [vmem:[%s2429_s1 + $0x90] sm:$0xff]  }
  0x16   : > { %1734 = vmatpush3.bf16.msra.mxu1 %v1906_v6  ;;  %1715 = vmatprep.subr.bf16.mxu0 %v1983_v1  ;;  %v712_v40 = vrot.slane %v2093_v25, 3  ;;  %v430_v44 = vcombine.high %v2089_v24, %v2089_v24  ;;  %vm442_vm11 = vmor %vm440_vm9, %vm441_vm10  ;;  %v431_v47 = vcombine.high %v2093_v25, %v2093_v25  ;;  %v448_v52 = vshrl.u32 %v2089_v24, 16  ;;  %v1929_v62 = vld [vmem:[%s2429_s1 + $0xd0] sm:$0xff]   ;;  %v1930_v0 = vld [vmem:[%s2429_s1 + $0x88] sm:$0xff]  }
  0x17   : > { %1735 = vmatprep.subr.bf16.mxu1 %v1983_v1  ;;  %v222_v31 = vcombine.low %v203_v27, %v204_v28  ;;  %vm444_vm13 = vmor %vm442_vm11, %vm443_vm12  ;;  %v457_v54 = vshrl.u32 %v2093_v25, 16  ;;  %v587_v60 = vrot.slane %v2089_v24, 2  ;;  %v588_v61 = vrot.slane %v2093_v25, 2  ;;  %v1931_v3 = vld [vmem:[%s2429_s1 + $0xc8] sm:$0xff]   ;;  %v1932_v5 = vld [vmem:[%s2429_s1 + $0x80] sm:$0xff]  }
  0x18   : > { %v730_v43 = vcombine.low %v711_v39, %v712_v40  ;;  %v453_v53 = vshll.u32 %v430_v44, 16  ;;  %v462_v55 = vshll.u32 %v431_v47, 16  ;;  %vm2168_vm15 = vmor %vm444_vm13, %vm445_vm14  ;;  %v1934_v9 = vld [vmem:[%s2429_s1 + $0x138] sm:$0xff]   ;;  %v1937_v13 = vld [vmem:[%s2429_s1 + $0x170] sm:$0xff]  }
  0x19   : > { %1716 = vmatpush3.bf16.msra.mxu0 %v1907_v7  ;;  %v229_v32 = vrot.slane %v222_v31, %v2078_v20  ;;  %v606_v2 = vcombine.low %v587_v60, %v588_v61  ;;  %v1933_v7 = vld [vmem:[%s2429_s1 + $0xc0] sm:$0xff]   ;;  %v170_v14 = vld [vmem:[%s2064_s10 + $0x10] sm:$0xff]  ;;  %v1938_v17 = vld [vmem:[%s2429_s1 + $0x128] sm:$0xff]  }
  0x1a   : > { %1736 = vmatpush3.bf16.msra.mxu1 %v1908_v8  ;;  %1717 = vmatprep.subr.bf16.mxu0 %v1983_v1  ;;  %v737_v45 = vrot.slane %v730_v43, %v2078_v20  ;;  %v2178_v58 = vsel %vm2168_vm15, %v448_v52, %v453_v53  ;;  %v2182_v59 = vsel %vm2168_vm15, %v457_v54, %v462_v55  ;;  %v1939_v18 = vld [vmem:[%s2429_s1 + $0x168] sm:$0xff]   ;;  %v1940_v29 = vld [vmem:[%s2429_s1 + $0x120] sm:$0xff]   ;;  %v1945_v40 = vld [vmem:[%s2429_s1 + $0x150] sm:$0xff]  }
  0x1b   : > { %1737 = vmatprep.subr.bf16.mxu1 %v1983_v1  ;;  %v236_v35 = vrot.slane %v229_v32, %v2078_v20  ;;  %v482_v63 = vcombine.low %v2178_v58, %v2182_v59  ;;  %v613_v6 = vrot.slane %v606_v2, %v2078_v20  ;;  %v977_v15 = vcombine.low %v2076_v19, %v170_v14  ;;  %v1947_v43 = vld [vmem:[%s2429_s1 + $0x148] sm:$0xff]   ;;  %v1948_v44 = vld [vmem:[%s2429_s1 + $0x100] sm:$0xff]   ;;  %v1950_v47 = vld [vmem:[%s2429_s1 + $0x1b8] sm:$0xff]  }
  0x1c   : > { %v2156_v49 = vrot.slane %v737_v45, %v2078_v20  ;;  %v836_v39 = vrot.slane %v2182_v59, 2  ;;  %v1953_v52 = vld [vmem:[%s2429_s1 + $0x1f0] sm:$0xff]   ;;  %v1955_v53 = vld [vmem:[%s2429_s1 + $0x1e8] sm:$0xff]   ;;  %v1956_v54 = vld [vmem:[%s2429_s1 + $0x1a0] sm:$0xff]  }
  0x1d   : > { %1718 = vmatpush3.bf16.msra.mxu0 %v1909_v10  ;;  %v489_v4 = vrot.slane %v482_v63, %v2078_v20  ;;  %v620_v10 = vrot.slane %v613_v6, %v2078_v20  ;;  %v1957_v55 = vld [vmem:[%s2429_s1 + $0x1e0] sm:$0xff]   ;;  %v1958_v56 = vld [vmem:[%s2429_s1 + $0x198] sm:$0xff]   ;;  %v1962_v60 = vld [vmem:[%s2429_s1 + $0x188] sm:$0xff]  }
  0x1e   : > { %1738 = vmatpush3.bf16.msra.mxu1 %v1910_v11  ;;  %1719 = vmatprep.subr.bf16.mxu0 %v1983_v1  ;;  %v1935_v11 = vld [vmem:[%s2429_s1 + $0x178] sm:$0xff]   ;;  %v1963_v61 = vld [vmem:[%s2429_s1 + $0x1c8] sm:$0xff]   ;;  %v1965_v63 = vld [vmem:[%s2429_s1 + $0x1c0] sm:$0xff]  }
  0x1f   : > { %1739 = vmatprep.subr.bf16.mxu1 %v1983_v1  ;;  %v496_v8 = vrot.slane %v489_v4, %v2078_v20  ;;  %v1968_v2 = vld [vmem:[%s2429_s1 + $0x230] sm:$0xff]   ;;  %v1970_v4 = vld [vmem:[%s2429_s1 + $0x220] sm:$0xff]   ;;  %vm1365_vm3 = vmand %vm1364_vm2, %vm432_vm1 }
  0x20   : > { %v1972_v6 = vld [vmem:[%s2429_s1 + $0x210] sm:$0xff]  }
  0x21   : > { %1720 = vmatpush3.bf16.msra.mxu0 %v1911_v12  ;;  %v1936_v12 = vld [vmem:[%s2429_s1 + $0x130] sm:$0xff]  }
  0x22   : > { %1740 = vmatpush3.bf16.msra.mxu1 %v1912_v16  ;;  %1721 = vmatprep.subr.bf16.mxu0 %v1983_v1  ;;  %v1088_v16 = vrot.slane %v170_v14, %v2078_v20 }
  0x23   : > { %1741 = vmatprep.subr.bf16.mxu1 %v1983_v1 }
  0x24   : > { %v1089_v22 = vrot.slane %v1088_v16, 1  ;;  %v1214_v19 = vshrl.u32 %v1088_v16, 16 }
  0x25   : > { %1722 = vmatpush3.bf16.msra.mxu0 %v1913_v21  ;;  %v2244_v21 = vrot.slane %v977_v15, %v2078_v20 }
  0x26   : > { %1742 = vmatpush3.bf16.msra.mxu1 %v1914_v23  ;;  %1723 = vmatprep.subr.bf16.mxu0 %v1983_v1  ;;  %v1212_v23 = vcombine.high %v1088_v16, %v1088_v16 }
  0x27   : > { %1743 = vmatprep.subr.bf16.mxu1 %v1983_v1  ;;  %v991_v24 = vrot.slane %v2244_v21, %v2078_v20 }
  0x28   : > { %v1219_v27 = vshll.u32 %v1212_v23, 16 }
  0x29   : > { %1724 = vmatpush3.bf16.msra.mxu0 %v1915_v26  ;;  %v1107_v26 = vcombine.low %v204_v28, %v1089_v22 }
  0x2a   : > { %1744 = vmatpush3.bf16.msra.mxu1 %v1916_v30  ;;  %1749 = vmatprep.subr.bf16.mxu0 %v1983_v1  ;;  %v1941_v30 = vld [vmem:[%s2429_s1 + $0x160] sm:$0xff]   ;;  %v1221_v32 = vsel %vm2168_vm15, %v1214_v19, %v1219_v27 }
  0x2b   : > { %1769 = vmatprep.subr.bf16.mxu1 %v1983_v1  ;;  %v1114_v31 = vrot.slane %v1107_v26, %v2078_v20  ;;  %v1239_v25 = vcombine.low %v2182_v59, %v1221_v32  ;;  %v1961_v59 = vld [vmem:[%s2429_s1 + $0x1d0] sm:$0xff]  }
  0x2c   : > { %1726 = vmatmul.mubr.bf16.vlgmr.msra.gmra.mxu0 %v236_v35  ;;  %v1943_v35 = vld [vmem:[%s2429_s1 + $0x158] sm:$0xff]  }
  0x2d   : > { %1746 = vmatmul.mubr.bf16.vlgmr.msra.gmra.mxu1 %v340_v33  ;;  %1750 = vmatpush3.bf16.msra.mxu0 %v1918_v34  ;;  %v2264_v28 = vrot.slane %v1114_v31, %v2078_v20  ;;  %v1942_v33 = vld [vmem:[%s2429_s1 + $0x118] sm:$0xff]   ;;  %v2270_v34 = vrot.slane %v1239_v25, %v2078_v20 }
  0x2e   : > { %1770 = vmatpush3.bf16.msra.mxu1 %v1919_v36  ;;  %1751 = vmatprep.subr.bf16.mxu0 %v1983_v1 }
  0x2f   : > { %1771 = vmatprep.subr.bf16.mxu1 %v1983_v1  ;;  %1765 = vmatprep.mubr.msk.bf16.mxu0 %vm1984_vm0, %v1983_v1  ;;  %v1253_v36 = vrot.slane %v2270_v34, %v2078_v20 }
  0x30   : > { %1785 = vmatprep.mubr.msk.bf16.mxu1 %vm1984_vm0, %v1983_v1 }
  0x31   : > { %1752 = vmatpush3.bf16.msra.mxu0 %v1920_v37  ;;  %v1944_v37 = vld [vmem:[%s2429_s1 + $0x110] sm:$0xff]  }
  0x32   : > { %1772 = vmatpush3.bf16.msra.mxu1 %v1921_v38  ;;  %1753 = vmatprep.subr.bf16.mxu0 %v1983_v1  ;;  %v835_v38 = vrot.slane %v2178_v58, 2  ;;  %v1960_v58 = vld [vmem:[%s2429_s1 + $0x190] sm:$0xff]  }
  0x33   : > { %1773 = vmatprep.subr.bf16.mxu1 %v1983_v1 }
  0x35   : > { %1754 = vmatpush3.bf16.msra.mxu0 %v1922_v41  ;;  %v1946_v41 = vld [vmem:[%s2429_s1 + $0x108] sm:$0xff]  }
  0x36   : > { %1774 = vmatpush3.bf16.msra.mxu1 %v1923_v42  ;;  %1755 = vmatprep.subr.bf16.mxu0 %v1983_v1  ;;  %v854_v42 = vcombine.low %v835_v38, %v836_v39 }
  0x37   : > { %1775 = vmatprep.subr.bf16.mxu1 %v1983_v1 }
  0x38   : > { %v861_v45 = vrot.slane %v854_v42, %v2078_v20 }
  0x39   : > { %1756 = vmatpush3.bf16.msra.mxu0 %v1924_v46  ;;  %v1949_v46 = vld [vmem:[%s2429_s1 + $0x140] sm:$0xff]  }
  0x3a   : > { %1776 = vmatpush3.bf16.msra.mxu1 %v1925_v48  ;;  %1757 = vmatprep.subr.bf16.mxu0 %v1983_v1  ;;  %v868_v48 = vrot.slane %v861_v45, %v2078_v20 }
  0x3b   : > { %1777 = vmatprep.subr.bf16.mxu1 %v1983_v1 }
  0x3d   : > { %1758 = vmatpush3.bf16.msra.mxu0 %v1926_v50  ;;  %v1951_v50 = vld [vmem:[%s2429_s1 + $0x1f8] sm:$0xff]  }
  0x3e   : > { %1778 = vmatpush3.bf16.msra.mxu1 %v1927_v51  ;;  %1759 = vmatprep.subr.bf16.mxu0 %v1983_v1  ;;  %v1952_v51 = vld [vmem:[%s2429_s1 + $0x1b0] sm:$0xff]  }
  0x3f   : > { %1779 = vmatprep.subr.bf16.mxu1 %v1983_v1 }
  0x41   : > { %1760 = vmatpush3.bf16.msra.mxu0 %v1928_v57  ;;  %v1959_v57 = vld [vmem:[%s2429_s1 + $0x1d8] sm:$0xff]  }
  0x42   : > { %1780 = vmatpush3.bf16.msra.mxu1 %v1929_v62  ;;  %1761 = vmatprep.subr.bf16.mxu0 %v1983_v1  ;;  %v1964_v62 = vld [vmem:[%s2429_s1 + $0x180] sm:$0xff]  }
  0x43   : > { %1781 = vmatprep.subr.bf16.mxu1 %v1983_v1 }
  0x45   : > { %1762 = vmatpush3.bf16.msra.mxu0 %v1930_v0  ;;  %v1967_v0 = vld [vmem:[%s2429_s1 + $0x238] sm:$0xff]  }
  0x46   : > { %1782 = vmatpush3.bf16.msra.mxu1 %v1931_v3  ;;  %1763 = vmatprep.subr.bf16.mxu0 %v1983_v1  ;;  %v1969_v3 = vld [vmem:[%s2429_s1 + $0x228] sm:$0xff]  }
  0x47   : > { %1783 = vmatprep.subr.bf16.mxu1 %v1983_v1 }
  0x49   : > { %1764 = vmatpush3.bf16.msra.mxu0 %v1932_v5  ;;  %v1971_v5 = vld [vmem:[%s2429_s1 + $0x218] sm:$0xff]  }
  0x4a   : > { %1784 = vmatpush3.bf16.msra.mxu1 %v1933_v7  ;;  %1789 = vmatprep.subr.bf16.mxu0 %v1983_v1  ;;  %v1973_v7 = vld [vmem:[%s2429_s1 + $0x208] sm:$0xff]  }
  0x4b   : > { %1809 = vmatprep.subr.bf16.mxu1 %v1983_v1 }
  0x4c   : > { %1766 = vmatmul.mubr.bf16.vlgmr.msra.gmra.mxu0 %v496_v8  ;;  %v1974_v8 = vld [vmem:[%s2429_s1 + $0x200] sm:$0xff]  }
  0x4d   : > { %1790 = vmatpush3.bf16.msra.mxu0 %v1934_v9  ;;  %1786 = vmatmul.mubr.bf16.vlgmr.msra.gmra.mxu1 %v620_v10 }
  0x4e   : > { %1810 = vmatpush3.bf16.msra.mxu1 %v1935_v11  ;;  %1791 = vmatprep.subr.bf16.mxu0 %v1983_v1 }
  0x4f   : > { %1811 = vmatprep.subr.bf16.mxu1 %v1983_v1  ;;  %1805 = vmatprep.mubr.msk.bf16.mxu0 %vm1984_vm0, %v1983_v1 }
  0x50   : > { %1825 = vmatprep.mubr.msk.bf16.mxu1 %vm1984_vm0, %v1983_v1 }
  0x51   : > { %1792 = vmatpush3.bf16.msra.mxu0 %v1936_v12 }
  0x52   : > { %1812 = vmatpush3.bf16.msra.mxu1 %v1937_v13  ;;  %1793 = vmatprep.subr.bf16.mxu0 %v1983_v1 }
  0x53   : > { %1813 = vmatprep.subr.bf16.mxu1 %v1983_v1 }
  0x55   : > { %1794 = vmatpush3.bf16.msra.mxu0 %v1938_v17 }
  0x56   : > { %1814 = vmatpush3.bf16.msra.mxu1 %v1939_v18  ;;  %1795 = vmatprep.subr.bf16.mxu0 %v1983_v1 }
  0x57   : > { %1815 = vmatprep.subr.bf16.mxu1 %v1983_v1 }
  0x59   : > { %1796 = vmatpush3.bf16.msra.mxu0 %v1940_v29 }
  0x5a   : > { %1816 = vmatpush3.bf16.msra.mxu1 %v1941_v30  ;;  %1797 = vmatprep.subr.bf16.mxu0 %v1983_v1 }
  0x5b   : > { %1817 = vmatprep.subr.bf16.mxu1 %v1983_v1 }
  0x5d   : > { %1798 = vmatpush3.bf16.msra.mxu0 %v1942_v33 }
  0x5e   : > { %1818 = vmatpush3.bf16.msra.mxu1 %v1943_v35  ;;  %1799 = vmatprep.subr.bf16.mxu0 %v1983_v1 }
  0x5f   : > { %1819 = vmatprep.subr.bf16.mxu1 %v1983_v1 }
  0x61   : > { %1800 = vmatpush3.bf16.msra.mxu0 %v1944_v37 }
  0x62   : > { %1820 = vmatpush3.bf16.msra.mxu1 %v1945_v40  ;;  %1801 = vmatprep.subr.bf16.mxu0 %v1983_v1 }
  0x63   : > { %1821 = vmatprep.subr.bf16.mxu1 %v1983_v1 }
  0x65   : > { %1802 = vmatpush3.bf16.msra.mxu0 %v1946_v41 }
  0x66   : > { %1822 = vmatpush3.bf16.msra.mxu1 %v1947_v43  ;;  %1803 = vmatprep.subr.bf16.mxu0 %v1983_v1 }
  0x67   : > { %1823 = vmatprep.subr.bf16.mxu1 %v1983_v1 }
  0x69   : > { %1804 = vmatpush3.bf16.msra.mxu0 %v1948_v44 }
  0x6a   : > { %1824 = vmatpush3.bf16.msra.mxu1 %v1949_v46  ;;  %1829 = vmatprep.subr.bf16.mxu0 %v1983_v1 }
  0x6b   : > { %1849 = vmatprep.subr.bf16.mxu1 %v1983_v1 }
  0x6c   : > { %1806 = vmatmul.mubr.bf16.vlgmr.msra.gmra.mxu0 %v2156_v49  ;;  %v1954_v49 = vld [vmem:[%s2429_s1 + $0x1a8] sm:$0xff]  }
  0x6d   : > { %1830 = vmatpush3.bf16.msra.mxu0 %v1950_v47  ;;  %1826 = vmatmul.mubr.bf16.vlgmr.msra.gmra.mxu1 %v868_v48  ;;  %v1625_v48 = vld [vmem:[%s2430_s2] ss:$0 sm:$0xff] }
  0x6e   : > { %1850 = vmatpush3.bf16.msra.mxu1 %v1951_v50  ;;  %1831 = vmatprep.subr.bf16.mxu0 %v1983_v1 }
  0x6f   : > { %1851 = vmatprep.subr.bf16.mxu1 %v1983_v1  ;;  %1845 = vmatprep.mubr.msk.bf16.mxu0 %vm1984_vm0, %v1983_v1 }
  0x70   : > { %1865 = vmatprep.mubr.msk.bf16.mxu1 %vm1984_vm0, %v1983_v1 }
  0x71   : > { %1832 = vmatpush3.bf16.msra.mxu0 %v1952_v51 }
  0x72   : > { %1852 = vmatpush3.bf16.msra.mxu1 %v1953_v52  ;;  %1833 = vmatprep.subr.bf16.mxu0 %v1983_v1 }
  0x73   : > { %1853 = vmatprep.subr.bf16.mxu1 %v1983_v1 }
  0x75   : > { %1834 = vmatpush3.bf16.msra.mxu0 %v1954_v49 }
  0x76   : > { %1854 = vmatpush3.bf16.msra.mxu1 %v1955_v53  ;;  %1835 = vmatprep.subr.bf16.mxu0 %v1983_v1 }
  0x77   : > { %1855 = vmatprep.subr.bf16.mxu1 %v1983_v1 }
  0x79   : > { %1836 = vmatpush3.bf16.msra.mxu0 %v1956_v54 }
  0x7a   : > { %1856 = vmatpush3.bf16.msra.mxu1 %v1957_v55  ;;  %1837 = vmatprep.subr.bf16.mxu0 %v1983_v1 }
  0x7b   : > { %1857 = vmatprep.subr.bf16.mxu1 %v1983_v1 }
  0x7d   : > { %1838 = vmatpush3.bf16.msra.mxu0 %v1958_v56 }
  0x7e   : > { %1858 = vmatpush3.bf16.msra.mxu1 %v1959_v57  ;;  %1839 = vmatprep.subr.bf16.mxu0 %v1983_v1 }
  0x7f   : > { %1859 = vmatprep.subr.bf16.mxu1 %v1983_v1 }
  0x81   : > { %1840 = vmatpush3.bf16.msra.mxu0 %v1960_v58 }
  0x82   : > { %1860 = vmatpush3.bf16.msra.mxu1 %v1961_v59  ;;  %1841 = vmatprep.subr.bf16.mxu0 %v1983_v1 }
  0x83   : > { %1861 = vmatprep.subr.bf16.mxu1 %v1983_v1 }
  0x85   : > { %1842 = vmatpush3.bf16.msra.mxu0 %v1962_v60 }
  0x86   : > { %1862 = vmatpush3.bf16.msra.mxu1 %v1963_v61  ;;  %1843 = vmatprep.subr.bf16.mxu0 %v1983_v1 }
  0x87   : > { %1863 = vmatprep.subr.bf16.mxu1 %v1983_v1 }
  0x89   : > { %1844 = vmatpush3.bf16.msra.mxu0 %v1964_v62 }
  0x8a   : > { %1864 = vmatpush3.bf16.msra.mxu1 %v1965_v63  ;;  %1869 = vmatprep.subr.bf16.mxu0 %v1983_v1  ;;  %v1366_v63 = vld [vmem:[%s166_s18] sm:$0x1] }
  0x8c   : > { %1846 = vmatmul.mubr.bf16.vlgmr.msra.gmra.mxu0 %v991_v24 }
  0x8d   : > { %1870 = vmatpush3.bf16.msra.mxu0 %v1967_v0  ;;  %1866 = vmatmul.mubr.bf16.vlgmr.msra.gmra.mxu1 %v2264_v28 }
  0x8e   : > { %1871 = vmatprep.subr.bf16.mxu0 %v1983_v1  ;;  %1885 = vmatprep.mubr.msk.bf16.mxu0 %vm1984_vm0, %v1983_v1  ;;  %vm1353_vm0 = vcmask 1043456  }
  0x91   : > { %1872 = vmatpush3.bf16.msra.mxu0 %v1968_v2 }
  0x92   : > { %1873 = vmatprep.subr.bf16.mxu0 %v1983_v1 }
  0x95   : > { %1874 = vmatpush3.bf16.msra.mxu0 %v1969_v3 }
  0x96   : > { %1875 = vmatprep.subr.bf16.mxu0 %v1983_v1 }
  0x99   : > { %1876 = vmatpush3.bf16.msra.mxu0 %v1970_v4 }
  0x9a   : > { %1877 = vmatprep.subr.bf16.mxu0 %v1983_v1 }
  0x9d   : > { %1878 = vmatpush3.bf16.msra.mxu0 %v1971_v5 }
  0x9e   : > { %1879 = vmatprep.subr.bf16.mxu0 %v1983_v1 }
  0xa1   : > { %1880 = vmatpush3.bf16.msra.mxu0 %v1972_v6 }
  0xa2   : > { %1881 = vmatprep.subr.bf16.mxu0 %v1983_v1 }
  0xa5   : > { %1882 = vmatpush3.bf16.msra.mxu0 %v1973_v7 }
  0xa6   : > { %1883 = vmatprep.subr.bf16.mxu0 %v1983_v1 }
  0xa9   : > { %1884 = vmatpush3.bf16.msra.mxu0 %v1974_v8 }
  0xac   : > { %1886 = vmatmul.mubr.bf16.vlgmr.msra.gmra.mxu0 %v1253_v36 }
  0xec   : > { %v320_v9 = vpop.f32.mrf.mxu0 }
  0xed   : > { %v424_v10 = vpop.f32.mrf.mxu1 }
  0xee   : > { %v425_v11 = vadd.f32 %v424_v10, %v320_v9  ;;  %v1727_v12 = vpop.f32.mrf.mxu0 }
  0xef   : > { %v1747_v13 = vpop.f32.mrf.mxu1 }
  0xf0   : > { %v323_v14 = vpop.f32.mrf.mxu0 }
  0xf1   : > { %v427_v15 = vpop.f32.mrf.mxu1 }
  0xf2   : > { %v1728_v16 = vpop.f32.mrf.mxu0 }
  0xf3   : > { %v1748_v17 = vpop.f32.mrf.mxu1 }
 0x10c   : > { %v580_v18 = vpop.f32.mrf.mxu0 }
 0x10d   : > { %v586_v21 = vadd.f32 %v580_v18, %v425_v11  ;;  %v704_v22 = vpop.f32.mrf.mxu1 }
 0x10e   : > { %v1767_v23 = vpop.f32.mrf.mxu0 }
 0x10f   : > { %v710_v19 = vadd.f32 %v704_v22, %v586_v21  ;;  %v1787_v1 = vpop.f32.mrf.mxu1 }
 0x110   : > { %v583_v24 = vpop.f32.mrf.mxu0 }
 0x111   : > { %v707_v26 = vpop.f32.mrf.mxu1 }
 0x112   : > { %v1768_v27 = vpop.f32.mrf.mxu0 }
 0x113   : > { %v1788_v20 = vpop.f32.mrf.mxu1 }
 0x12c   : > { %v828_v29 = vpop.f32.mrf.mxu0 }
 0x12d   : > { %v952_v30 = vpop.f32.mrf.mxu1  ;;  %v834_v43 = vadd.f32 %v828_v29, %v710_v19 }
 0x12e   : > { %v1807_v31 = vpop.f32.mrf.mxu0 }
 0x12f   : > { %v1827_v32 = vpop.f32.mrf.mxu1  ;;  %v958_v44 = vadd.f32 %v952_v30, %v834_v43 }
 0x130   : > { %v831_v25 = vpop.f32.mrf.mxu0 }
 0x131   : > { %v955_v28 = vpop.f32.mrf.mxu1 }
 0x132   : > { %v1808_v33 = vpop.f32.mrf.mxu0 }
 0x133   : > { %v1828_v34 = vpop.f32.mrf.mxu1 }
 0x14c   : > { %v1075_v35 = vpop.f32.mrf.mxu0 }
 0x14d   : > { %v1205_v36 = vpop.f32.mrf.mxu1  ;;  %v1081_v45 = vadd.f32 %v1075_v35, %v958_v44 }
 0x14e   : > { %v1847_v37 = vpop.f32.mrf.mxu0 }
 0x14f   : > { %v1867_v38 = vpop.f32.mrf.mxu1  ;;  %v1211_v46 = vadd.f32 %v1205_v36, %v1081_v45 }
 0x150   : > { %v1078_v39 = vpop.f32.mrf.mxu0 }
 0x151   : > { %v1208_v40 = vpop.f32.mrf.mxu1 }
 0x152   : > { %v1848_v41 = vpop.f32.mrf.mxu0 }
 0x153   : > { %v1868_v42 = vpop.f32.mrf.mxu1 }
 0x16c   : > { %v1337_v47 = vpop.f32.mrf.mxu0 }
 0x16d   : > { %v1343_v50 = vadd.f32 %v1337_v47, %v1211_v46 }
 0x16e   : > { %v1887_v51 = vpop.f32.mrf.mxu0 }
 0x16f   : > { %v1351_v52 = vadd.f32 %v1625_v48, %v1343_v50 }
 0x170   : > { %v1340_v49 = vpop.f32.mrf.mxu0 }
 0x171   : > { %v1352_v53 = vmax.f32 %v1351_v52, 0.0 }
 0x172   : > { %v1888_v54 = vpop.f32.mrf.mxu0 }
 0x173   : > { %v1354_v55 = vsel %vm1353_vm0, %v1352_v53, 0.0 }
 0x174   : > { %v1355_v56 = vrot.slane %v1354_v55, 4 }
 0x176   : > { %v1356_v57 = vadd.f32 %v1355_v56, %v1354_v55 }
 0x178   : > { %v1357_v58 = vrot.slane %v1356_v57, 2 }
 0x17a   : > { %v1358_v59 = vadd.f32 %v1357_v58, %v1356_v57 }
 0x17c   : > { %v1359_v60 = vrot.slane %v1358_v59, 1 }
 0x17e   : > { %v1360_v61 = vadd.f32 %v1359_v60, %v1358_v59 }
 0x180   : > { %v1362_v62 = vmul.f32 0.25, %v1360_v61 }
 0x182   : > { %v1363_v0 = vpack.c.bf16 %v1362_v62, %v1362_v62 }
 0x184   : > { %v1367_v2 = vsel %vm1365_vm3, %v1363_v0, %v1366_v63 }
 0x185   : > { %1368 = vst [vmem:[%s166_s18] sm:$0x1] %v1367_v2 }
 0x186 PF: > { %s13_s12 = sadd.s32 1, %s1981_s12  }
 0x187   : > { %p10_p4 = scmp.ge.s32.totalorder %s13_s12, 10  }
 0x189   :  { %12 = sbr.rel (!%p10_p4) target bundleno = 1 (0x1), region = 70 }

// kernel: mr_cnn_lstm_forward.7
= control target key start
LH: loop header
LB: loop body
LE: loop exit
PB: predicated region body
PF: predicated region fallthrough
CT: control target
= control target key end

     0   :  { %v1114_v2 = vmov 0   ;;  %s1412_s0 = inlined_call_operand.vmem [shape: bf16[8,256], index: 0, kind: input, shape index: {}]   ;;  %s1413_s1 = inlined_call_operand.vmem [shape: bf16[256,256], index: 1, kind: input, shape index: {}]   ;;  %s1414_s2 = inlined_call_operand.vmem [shape: f32[4,2,256], index: 2, kind: input, shape index: {}]   ;;  %s1415_s3 = inlined_call_operand.vmem [shape: bf16[64,256], index: 3, kind: input, shape index: {}]   ;;  %s1416_s4 = inlined_call_operand.vmem [shape: bf16[128,128], index: 4, kind: input, shape index: {}]   ;;  %s1417_s5 = inlined_call_operand.vmem [shape: f32[1,128], index: 5, kind: input, shape index: {}]   ;;  %s1418_s6 = inlined_call_operand.hbm [shape: f32[2,128], index: 6, kind: output, shape index: {}]  }
   0x1   :  { %v990_v0 = vld [vmem:[%s1413_s1 + $0x74] ss:$8 sps:$4 sm:$0xff]   ;;  %v992_v1 = vld [vmem:[%s1413_s1 + $0x70] ss:$8 sps:$4 sm:$0xff]   ;;  %396 = vmatprep.mubr.bf16.mxu1 %v1114_v2  ;;  %v993_v3 = vld [vmem:[%s1413_s1 + $0x64] ss:$8 sps:$4 sm:$0xff]  }
   0x2   :  { %225 = vmatprep.subr.bf16.mxu0 %v990_v0  ;;  %v995_v4 = vld [vmem:[%s1413_s1 + $0x60] ss:$8 sps:$4 sm:$0xff]   ;;  %v996_v5 = vld [vmem:[%s1413_s1 + $0x54] ss:$8 sps:$4 sm:$0xff]   ;;  %v998_v6 = vld [vmem:[%s1413_s1 + $0x50] ss:$8 sps:$4 sm:$0xff]  }
   0x3   :  { %226 = vmatpush1.bf16.msra.mxu0 %v992_v1  ;;  %v999_v7 = vld [vmem:[%s1413_s1 + $0x44] ss:$8 sps:$4 sm:$0xff]   ;;  %v1001_v8 = vld [vmem:[%s1413_s1 + $0x40] ss:$8 sps:$4 sm:$0xff]   ;;  %v1002_v9 = vld [vmem:[%s1413_s1 + $0x34] ss:$8 sps:$4 sm:$0xff]  }
   0x4   :  { %227 = vmatprep.subr.bf16.mxu0 %v993_v3  ;;  %v1004_v10 = vld [vmem:[%s1413_s1 + $0x30] ss:$8 sps:$4 sm:$0xff]   ;;  %v1005_v11 = vld [vmem:[%s1413_s1 + $0x24] ss:$8 sps:$4 sm:$0xff]   ;;  %v1007_v12 = vld [vmem:[%s1413_s1 + $0x20] ss:$8 sps:$4 sm:$0xff]  }
   0x5   :  { %v1195_v13 = vld [vmem:[%s1415_s3 + $0x34] ss:$8 sps:$4 sm:$0xff]   ;;  %v1200_v14 = vld [vmem:[%s1415_s3 + $0x30] ss:$8 sps:$4 sm:$0xff]   ;;  %v1209_v16 = vld [vmem:[%s1415_s3 + $0x24] ss:$8 sps:$4 sm:$0xff]  }
   0x6   :  { %v1008_v15 = vld [vmem:[%s1413_s1 + $0x14] ss:$8 sps:$4 sm:$0xff]   ;;  %372 = vmatprep.subr.bf16.mxu1 %v1195_v13  ;;  %v1215_v17 = vld [vmem:[%s1415_s3 + $0x20] ss:$8 sps:$4 sm:$0xff]   ;;  %v1010_v18 = vld [vmem:[%s1413_s1 + $0x10] ss:$8 sps:$4 sm:$0xff]  }
   0x7   :  { %228 = vmatpush1.bf16.msra.mxu0 %v995_v4  ;;  %373 = vmatpush1.bf16.msra.mxu1 %v1200_v14  ;;  %v1011_v19 = vld [vmem:[%s1413_s1 + $0x4] ss:$8 sps:$4 sm:$0xff]   ;;  %v1227_v20 = vld [vmem:[%s1415_s3 + $0x14] ss:$8 sps:$4 sm:$0xff]   ;;  %v1013_v21 = vld [vmem:[%s1413_s1] ss:$8 sps:$4 sm:$0xff]  }
   0x8   :  { %229 = vmatprep.subr.bf16.mxu0 %v996_v5  ;;  %374 = vmatprep.subr.bf16.mxu1 %v1209_v16  ;;  %v25_v22 = vld [vmem:[%s1412_s0] sm:$0xff]  ;;  %v1014_v23 = vld [vmem:[%s1413_s1 + $0xf4] ss:$8 sps:$4 sm:$0xff]   ;;  %v1242_v24 = vld [vmem:[%s1415_s3 + $0x10] ss:$8 sps:$4 sm:$0xff]  }
   0x9   :  { %v897_v25 = vcombine.high %v25_v22, %v25_v22  ;;  %v1247_v26 = vld [vmem:[%s1415_s3 + $0x4] ss:$8 sps:$4 sm:$0xff]   ;;  %v1253_v27 = vld [vmem:[%s1415_s3] ss:$8 sps:$4 sm:$0xff]   ;;  %v1016_v28 = vld [vmem:[%s1413_s1 + $0xf0] ss:$8 sps:$4 sm:$0xff]  }
   0xa   :  { %v1017_v29 = vld [vmem:[%s1413_s1 + $0xe4] ss:$8 sps:$4 sm:$0xff]  }
   0xb   :  { %230 = vmatpush1.bf16.msra.mxu0 %v998_v6  ;;  %375 = vmatpush1.bf16.msra.mxu1 %v1215_v17 }
   0xc   :  { %231 = vmatprep.subr.bf16.mxu0 %v999_v7  ;;  %376 = vmatprep.subr.bf16.mxu1 %v1227_v20 }
   0xd   :  { %257 = vmatprep.mubr.bf16.mxu0 %v897_v25 }
   0xf   :  { %232 = vmatpush1.bf16.msra.mxu0 %v1001_v8  ;;  %377 = vmatpush1.bf16.msra.mxu1 %v1242_v24 }
  0x10   :  { %233 = vmatprep.subr.bf16.mxu0 %v1002_v9  ;;  %378 = vmatprep.subr.bf16.mxu1 %v1247_v26 }
  0x13   :  { %234 = vmatpush1.bf16.msra.mxu0 %v1004_v10 }
  0x14   :  { %235 = vmatprep.subr.bf16.mxu0 %v1005_v11 }
  0x17   :  { %236 = vmatpush1.bf16.msra.mxu0 %v1007_v12 }
  0x18   :  { %237 = vmatprep.subr.bf16.mxu0 %v1008_v15 }
  0x1b   :  { %238 = vmatpush1.bf16.msra.mxu0 %v1010_v18 }
  0x1c   :  { %239 = vmatprep.subr.bf16.mxu0 %v1011_v19 }
  0x1f   :  { %240 = vmatpush1.bf16.msra.mxu0 %v1013_v21 }
  0x20   :  { %241 = vmatprep.subr.bf16.mxu0 %v1014_v23 }
  0x21   :  { %11 = vsyncpa [#allocation4], 0  ;;  %379 = vmatpush1.bf16.msra.mxu1 %v1253_v27  ;;  %v1019_v30 = vld [vmem:[%s1413_s1 + $0xe0] ss:$8 sps:$4 sm:$0xff]   ;;  %v1020_v31 = vld [vmem:[%s1413_s1 + $0xd4] ss:$8 sps:$4 sm:$0xff]   ;;  %v896_v43 = vcombine.low %v25_v22, %v25_v22  ;;  %v273_v50 = vlaneseq }
  0x22   :  { %474 = vmatprep.subr.bf16.mxu1 %v1195_v13  ;;  %v1022_v32 = vld [vmem:[%s1413_s1 + $0xd0] ss:$8 sps:$4 sm:$0xff]   ;;  %v1023_v33 = vld [vmem:[%s1413_s1 + $0xc4] ss:$8 sps:$4 sm:$0xff]   ;;  %v1025_v34 = vld [vmem:[%s1413_s1 + $0xc0] ss:$8 sps:$4 sm:$0xff]  }
  0x23   :  { %242 = vmatpush2.bf16.msra.mxu0 %v1016_v28  ;;  %v1026_v35 = vld [vmem:[%s1413_s1 + $0xb4] ss:$8 sps:$4 sm:$0xff]   ;;  %v1028_v36 = vld [vmem:[%s1413_s1 + $0xb0] ss:$8 sps:$4 sm:$0xff]   ;;  %v1029_v37 = vld [vmem:[%s1413_s1 + $0xa4] ss:$8 sps:$4 sm:$0xff]  }
  0x24   :  { %243 = vmatprep.subr.bf16.mxu0 %v1017_v29  ;;  %397 = vmatmul.mubr.bf16.vlgmr.msra.gmra.mxu1 %v1114_v2  ;;  %v1033_v38 = vld [vmem:[%s1413_s1 + $0xa0] ss:$8 sps:$4 sm:$0xff]   ;;  %v1035_v39 = vld [vmem:[%s1413_s1 + $0x94] ss:$8 sps:$4 sm:$0xff]   ;;  %v1039_v40 = vld [vmem:[%s1413_s1 + $0x90] ss:$8 sps:$4 sm:$0xff]  }
  0x25   :  { %475 = vmatpush1.bf16.msra.mxu1 %v1200_v14  ;;  %498 = vmatprep.mubr.bf16.mxu1 %v1114_v2  ;;  %v1041_v41 = vld [vmem:[%s1413_s1 + $0x84] ss:$8 sps:$4 sm:$0xff]   ;;  %v1045_v42 = vld [vmem:[%s1413_s1 + $0x80] ss:$8 sps:$4 sm:$0xff]   ;;  %v1115_v48 = vmov 1983009808  }
  0x26   :  { %476 = vmatprep.subr.bf16.mxu1 %v1209_v16  ;;  %v271_v49 = vunpack.c.l.s4 %v1115_v48  ;;  %v274_v52 = vshrl.u32 %v273_v50, 7  ;;  %v290_v58 = vld [vmem:[%s1414_s2] sm:$0xf]  ;;  %v292_v59 = vld [vmem:[%s1414_s2 + $0x8] sm:$0xf]  ;;  %v311_v21 = vand.u32 127, %v273_v50 }
  0x27   :  { %244 = vmatpush2.bf16.msra.mxu0 %v1019_v30  ;;  %v291_v63 = vld [vmem:[%s1414_s2 + $0x4] sm:$0xf]  ;;  %v293_v0 = vld [vmem:[%s1414_s2 + $0xc] sm:$0xf]  ;;  %s1116_s2 = smov 64   ;;  %vm360_vm1 = vcmask 523264  }
  0x28   :  { %245 = vmatprep.subr.bf16.mxu0 %v1020_v31  ;;  %v272_v51 = vunpack.c.0.s8 %v271_v49  ;;  %v1331_v23 = vadd.s32 128, %v311_v21  ;;  %vm1118_vm2 = vmmov 0   ;;  %s1119_s27 = smov [#allocation3]  }
  0x29   :  { %477 = vmatpush1.bf16.msra.mxu1 %v1215_v17 }
  0x2a   :  { %478 = vmatprep.subr.bf16.mxu1 %v1227_v20  ;;  %v1314_v54 = vsub.s32 %v272_v51, %v274_v52  ;;  %vm316_vm0 = vcmp.lt.s32.totalorder %v1331_v23, 192  ;;  %v1054_v23 = vld [vmem:[%s1416_s4 + $0x28] sm:$0xff]  }
  0x2b   :  { %246 = vmatpush2.bf16.msra.mxu0 %v1022_v32 }
  0x2c   :  { %247 = vmatprep.subr.bf16.mxu0 %v1023_v33 }
  0x2d   :  { %479 = vmatpush1.bf16.msra.mxu1 %v1242_v24 }
  0x2e   :  { %480 = vmatprep.subr.bf16.mxu1 %v1247_v26 }
  0x2f   :  { %248 = vmatpush2.bf16.msra.mxu0 %v1025_v34 }
  0x30   :  { %249 = vmatprep.subr.bf16.mxu0 %v1026_v35 }
  0x31   :  { %481 = vmatpush1.bf16.msra.mxu1 %v1253_v27 }
  0x32   :  { %576 = vmatprep.subr.bf16.mxu1 %v1195_v13 }
  0x33   :  { %250 = vmatpush2.bf16.msra.mxu0 %v1028_v36 }
  0x34   :  { %251 = vmatprep.subr.bf16.mxu0 %v1029_v37 }
  0x37   :  { %252 = vmatpush2.bf16.msra.mxu0 %v1033_v38 }
  0x38   :  { %253 = vmatprep.subr.bf16.mxu0 %v1035_v39 }
  0x3b   :  { %254 = vmatpush2.bf16.msra.mxu0 %v1039_v40 }
  0x3c   :  { %255 = vmatprep.subr.bf16.mxu0 %v1041_v41 }
  0x3f   :  { %256 = vmatpush2.bf16.msra.mxu0 %v1045_v42 }
  0x42   :  { %258 = vmatmul.mubr.bf16.vlgmr.msra.gmra.mxu0 %v896_v43 }
  0xe4   :  { %v398_v44 = vpop.f32.mrf.mxu1 }
  0xe6   :  { %v400_v45 = vpop.f32.mrf.mxu1 }
  0xe7   :  { %v407_v9 = vcombine.low %v398_v44, %v400_v45 }
  0xe8   :  { %v402_v46 = vpop.f32.mrf.mxu1 }
  0xe9   :  { %v414_v10 = vrot.slane %v407_v9, %v1314_v54 }
  0xea   :  { %v403_v47 = vpop.f32.mrf.mxu1 }
 0x102   :  { %v259_v53 = vpop.f32.mrf.mxu0 }
 0x104   :  { %v261_v55 = vpop.f32.mrf.mxu0 }
 0x105   :  { %v268_v56 = vcombine.low %v259_v53, %v261_v55  ;;  %v269_v57 = vcombine.high %v259_v53, %v261_v55 }
 0x106   :  { %v263_v60 = vpop.f32.mrf.mxu0 }
 0x107   :  { %v276_v61 = vrot.slane %v268_v56, %v1314_v54  ;;  %v283_v62 = vrot.slane %v269_v57, %v1314_v54 }
 0x108   :  { %v264_v1 = vpop.f32.mrf.mxu0 }
 0x109   :  { %v284_v3 = vcombine.high %v276_v61, %v276_v61  ;;  %v285_v4 = vcombine.high %v283_v62, %v283_v62  ;;  %v294_v5 = vadd.f32 %v290_v58, %v276_v61  ;;  %v296_v6 = vadd.f32 %v292_v59, %v283_v62 }
 0x10b   :  { %v295_v7 = vadd.f32 %v291_v63, %v284_v3  ;;  %v297_v8 = vadd.f32 %v293_v0, %v285_v4  ;;  %298 = vst [vmem:[#allocation2] sm:$0xf] %v294_v5  ;;  %300 = vst [vmem:[#allocation2 + $0x8] sm:$0xf] %v296_v6 }
 0x10d   :  { %299 = vst [vmem:[#allocation2 + $0x4] sm:$0xf] %v295_v7  ;;  %301 = vst [vmem:[#allocation2 + $0xc] sm:$0xf] %v297_v8 }
 0x112   :  { %v319_v11 = vld [vmem:[#allocation2] sm:$0xf]  ;;  %v561_v8 = vld [vmem:[#allocation2 + $0x8] sm:$0xf] }
 0x113   :  { %v416_v12 = vadd.f32 %v414_v10, %v319_v11 }
 0x114   :  { %v459_v46 = vld [vmem:[#allocation2 + $0x4] sm:$0xf] }
 0x115   :  { %v938_v15 = vmul.f32 -1.442695, %v416_v12 }
 0x117   :  { %1060 = vpow2.f32 %v938_v15 }
 0x118   :  { %1062 = vtanh.f32 %v416_v12 }
 0x124   :  { %v1061_v18 = vpop.eup %1060 }
 0x125   :  { %v420_v19 = vadd.f32 1.0, %v1061_v18  ;;  %v1063_v22 = vpop.eup %1062 }
 0x126   :  { %v431_v25 = vrot.slane %v1063_v22, %v1314_v54 }
 0x127   :  { %1064 = vrcp.f32 %v420_v19 }
 0x128   :  { %v432_v30 = vcombine.high %v431_v25, %v431_v25 }
 0x134   :  { %v1065_v28 = vpop.eup %1064 }
 0x135   :  { %v442_v29 = vrot.slane %v1065_v28, %v1314_v54 }
 0x137   :  { %v443_v31 = vcombine.high %v442_v29, %v442_v29  ;;  %v448_v34 = vmul.f32 0.0, %v442_v29 }
 0x139   :  { %v447_v32 = vsel %vm316_vm0, %v432_v30, %v443_v31 }
 0x13a   :  { %v449_v33 = vmul.f32 %v447_v32, %v442_v29 }
 0x13c   :  { %451 = vrot.lane.b32.xlu0 %v449_v33, %s1116_s2 }
 0x1ae   :  { %v452_v35 = vpop.permute.xlu0 %451 }
 0x1af   :  { %v454_v36 = vadd.f32 %v452_v35, %v448_v34 }
 0x1b1   :  { %1066 = vtanh.f32 %v454_v36 }
 0x1be   :  { %v1067_v37 = vpop.eup %1066 }
 0x1bf   :  { %v456_v38 = vmul.f32 %v1067_v37, %v447_v32 }
 0x1c1   :  { %v457_v39 = vpack.c.bf16 %v456_v38, %v456_v38 }
 0x1c3   :  { %461 = vrot.lane.b32.xlu0 %v457_v39, %s1116_s2 }
 0x235   :  { %v462_v40 = vpop.permute.xlu0 %461 }
 0x236   :  { %939 = vmatmul.mubr.msk.bf16.vlgmr.msra.gmra.mxu1 %vm360_vm1, %v462_v40 }
 0x237   :  { %577 = vmatpush1.bf16.msra.mxu1 %v1200_v14  ;;  %600 = vmatprep.mubr.bf16.mxu1 %v1114_v2 }
 0x238   :  { %578 = vmatprep.subr.bf16.mxu1 %v1209_v16 }
 0x23b   :  { %579 = vmatpush1.bf16.msra.mxu1 %v1215_v17 }
 0x23c   :  { %580 = vmatprep.subr.bf16.mxu1 %v1227_v20 }
 0x23f   :  { %581 = vmatpush1.bf16.msra.mxu1 %v1242_v24 }
 0x240   :  { %582 = vmatprep.subr.bf16.mxu1 %v1247_v26 }
 0x243   :  { %583 = vmatpush1.bf16.msra.mxu1 %v1253_v27 }
 0x244   :  { %678 = vmatprep.subr.bf16.mxu1 %v1195_v13 }
 0x2f6   :  { %v500_v41 = vpop.f32.mrf.mxu1 }
 0x2f8   :  { %v502_v42 = vpop.f32.mrf.mxu1 }
 0x2f9   :  { %v509_v43 = vcombine.low %v500_v41, %v502_v42 }
 0x2fa   :  { %v504_v44 = vpop.f32.mrf.mxu1 }
 0x2fb   :  { %v516_v45 = vrot.slane %v509_v43, %v1314_v54 }
 0x2fc   :  { %v505_v47 = vpop.f32.mrf.mxu1 }
 0x2fd   :  { %v518_v48 = vadd.f32 %v516_v45, %v459_v46 }
 0x2ff   :  { %v940_v49 = vmul.f32 -1.442695, %v518_v48 }
 0x301   :  { %1068 = vpow2.f32 %v940_v49 }
 0x302   :  { %1070 = vtanh.f32 %v518_v48 }
 0x30e   :  { %v1069_v50 = vpop.eup %1068 }
 0x30f   :  { %v522_v51 = vadd.f32 1.0, %v1069_v50  ;;  %v1071_v52 = vpop.eup %1070  ;;  %v1052_v50 = vld [vmem:[%s1416_s4 + $0x38] sm:$0xff]  }
 0x310   :  { %v533_v53 = vrot.slane %v1071_v52, %v1314_v54  ;;  %v1055_v52 = vld [vmem:[%s1416_s4 + $0x20] sm:$0xff]  }
 0x311   :  { %1072 = vrcp.f32 %v522_v51  ;;  %v1117_v51 = vmov 0.0  }
 0x312   :  { %v534_v56 = vcombine.high %v533_v53, %v533_v53  ;;  %964 = vmatprep.subr.bf16.mxu0 %v1117_v51  ;;  %980 = vmatprep.mubr.msk.bf16.mxu0 %vm1118_vm2, %v1117_v51  ;;  %v1056_v53 = vld [vmem:[%s1416_s4 + $0x18] sm:$0xff]  }
 0x313   :  { %965 = vmatpush3.bf16.msra.mxu0 %v1052_v50 }
 0x314   :  { %966 = vmatprep.subr.bf16.mxu0 %v1117_v51 }
 0x31e   :  { %v1073_v55 = vpop.eup %1072 }
 0x31f   :  { %v544_v13 = vrot.slane %v1073_v55, %v1314_v54  ;;  %v1057_v55 = vld [vmem:[%s1416_s4 + $0x10] sm:$0xff]  }
 0x321   :  { %v545_v57 = vcombine.high %v544_v13, %v544_v13  ;;  %v550_v60 = vmul.f32 %v544_v13, %v454_v36  ;;  %v663_v36 = vld [vmem:[#allocation2 + $0xc] sm:$0xf] }
 0x323   :  { %v549_v58 = vsel %vm316_vm0, %v534_v56, %v545_v57  ;;  %v1059_v56 = vld [vmem:[%s1416_s4] sm:$0xff]  }
 0x324   :  { %v551_v59 = vmul.f32 %v549_v58, %v544_v13  ;;  %v1058_v13 = vld [vmem:[%s1416_s4 + $0x8] sm:$0xff]  }
 0x326   :  { %553 = vrot.lane.b32.xlu1 %v551_v59, %s1116_s2 }
 0x398   :  { %v554_v61 = vpop.permute.xlu1 %553 }
 0x399   :  { %v556_v62 = vadd.f32 %v554_v61, %v550_v60 }
 0x39b   :  { %1074 = vtanh.f32 %v556_v62 }
 0x3a8   :  { %v1075_v63 = vpop.eup %1074 }
 0x3a9   :  { %v558_v0 = vmul.f32 %v1075_v63, %v549_v58 }
 0x3ab   :  { %v559_v1 = vpack.c.bf16 %v558_v0, %v558_v0  ;;  %v945_v0 = vld [vmem:[%s1417_s5] ss:$0 sm:$0xff] }
 0x3ad   :  { %563 = vrot.lane.b32.xlu1 %v559_v1, %s1116_s2 }
 0x41f   :  { %v564_v3 = vpop.permute.xlu1 %563 }
 0x420   :  { %941 = vmatmul.mubr.msk.bf16.vlgmr.msra.gmra.mxu1 %vm360_vm1, %v564_v3 }
 0x421   :  { %679 = vmatpush1.bf16.msra.mxu1 %v1200_v14  ;;  %702 = vmatprep.mubr.bf16.mxu1 %v1114_v2 }
 0x422   :  { %680 = vmatprep.subr.bf16.mxu1 %v1209_v16 }
 0x425   :  { %681 = vmatpush1.bf16.msra.mxu1 %v1215_v17 }
 0x426   :  { %682 = vmatprep.subr.bf16.mxu1 %v1227_v20 }
 0x429   :  { %683 = vmatpush1.bf16.msra.mxu1 %v1242_v24 }
 0x42a   :  { %684 = vmatprep.subr.bf16.mxu1 %v1247_v26 }
 0x42d   :  { %685 = vmatpush1.bf16.msra.mxu1 %v1253_v27 }
 0x4e0   :  { %v602_v4 = vpop.f32.mrf.mxu1 }
 0x4e2   :  { %v604_v5 = vpop.f32.mrf.mxu1 }
 0x4e3   :  { %v611_v6 = vcombine.low %v602_v4, %v604_v5 }
 0x4e4   :  { %v606_v7 = vpop.f32.mrf.mxu1 }
 0x4e5   :  { %v618_v14 = vrot.slane %v611_v6, %v1314_v54 }
 0x4e6   :  { %v607_v2 = vpop.f32.mrf.mxu1 }
 0x4e7   :  { %v620_v9 = vadd.f32 %v618_v14, %v561_v8 }
 0x4e9   :  { %v942_v16 = vmul.f32 -1.442695, %v620_v9 }
 0x4eb   :  { %1076 = vpow2.f32 %v942_v16 }
 0x4ec   :  { %1078 = vtanh.f32 %v620_v9 }
 0x4f8   :  { %v1077_v17 = vpop.eup %1076 }
 0x4f9   :  { %v624_v20 = vadd.f32 1.0, %v1077_v17  ;;  %v1079_v24 = vpop.eup %1078 }
 0x4fa   :  { %v635_v26 = vrot.slane %v1079_v24, %v1314_v54 }
 0x4fb   :  { %1080 = vrcp.f32 %v624_v20 }
 0x4fc   :  { %v636_v11 = vcombine.high %v635_v26, %v635_v26 }
 0x508   :  { %v1081_v10 = vpop.eup %1080 }
 0x509   :  { %v646_v27 = vrot.slane %v1081_v10, %v1314_v54 }
 0x50b   :  { %v647_v12 = vcombine.high %v646_v27, %v646_v27  ;;  %v652_v19 = vmul.f32 %v646_v27, %v556_v62 }
 0x50d   :  { %v651_v15 = vsel %vm316_vm0, %v636_v11, %v647_v12 }
 0x50e   :  { %v653_v18 = vmul.f32 %v651_v15, %v646_v27 }
 0x510   :  { %655 = vrot.lane.b32.xlu0 %v653_v18, %s1116_s2 }
 0x582   :  { %v656_v21 = vpop.permute.xlu0 %655 }
 0x583   :  { %v658_v22 = vadd.f32 %v656_v21, %v652_v19 }
 0x585   :  { %1082 = vtanh.f32 %v658_v22 }
 0x592   :  { %v1083_v25 = vpop.eup %1082 }
 0x593   :  { %v660_v28 = vmul.f32 %v1083_v25, %v651_v15 }
 0x595   :  { %v661_v29 = vpack.c.bf16 %v660_v28, %v660_v28 }
 0x597   :  { %665 = vrot.lane.b32.xlu1 %v661_v29, %s1116_s2 }
 0x609   :  { %v666_v30 = vpop.permute.xlu1 %665 }
 0x60a   :  { %943 = vmatmul.mubr.msk.bf16.vlgmr.msra.gmra.mxu1 %vm360_vm1, %v666_v30 }
 0x6ca   :  { %v704_v31 = vpop.f32.mrf.mxu1 }
 0x6cc   :  { %v706_v32 = vpop.f32.mrf.mxu1 }
 0x6cd   :  { %v713_v33 = vcombine.low %v704_v31, %v706_v32 }
 0x6ce   :  { %v708_v34 = vpop.f32.mrf.mxu1 }
 0x6cf   :  { %v720_v35 = vrot.slane %v713_v33, %v1314_v54 }
 0x6d0   :  { %v709_v37 = vpop.f32.mrf.mxu1 }
 0x6d1   :  { %v722_v38 = vadd.f32 %v720_v35, %v663_v36 }
 0x6d3   :  { %v944_v39 = vmul.f32 -1.442695, %v722_v38 }
 0x6d5   :  { %1084 = vpow2.f32 %v944_v39 }
 0x6d6   :  { %1086 = vtanh.f32 %v722_v38 }
 0x6e2   :  { %v1085_v40 = vpop.eup %1084 }
 0x6e3   :  { %v726_v41 = vadd.f32 1.0, %v1085_v40  ;;  %v1087_v42 = vpop.eup %1086 }
 0x6e4   :  { %v737_v43 = vrot.slane %v1087_v42, %v1314_v54 }
 0x6e5   :  { %1088 = vrcp.f32 %v726_v41 }
 0x6e6   :  { %v738_v46 = vcombine.high %v737_v43, %v737_v43 }
 0x6f2   :  { %v1089_v44 = vpop.eup %1088 }
 0x6f3   :  { %v748_v45 = vrot.slane %v1089_v44, %v1314_v54  ;;  %v1053_v54 = vld [vmem:[%s1416_s4 + $0x30] sm:$0xff]   ;;  %s888_s4 = sshll.u32 %s1119_s27, 4  ;;  %s889_s4 = int_to_ptr.vmem [resolvable:$true] %s888_s4 }
 0x6f4   :  { %967 = vmatpush3.bf16.msra.mxu0 %v1053_v54  ;;  %s1092_s1 = scalar_lea.vmem %s889_s4, 32  ;;  %p1097_p1 = scmp.lt.s32.totalorder %s889_s4, %s889_s4 }
 0x6f5   :  { %v749_v47 = vcombine.high %v748_v45, %v748_v45  ;;  %968 = vmatprep.subr.bf16.mxu0 %v1117_v51  ;;  %v754_v57 = vmul.f32 %v748_v45, %v658_v22  ;;  %p1093_p0 = scmp.ne.s32.totalorder %s889_s4, %s1092_s1  ;;  %p1098_p2 = scmp.lt.s32.totalorder %s1092_s1, %s1092_s1 }
 0x6f7   :  { %v753_v48 = vsel %vm316_vm0, %v738_v46, %v749_v47  ;;  %p1099_p3 = por %p1098_p2, %p1097_p1 }
 0x6f8   :  { %v755_v49 = vmul.f32 %v753_v48, %v748_v45  ;;  %969 = vmatpush3.bf16.msra.mxu0 %v1054_v23 }
 0x6f9   :  { %970 = vmatprep.subr.bf16.mxu0 %v1117_v51  ;;  %p1100_p4 = pnand %p1099_p3, %p1093_p0 }
 0x6fa   :  { %757 = vrot.lane.b32.xlu0 %v755_v49, %s1116_s2 }
 0x6fc   :  { %971 = vmatpush3.bf16.msra.mxu0 %v1055_v52 }
 0x6fd   :  { %972 = vmatprep.subr.bf16.mxu0 %v1117_v51 }
 0x700   :  { %973 = vmatpush3.bf16.msra.mxu0 %v1056_v53 }
 0x701   :  { %974 = vmatprep.subr.bf16.mxu0 %v1117_v51 }
 0x704   :  { %975 = vmatpush3.bf16.msra.mxu0 %v1057_v55 }
 0x705   :  { %976 = vmatprep.subr.bf16.mxu0 %v1117_v51 }
 0x708   :  { %977 = vmatpush3.bf16.msra.mxu0 %v1058_v13 }
 0x709   :  { %978 = vmatprep.subr.bf16.mxu0 %v1117_v51 }
 0x70c   :  { %979 = vmatpush3.bf16.msra.mxu0 %v1059_v56 }
 0x76c   :  { %v758_v58 = vpop.permute.xlu0 %757 }
 0x76d   :  { %v760_v59 = vadd.f32 %v758_v58, %v754_v57 }
 0x76f   :  { %1090 = vtanh.f32 %v760_v59 }
 0x77c   :  { %v1091_v60 = vpop.eup %1090 }
 0x77d   :  { %v762_v61 = vmul.f32 %v1091_v60, %v753_v48 }
 0x77f   :  { %v763_v62 = vpack.c.bf16 %v762_v61, %v762_v61 }
 0x781   :  { %765 = vrot.lane.b32.xlu1 %v763_v62, %s1116_s2 }
 0x7f3   :  { %v766_v63 = vpop.permute.xlu1 %765 }
 0x7f4   :  { %981 = vmatmul.mubr.msk.bf16.vlgmr.msra.gmra.mxu0 %vm360_vm1, %v766_v63 }
 0x8b4   :  { %v875_v1 = vpop.f32.mrf.mxu0 }
 0x8b5   :  { %v876_v3 = vadd.f32 %v945_v0, %v875_v1 }
 0x8b6   :  { %v982_v4 = vpop.f32.mrf.mxu0 }
 0x8b7   :  { %881 = vst [vmem:[#allocation3] sm:$0x3] %v876_v3 }
 0x8b8   :  { %v878_v5 = vpop.f32.mrf.mxu0 }
 0x8b9   :  { %1103 = shalt.err (!%p1100_p4)
}
 0x8ba   :  { %891 = dma.vmem_to_hbm [thread:$0]  %s889_s4, 32, %s1418_s6, [#allocation4]   ;;  %v983_v6 = vpop.f32.mrf.mxu0 }
 0x8bb   :  { %1112 = dma.done.wait [#allocation4], 32  }
 0x8bc   :  { %1113 = vsyncadd [#allocation4], 4294967264 }
 0x8bd   :  { %895 = vsyncpa [#allocation4], 1 }

</bundles_post_ra>
